<compile_context>
chip_gen: v7x
topology: tpu7x:2x2x1
jax: 0.10.0
libtpu: 0.0.40
codegen_flags: <defaults>
</compile_context>

<pallas_src>
import numpy as np
import jax
import jax.numpy as jnp
from jax.experimental import pallas as pl
from jax.experimental.pallas import tpu as pltpu

# ----------------------------- model config ---------------------------------
B = 2           # batch
C = 3           # input channels
IMG = 32        # spatial size
PATCH = 8       # patch size
NP = (IMG // PATCH) ** 2   # 16 patches
T = NP + 1                 # +1 CLS token -> 17
TP = 24                    # token axis padded to next multiple of 8 sublanes
E = 64          # embed dim
HEADS = 4
HD = E // HEADS  # 16
MLP = 4 * E      # 256
DEPTH = 2
EPS = 1e-6
CPP = C * PATCH * PATCH    # 192
SCALE = 1.0 / (HD ** 0.5)
BT = B * TP                # 48 rows in the fused token slab

_VMEM = pl.BlockSpec(memory_space=pltpu.MemorySpace.VMEM)


# ----------------------------- in-kernel helpers -----------------------------
def _ln(x, w, b):
    mu = jnp.mean(x, axis=-1, keepdims=True)
    xc = x - mu
    var = jnp.mean(xc * xc, axis=-1, keepdims=True)
    return xc * jax.lax.rsqrt(var + EPS) * w + b


def _gelu(x):
    # TODO(synk): nn.GELU() is exact erf-GELU; tanh approximation used here
    # (erf lowering availability on Mosaic is not guaranteed).
    c = jnp.float32(0.7978845608028654)
    return 0.5 * x * (1.0 + jnp.tanh(c * (x + 0.044715 * x * x * x)))


# ----------------------------- fused ViT kernel ------------------------------
def _vit_kernel(patches_ref, patch_w_ref, bias_ref, attn_bias_ref,
                ln1_w_ref, ln1_b_ref, qkv_w_ref, qkv_b_ref,
                proj_w_ref, proj_b_ref,
                ln2_w_ref, ln2_b_ref, fc1_w_ref, fc1_b_ref,
                fc2_w_ref, fc2_b_ref,
                norm_w_ref, norm_b_ref,
                out_ref,
                qkv_buf, attn_buf):
    f32 = jnp.float32

    # ---- patch embedding: (B*TP, CPP) @ (CPP, E) + folded bias slab ----
    # bias_ref already contains patch bias, CLS token and positional embedding
    # (zeros for pad rows), so this single matmul+add yields the token slab.
    x = jnp.dot(patches_ref[...], patch_w_ref[...],
                preferred_element_type=f32) + bias_ref[...]            # (BT, E)

    # Additive attention mask (constant input): 0 where (same batch AND key < T),
    # -1e30 elsewhere (cross-batch blocks + pad keys).
    attn_bias = attn_bias_ref[...]                                     # (BT, BT)

    for d in range(DEPTH):
        # ---------------- attention branch ----------------
        h = _ln(x, ln1_w_ref[d], ln1_b_ref[d])
        qkv_buf[...] = jnp.dot(h, qkv_w_ref[d],
                               preferred_element_type=f32) + qkv_b_ref[d]  # (BT, 3E)

        for hh in range(HEADS):
            c0 = hh * HD
            q = qkv_buf[:, c0:c0 + HD] * SCALE                         # (BT, HD)
            k = qkv_buf[:, E + c0:E + c0 + HD]                         # (BT, HD)
            v = qkv_buf[:, 2 * E + c0:2 * E + c0 + HD]                 # (BT, HD)
            # Batched-over-batch scores; cross-batch blocks are masked to -inf,
            # so the block-diagonal softmax*V equals per-batch attention.
            s = jax.lax.dot_general(q, k, (((1,), (1,)), ((), ())),
                                    preferred_element_type=f32)        # (BT, BT)
            s = s + attn_bias
            m = jnp.max(s, axis=-1, keepdims=True)
            p = jnp.exp(s - m)
            denom = jnp.sum(p, axis=-1, keepdims=True)
            p = p * pl.reciprocal(denom, approx=True)
            attn_buf[:, c0:c0 + HD] = jnp.dot(
                p, v, preferred_element_type=f32)                      # (BT, HD)

        proj = jnp.dot(attn_buf[...], proj_w_ref[d],
                       preferred_element_type=f32) + proj_b_ref[d]
        x = x + proj

        # ---------------- MLP branch ----------------
        h = _ln(x, ln2_w_ref[d], ln2_b_ref[d])
        h = _gelu(jnp.dot(h, fc1_w_ref[d], preferred_element_type=f32)
                  + fc1_b_ref[d])
        h = jnp.dot(h, fc2_w_ref[d], preferred_element_type=f32) + fc2_b_ref[d]
        x = x + h

    # ---- final norm + CLS-token extraction (num_classes=0 => token features) ----
    xf = _ln(x, norm_w_ref[...], norm_b_ref[...])
    for b in range(B):
        out_ref[b:b + 1, :] = xf[b * TP:b * TP + 1, :]


# ----------------------------- forward wrapper -------------------------------
def feature_extractor_forward(x, params):
    """x: (B, C, IMG, IMG) float32 -> (B, E) CLS-token features."""
    Bb = x.shape[0]
    assert Bb == B and x.shape[1:] == (C, IMG, IMG), x.shape
    nh = nw = IMG // PATCH

    # im2col (conv with kernel == stride == patch rewritten as matmul), padded
    # so each batch occupies TP rows: row 0 = CLS slot (zeros), rows 1..T-1 =
    # patches, remaining rows = pad. Ordering matches conv weight flattening.
    patches = (x.reshape(Bb, C, nh, PATCH, nw, PATCH)
                .transpose(0, 2, 4, 1, 3, 5)
                .reshape(Bb, NP, CPP))
    patches_padded = jnp.concatenate(
        [jnp.zeros((Bb, 1, CPP), x.dtype), patches,
         jnp.zeros((Bb, TP - T, CPP), x.dtype)], axis=1).reshape(Bb * TP, CPP)

    # Fold CLS token, positional embedding and patch bias into one additive
    # (B*TP, E) slab (parameter-only math; constant-folded under jit).
    pos = params["pos_embed"][0]                                   # (T, E)
    bias_block = jnp.concatenate(
        [params["cls_token"].reshape(1, E) + pos[0:1],
         pos[1:T] + params["patch_b"][None, :],
         jnp.zeros((TP - T, E), jnp.float32)], axis=0)             # (TP, E)
    bias_slab = jnp.tile(bias_block, (Bb, 1))                      # (B*TP, E)

    # Additive attention mask: block-diagonal over batches, pad keys disabled.
    row_b = np.arange(BT)[:, None] // TP
    col = np.arange(BT)[None, :]
    valid = (row_b == (col // TP)) & ((col % TP) < T)
    attn_bias = jnp.asarray(np.where(valid, 0.0, -1e30), dtype=jnp.float32)  # (BT, BT)

    return pl.pallas_call(
        _vit_kernel,
        out_shape=jax.ShapeDtypeStruct((Bb, E), jnp.float32),
        in_specs=[_VMEM] * 18,
        out_specs=_VMEM,
        scratch_shapes=[pltpu.VMEM((BT, 3 * E), jnp.float32),   # qkv slab
                        pltpu.VMEM((BT, E), jnp.float32)],      # attn output
    )(patches_padded, params["patch_w"], bias_slab, attn_bias,
      params["ln1_w"].reshape(DEPTH, 1, E), params["ln1_b"].reshape(DEPTH, 1, E),
      params["qkv_w"], params["qkv_b"].reshape(DEPTH, 1, 3 * E),
      params["proj_w"], params["proj_b"].reshape(DEPTH, 1, E),
      params["ln2_w"].reshape(DEPTH, 1, E), params["ln2_b"].reshape(DEPTH, 1, E),
      params["fc1_w"], params["fc1_b"].reshape(DEPTH, 1, MLP),
      params["fc2_w"], params["fc2_b"].reshape(DEPTH, 1, E),
      params["norm_w"].reshape(1, E), params["norm_b"].reshape(1, E))


# ----------------------------- parameter init --------------------------------
def init_params(key):
    def normal(k, shape, std=0.02):
        return (std * jax.random.normal(k, shape)).astype(jnp.float32)

    keys = jax.random.split(key, 3 + DEPTH)
    p = {
        "patch_w": normal(keys[0], (CPP, E)),
        "patch_b": jnp.zeros((E,), jnp.float32),
        "cls_token": normal(keys[1], (1, 1, E)),
        "pos_embed": normal(keys[2], (1, T, E)),
        "norm_w": jnp.ones((E,), jnp.float32),
        "norm_b": jnp.zeros((E,), jnp.float32),
        # per-block parameters, stacked along a leading DEPTH axis
        "ln1_w": jnp.ones((DEPTH, E), jnp.float32),
        "ln1_b": jnp.zeros((DEPTH, E), jnp.float32),
        "ln2_w": jnp.ones((DEPTH, E), jnp.float32),
        "ln2_b": jnp.zeros((DEPTH, E), jnp.float32),
        "qkv_b": jnp.zeros((DEPTH, 3 * E), jnp.float32),
        "proj_b": jnp.zeros((DEPTH, E), jnp.float32),
        "fc1_b": jnp.zeros((DEPTH, MLP), jnp.float32),
        "fc2_b": jnp.zeros((DEPTH, E), jnp.float32),
    }
    qkv_w, proj_w, fc1_w, fc2_w = [], [], [], []
    for d in range(DEPTH):
        bk = jax.random.split(keys[3 + d], 4)
        qkv_w.append(normal(bk[0], (E, 3 * E)))
        proj_w.append(normal(bk[1], (E, E)))
        fc1_w.append(normal(bk[2], (E, MLP)))
        fc2_w.append(normal(bk[3], (MLP, E)))
    p["qkv_w"] = jnp.stack(qkv_w)    # (DEPTH, E, 3E)
    p["proj_w"] = jnp.stack(proj_w)  # (DEPTH, E, E)
    p["fc1_w"] = jnp.stack(fc1_w)    # (DEPTH, E, MLP)
    p["fc2_w"] = jnp.stack(fc2_w)    # (DEPTH, MLP, E)
    return p


# ----------------------------------- main ------------------------------------
if __name__ == "__main__":
    key = jax.random.PRNGKey(0)
    k_x, k_p = jax.random.split(key)
    x = jax.random.normal(k_x, (B, C, IMG, IMG), dtype=jnp.float32)
    params = init_params(k_p)

    feats = jax.jit(feature_extractor_forward)(x, params)
    feats = jax.block_until_ready(feats)

    assert feats.shape == (B, E), feats.shape
    assert bool(jnp.all(jnp.isfinite(feats)))
    print("KERNEL_OK")
</pallas_src>

<mosaic_0001>
module attributes {stable_mosaic.version = 11 : i64} {
  func.func @_vit_kernel(%arg0: memref<48x192xf32, #tpu.memory_space<vmem>>, %arg1: memref<192x64xf32, #tpu.memory_space<vmem>>, %arg2: memref<48x64xf32, #tpu.memory_space<vmem>>, %arg3: memref<48x48xf32, #tpu.memory_space<vmem>>, %arg4: memref<2x1x64xf32, #tpu.memory_space<vmem>>, %arg5: memref<2x1x64xf32, #tpu.memory_space<vmem>>, %arg6: memref<2x64x192xf32, #tpu.memory_space<vmem>>, %arg7: memref<2x1x192xf32, #tpu.memory_space<vmem>>, %arg8: memref<2x64x64xf32, #tpu.memory_space<vmem>>, %arg9: memref<2x1x64xf32, #tpu.memory_space<vmem>>, %arg10: memref<2x1x64xf32, #tpu.memory_space<vmem>>, %arg11: memref<2x1x64xf32, #tpu.memory_space<vmem>>, %arg12: memref<2x64x256xf32, #tpu.memory_space<vmem>>, %arg13: memref<2x1x256xf32, #tpu.memory_space<vmem>>, %arg14: memref<2x256x64xf32, #tpu.memory_space<vmem>>, %arg15: memref<2x1x64xf32, #tpu.memory_space<vmem>>, %arg16: memref<1x64xf32, #tpu.memory_space<vmem>>, %arg17: memref<1x64xf32, #tpu.memory_space<vmem>>, %arg18: memref<2x64xf32, #tpu.memory_space<vmem>>, %arg19: memref<48x192xf32, #tpu.memory_space<vmem>>, %arg20: memref<48x64xf32, #tpu.memory_space<vmem>>) attributes {dimension_semantics = [], scalar_prefetch = 0 : i64, scratch_operands = 2 : i64, tpu.core_type = #tpu.core_type<tc>} {
    %c0 = arith.constant 0 : index
    %c0_0 = arith.constant 0 : index
    %0 = vector.load %arg0[%c0, %c0_0] : memref<48x192xf32, #tpu.memory_space<vmem>>, vector<48x192xf32>
    %c0_1 = arith.constant 0 : index
    %c0_2 = arith.constant 0 : index
    %1 = vector.load %arg1[%c0_1, %c0_2] : memref<192x64xf32, #tpu.memory_space<vmem>>, vector<192x64xf32>
    %cst = arith.constant dense<0.000000e+00> : vector<48x64xf32>
    %2 = tpu.matmul %0, %1, %cst {dimension_numbers = #tpu.dot_dimension_numbers<[1], [0], [0], [1], [0, 0, 1, 1], [], []>} : vector<48x192xf32>, vector<192x64xf32>, vector<48x64xf32> -> vector<48x64xf32>
    %c0_3 = arith.constant 0 : index
    %c0_4 = arith.constant 0 : index
    %3 = vector.load %arg2[%c0_3, %c0_4] : memref<48x64xf32, #tpu.memory_space<vmem>>, vector<48x64xf32>
    %4 = arith.addf %2, %3 : vector<48x64xf32>
    %c0_5 = arith.constant 0 : index
    %c0_6 = arith.constant 0 : index
    %5 = vector.load %arg3[%c0_5, %c0_6] : memref<48x48xf32, #tpu.memory_space<vmem>>, vector<48x48xf32>
    %c0_7 = arith.constant 0 : index
    %c0_8 = arith.constant 0 : index
    %c0_9 = arith.constant 0 : index
    %6 = vector.load %arg4[%c0_7, %c0_8, %c0_9] : memref<2x1x64xf32, #tpu.memory_space<vmem>>, vector<1x1x64xf32>
    %7 = vector.shape_cast %6 : vector<1x1x64xf32> to vector<1x64xf32>
    %c0_10 = arith.constant 0 : index
    %c0_11 = arith.constant 0 : index
    %c0_12 = arith.constant 0 : index
    %8 = vector.load %arg5[%c0_10, %c0_11, %c0_12] : memref<2x1x64xf32, #tpu.memory_space<vmem>>, vector<1x1x64xf32>
    %9 = vector.shape_cast %8 : vector<1x1x64xf32> to vector<1x64xf32>
    %cst_13 = arith.constant dense<0.000000e+00> : vector<48xf32>
    %10 = vector.multi_reduction <add>, %4, %cst_13 [1] : vector<48x64xf32> to vector<48xf32>
    %11 = vector.shape_cast %10 : vector<48xf32> to vector<48x1xf32>
    %cst_14 = arith.constant 6.400000e+01 : f32
    %12 = vector.broadcast %cst_14 : f32 to vector<48x1xf32>
    %13 = arith.divf %11, %12 : vector<48x1xf32>
    %14 = vector.broadcast %13 : vector<48x1xf32> to vector<48x64xf32>
    %15 = arith.subf %4, %14 : vector<48x64xf32>
    %16 = arith.mulf %15, %15 : vector<48x64xf32>
    %cst_15 = arith.constant dense<0.000000e+00> : vector<48xf32>
    %17 = vector.multi_reduction <add>, %16, %cst_15 [1] : vector<48x64xf32> to vector<48xf32>
    %18 = vector.shape_cast %17 : vector<48xf32> to vector<48x1xf32>
    %cst_16 = arith.constant 6.400000e+01 : f32
    %19 = vector.broadcast %cst_16 : f32 to vector<48x1xf32>
    %20 = arith.divf %18, %19 : vector<48x1xf32>
    %cst_17 = arith.constant 9.99999997E-7 : f32
    %21 = vector.broadcast %cst_17 : f32 to vector<48x1xf32>
    %22 = arith.addf %20, %21 : vector<48x1xf32>
    %23 = math.rsqrt %22 : vector<48x1xf32>
    %24 = vector.broadcast %23 : vector<48x1xf32> to vector<48x64xf32>
    %25 = arith.mulf %15, %24 : vector<48x64xf32>
    %26 = vector.broadcast %7 : vector<1x64xf32> to vector<48x64xf32>
    %27 = arith.mulf %25, %26 : vector<48x64xf32>
    %28 = vector.broadcast %9 : vector<1x64xf32> to vector<48x64xf32>
    %29 = arith.addf %27, %28 : vector<48x64xf32>
    %c0_18 = arith.constant 0 : index
    %c0_19 = arith.constant 0 : index
    %c0_20 = arith.constant 0 : index
    %30 = vector.load %arg6[%c0_18, %c0_19, %c0_20] : memref<2x64x192xf32, #tpu.memory_space<vmem>>, vector<1x64x192xf32>
    %31 = vector.shape_cast %30 : vector<1x64x192xf32> to vector<64x192xf32>
    %cst_21 = arith.constant dense<0.000000e+00> : vector<48x192xf32>
    %32 = tpu.matmul %29, %31, %cst_21 {dimension_numbers = #tpu.dot_dimension_numbers<[1], [0], [0], [1], [0, 0, 1, 1], [], []>} : vector<48x64xf32>, vector<64x192xf32>, vector<48x192xf32> -> vector<48x192xf32>
    %c0_22 = arith.constant 0 : index
    %c0_23 = arith.constant 0 : index
    %c0_24 = arith.constant 0 : index
    %33 = vector.load %arg7[%c0_22, %c0_23, %c0_24] : memref<2x1x192xf32, #tpu.memory_space<vmem>>, vector<1x1x192xf32>
    %34 = vector.shape_cast %33 : vector<1x1x192xf32> to vector<1x192xf32>
    %35 = vector.broadcast %34 : vector<1x192xf32> to vector<48x192xf32>
    %36 = arith.addf %32, %35 : vector<48x192xf32>
    %c0_25 = arith.constant 0 : index
    %c0_26 = arith.constant 0 : index
    %37 = vector.load %arg19[%c0_25, %c0_26] : memref<48x192xf32, #tpu.memory_space<vmem>>, vector<48x192xf32>
    tpu.vector_store %arg19[%c0_25, %c0_26], %36 {strides = array<i32>} : memref<48x192xf32, #tpu.memory_space<vmem>>, vector<48x192xf32>,
    %c0_27 = arith.constant 0 : index
    %c0_28 = arith.constant 0 : index
    %38 = vector.load %arg19[%c0_27, %c0_28] : memref<48x192xf32, #tpu.memory_space<vmem>>, vector<48x16xf32>
    %cst_29 = arith.constant 2.500000e-01 : f32
    %39 = vector.broadcast %cst_29 : f32 to vector<48x16xf32>
    %40 = arith.mulf %38, %39 : vector<48x16xf32>
    %c0_30 = arith.constant 0 : index
    %c64 = arith.constant 64 : index
    %41 = vector.load %arg19[%c0_30, %c64] : memref<48x192xf32, #tpu.memory_space<vmem>>, vector<48x16xf32>
    %c0_31 = arith.constant 0 : index
    %c128 = arith.constant 128 : index
    %42 = vector.load %arg19[%c0_31, %c128] : memref<48x192xf32, #tpu.memory_space<vmem>>, vector<48x16xf32>
    %cst_32 = arith.constant dense<0.000000e+00> : vector<48x48xf32>
    %43 = tpu.matmul %40, %41, %cst_32 {dimension_numbers = #tpu.dot_dimension_numbers<[1], [1], [0], [0], [0, 0, 1, 0], [], []>} : vector<48x16xf32>, vector<48x16xf32>, vector<48x48xf32> -> vector<48x48xf32>
    %44 = arith.addf %43, %5 : vector<48x48xf32>
    %cst_33 = arith.constant dense<0xFF800000> : vector<48xf32>
    %45 = vector.multi_reduction <maximumf>, %44, %cst_33 [1] : vector<48x48xf32> to vector<48xf32>
    %46 = vector.shape_cast %45 : vector<48xf32> to vector<48x1xf32>
    %47 = vector.broadcast %46 : vector<48x1xf32> to vector<48x48xf32>
    %48 = arith.subf %44, %47 : vector<48x48xf32>
    %49 = math.exp %48 : vector<48x48xf32>
    %cst_34 = arith.constant dense<0.000000e+00> : vector<48xf32>
    %50 = vector.multi_reduction <add>, %49, %cst_34 [1] : vector<48x48xf32> to vector<48xf32>
    %51 = vector.shape_cast %50 : vector<48xf32> to vector<48x1xf32>
    %52 = tpu.reciprocal %51 {approx = true} : vector<48x1xf32> -> vector<48x1xf32>
    %53 = vector.broadcast %52 : vector<48x1xf32> to vector<48x48xf32>
    %54 = arith.mulf %49, %53 : vector<48x48xf32>
    %cst_35 = arith.constant dense<0.000000e+00> : vector<48x16xf32>
    %55 = tpu.matmul %54, %42, %cst_35 {dimension_numbers = #tpu.dot_dimension_numbers<[1], [0], [0], [1], [0, 0, 1, 1], [], []>} : vector<48x48xf32>, vector<48x16xf32>, vector<48x16xf32> -> vector<48x16xf32>
    %c0_36 = arith.constant 0 : index
    %c0_37 = arith.constant 0 : index
    %56 = vector.load %arg20[%c0_36, %c0_37] : memref<48x64xf32, #tpu.memory_space<vmem>>, vector<48x16xf32>
    tpu.vector_store %arg20[%c0_36, %c0_37], %55 {strides = array<i32>} : memref<48x64xf32, #tpu.memory_space<vmem>>, vector<48x16xf32>,
    %c0_38 = arith.constant 0 : index
    %c16 = arith.constant 16 : index
    %57 = vector.load %arg19[%c0_38, %c16] : memref<48x192xf32, #tpu.memory_space<vmem>>, vector<48x16xf32>
    %cst_39 = arith.constant 2.500000e-01 : f32
    %58 = vector.broadcast %cst_39 : f32 to vector<48x16xf32>
    %59 = arith.mulf %57, %58 : vector<48x16xf32>
    %c0_40 = arith.constant 0 : index
    %c80 = arith.constant 80 : index
    %60 = vector.load %arg19[%c0_40, %c80] : memref<48x192xf32, #tpu.memory_space<vmem>>, vector<48x16xf32>
    %c0_41 = arith.constant 0 : index
    %c144 = arith.constant 144 : index
    %61 = vector.load %arg19[%c0_41, %c144] : memref<48x192xf32, #tpu.memory_space<vmem>>, vector<48x16xf32>
    %cst_42 = arith.constant dense<0.000000e+00> : vector<48x48xf32>
    %62 = tpu.matmul %59, %60, %cst_42 {dimension_numbers = #tpu.dot_dimension_numbers<[1], [1], [0], [0], [0, 0, 1, 0], [], []>} : vector<48x16xf32>, vector<48x16xf32>, vector<48x48xf32> -> vector<48x48xf32>
    %63 = arith.addf %62, %5 : vector<48x48xf32>
    %cst_43 = arith.constant dense<0xFF800000> : vector<48xf32>
    %64 = vector.multi_reduction <maximumf>, %63, %cst_43 [1] : vector<48x48xf32> to vector<48xf32>
    %65 = vector.shape_cast %64 : vector<48xf32> to vector<48x1xf32>
    %66 = vector.broadcast %65 : vector<48x1xf32> to vector<48x48xf32>
    %67 = arith.subf %63, %66 : vector<48x48xf32>
    %68 = math.exp %67 : vector<48x48xf32>
    %cst_44 = arith.constant dense<0.000000e+00> : vector<48xf32>
    %69 = vector.multi_reduction <add>, %68, %cst_44 [1] : vector<48x48xf32> to vector<48xf32>
    %70 = vector.shape_cast %69 : vector<48xf32> to vector<48x1xf32>
    %71 = tpu.reciprocal %70 {approx = true} : vector<48x1xf32> -> vector<48x1xf32>
    %72 = vector.broadcast %71 : vector<48x1xf32> to vector<48x48xf32>
    %73 = arith.mulf %68, %72 : vector<48x48xf32>
    %cst_45 = arith.constant dense<0.000000e+00> : vector<48x16xf32>
    %74 = tpu.matmul %73, %61, %cst_45 {dimension_numbers = #tpu.dot_dimension_numbers<[1], [0], [0], [1], [0, 0, 1, 1], [], []>} : vector<48x48xf32>, vector<48x16xf32>, vector<48x16xf32> -> vector<48x16xf32>
    %c0_46 = arith.constant 0 : index
    %c16_47 = arith.constant 16 : index
    %75 = vector.load %arg20[%c0_46, %c16_47] : memref<48x64xf32, #tpu.memory_space<vmem>>, vector<48x16xf32>
    tpu.vector_store %arg20[%c0_46, %c16_47], %74 {strides = array<i32>} : memref<48x64xf32, #tpu.memory_space<vmem>>, vector<48x16xf32>,
    %c0_48 = arith.constant 0 : index
    %c32 = arith.constant 32 : index
    %76 = vector.load %arg19[%c0_48, %c32] : memref<48x192xf32, #tpu.memory_space<vmem>>, vector<48x16xf32>
    %cst_49 = arith.constant 2.500000e-01 : f32
    %77 = vector.broadcast %cst_49 : f32 to vector<48x16xf32>
    %78 = arith.mulf %76, %77 : vector<48x16xf32>
    %c0_50 = arith.constant 0 : index
    %c96 = arith.constant 96 : index
    %79 = vector.load %arg19[%c0_50, %c96] : memref<48x192xf32, #tpu.memory_space<vmem>>, vector<48x16xf32>
    %c0_51 = arith.constant 0 : index
    %c160 = arith.constant 160 : index
    %80 = vector.load %arg19[%c0_51, %c160] : memref<48x192xf32, #tpu.memory_space<vmem>>, vector<48x16xf32>
    %cst_52 = arith.constant dense<0.000000e+00> : vector<48x48xf32>
    %81 = tpu.matmul %78, %79, %cst_52 {dimension_numbers = #tpu.dot_dimension_numbers<[1], [1], [0], [0], [0, 0, 1, 0], [], []>} : vector<48x16xf32>, vector<48x16xf32>, vector<48x48xf32> -> vector<48x48xf32>
    %82 = arith.addf %81, %5 : vector<48x48xf32>
    %cst_53 = arith.constant dense<0xFF800000> : vector<48xf32>
    %83 = vector.multi_reduction <maximumf>, %82, %cst_53 [1] : vector<48x48xf32> to vector<48xf32>
    %84 = vector.shape_cast %83 : vector<48xf32> to vector<48x1xf32>
    %85 = vector.broadcast %84 : vector<48x1xf32> to vector<48x48xf32>
    %86 = arith.subf %82, %85 : vector<48x48xf32>
    %87 = math.exp %86 : vector<48x48xf32>
    %cst_54 = arith.constant dense<0.000000e+00> : vector<48xf32>
    %88 = vector.multi_reduction <add>, %87, %cst_54 [1] : vector<48x48xf32> to vector<48xf32>
    %89 = vector.shape_cast %88 : vector<48xf32> to vector<48x1xf32>
    %90 = tpu.reciprocal %89 {approx = true} : vector<48x1xf32> -> vector<48x1xf32>
    %91 = vector.broadcast %90 : vector<48x1xf32> to vector<48x48xf32>
    %92 = arith.mulf %87, %91 : vector<48x48xf32>
    %cst_55 = arith.constant dense<0.000000e+00> : vector<48x16xf32>
    %93 = tpu.matmul %92, %80, %cst_55 {dimension_numbers = #tpu.dot_dimension_numbers<[1], [0], [0], [1], [0, 0, 1, 1], [], []>} : vector<48x48xf32>, vector<48x16xf32>, vector<48x16xf32> -> vector<48x16xf32>
    %c0_56 = arith.constant 0 : index
    %c32_57 = arith.constant 32 : index
    %94 = vector.load %arg20[%c0_56, %c32_57] : memref<48x64xf32, #tpu.memory_space<vmem>>, vector<48x16xf32>
    tpu.vector_store %arg20[%c0_56, %c32_57], %93 {strides = array<i32>} : memref<48x64xf32, #tpu.memory_space<vmem>>, vector<48x16xf32>,
    %c0_58 = arith.constant 0 : index
    %c48 = arith.constant 48 : index
    %95 = vector.load %arg19[%c0_58, %c48] : memref<48x192xf32, #tpu.memory_space<vmem>>, vector<48x16xf32>
    %cst_59 = arith.constant 2.500000e-01 : f32
    %96 = vector.broadcast %cst_59 : f32 to vector<48x16xf32>
    %97 = arith.mulf %95, %96 : vector<48x16xf32>
    %c0_60 = arith.constant 0 : index
    %c112 = arith.constant 112 : index
    %98 = vector.load %arg19[%c0_60, %c112] : memref<48x192xf32, #tpu.memory_space<vmem>>, vector<48x16xf32>
    %c0_61 = arith.constant 0 : index
    %c176 = arith.constant 176 : index
    %99 = vector.load %arg19[%c0_61, %c176] : memref<48x192xf32, #tpu.memory_space<vmem>>, vector<48x16xf32>
    %cst_62 = arith.constant dense<0.000000e+00> : vector<48x48xf32>
    %100 = tpu.matmul %97, %98, %cst_62 {dimension_numbers = #tpu.dot_dimension_numbers<[1], [1], [0], [0], [0, 0, 1, 0], [], []>} : vector<48x16xf32>, vector<48x16xf32>, vector<48x48xf32> -> vector<48x48xf32>
    %101 = arith.addf %100, %5 : vector<48x48xf32>
    %cst_63 = arith.constant dense<0xFF800000> : vector<48xf32>
    %102 = vector.multi_reduction <maximumf>, %101, %cst_63 [1] : vector<48x48xf32> to vector<48xf32>
    %103 = vector.shape_cast %102 : vector<48xf32> to vector<48x1xf32>
    %104 = vector.broadcast %103 : vector<48x1xf32> to vector<48x48xf32>
    %105 = arith.subf %101, %104 : vector<48x48xf32>
    %106 = math.exp %105 : vector<48x48xf32>
    %cst_64 = arith.constant dense<0.000000e+00> : vector<48xf32>
    %107 = vector.multi_reduction <add>, %106, %cst_64 [1] : vector<48x48xf32> to vector<48xf32>
    %108 = vector.shape_cast %107 : vector<48xf32> to vector<48x1xf32>
    %109 = tpu.reciprocal %108 {approx = true} : vector<48x1xf32> -> vector<48x1xf32>
    %110 = vector.broadcast %109 : vector<48x1xf32> to vector<48x48xf32>
    %111 = arith.mulf %106, %110 : vector<48x48xf32>
    %cst_65 = arith.constant dense<0.000000e+00> : vector<48x16xf32>
    %112 = tpu.matmul %111, %99, %cst_65 {dimension_numbers = #tpu.dot_dimension_numbers<[1], [0], [0], [1], [0, 0, 1, 1], [], []>} : vector<48x48xf32>, vector<48x16xf32>, vector<48x16xf32> -> vector<48x16xf32>
    %c0_66 = arith.constant 0 : index
    %c48_67 = arith.constant 48 : index
    %113 = vector.load %arg20[%c0_66, %c48_67] : memref<48x64xf32, #tpu.memory_space<vmem>>, vector<48x16xf32>
    tpu.vector_store %arg20[%c0_66, %c48_67], %112 {strides = array<i32>} : memref<48x64xf32, #tpu.memory_space<vmem>>, vector<48x16xf32>,
    %c0_68 = arith.constant 0 : index
    %c0_69 = arith.constant 0 : index
    %114 = vector.load %arg20[%c0_68, %c0_69] : memref<48x64xf32, #tpu.memory_space<vmem>>, vector<48x64xf32>
    %c0_70 = arith.constant 0 : index
    %c0_71 = arith.constant 0 : index
    %c0_72 = arith.constant 0 : index
    %115 = vector.load %arg8[%c0_70, %c0_71, %c0_72] : memref<2x64x64xf32, #tpu.memory_space<vmem>>, vector<1x64x64xf32>
    %116 = vector.shape_cast %115 : vector<1x64x64xf32> to vector<64x64xf32>
    %cst_73 = arith.constant dense<0.000000e+00> : vector<48x64xf32>
    %117 = tpu.matmul %114, %116, %cst_73 {dimension_numbers = #tpu.dot_dimension_numbers<[1], [0], [0], [1], [0, 0, 1, 1], [], []>} : vector<48x64xf32>, vector<64x64xf32>, vector<48x64xf32> -> vector<48x64xf32>
    %c0_74 = arith.constant 0 : index
    %c0_75 = arith.constant 0 : index
    %c0_76 = arith.constant 0 : index
    %118 = vector.load %arg9[%c0_74, %c0_75, %c0_76] : memref<2x1x64xf32, #tpu.memory_space<vmem>>, vector<1x1x64xf32>
    %119 = vector.shape_cast %118 : vector<1x1x64xf32> to vector<1x64xf32>
    %120 = vector.broadcast %119 : vector<1x64xf32> to vector<48x64xf32>
    %121 = arith.addf %117, %120 : vector<48x64xf32>
    %122 = arith.addf %4, %121 : vector<48x64xf32>
    %c0_77 = arith.constant 0 : index
    %c0_78 = arith.constant 0 : index
    %c0_79 = arith.constant 0 : index
    %123 = vector.load %arg10[%c0_77, %c0_78, %c0_79] : memref<2x1x64xf32, #tpu.memory_space<vmem>>, vector<1x1x64xf32>
    %124 = vector.shape_cast %123 : vector<1x1x64xf32> to vector<1x64xf32>
    %c0_80 = arith.constant 0 : index
    %c0_81 = arith.constant 0 : index
    %c0_82 = arith.constant 0 : index
    %125 = vector.load %arg11[%c0_80, %c0_81, %c0_82] : memref<2x1x64xf32, #tpu.memory_space<vmem>>, vector<1x1x64xf32>
    %126 = vector.shape_cast %125 : vector<1x1x64xf32> to vector<1x64xf32>
    %cst_83 = arith.constant dense<0.000000e+00> : vector<48xf32>
    %127 = vector.multi_reduction <add>, %122, %cst_83 [1] : vector<48x64xf32> to vector<48xf32>
    %128 = vector.shape_cast %127 : vector<48xf32> to vector<48x1xf32>
    %cst_84 = arith.constant 6.400000e+01 : f32
    %129 = vector.broadcast %cst_84 : f32 to vector<48x1xf32>
    %130 = arith.divf %128, %129 : vector<48x1xf32>
    %131 = vector.broadcast %130 : vector<48x1xf32> to vector<48x64xf32>
    %132 = arith.subf %122, %131 : vector<48x64xf32>
    %133 = arith.mulf %132, %132 : vector<48x64xf32>
    %cst_85 = arith.constant dense<0.000000e+00> : vector<48xf32>
    %134 = vector.multi_reduction <add>, %133, %cst_85 [1] : vector<48x64xf32> to vector<48xf32>
    %135 = vector.shape_cast %134 : vector<48xf32> to vector<48x1xf32>
    %cst_86 = arith.constant 6.400000e+01 : f32
    %136 = vector.broadcast %cst_86 : f32 to vector<48x1xf32>
    %137 = arith.divf %135, %136 : vector<48x1xf32>
    %cst_87 = arith.constant 9.99999997E-7 : f32
    %138 = vector.broadcast %cst_87 : f32 to vector<48x1xf32>
    %139 = arith.addf %137, %138 : vector<48x1xf32>
    %140 = math.rsqrt %139 : vector<48x1xf32>
    %141 = vector.broadcast %140 : vector<48x1xf32> to vector<48x64xf32>
    %142 = arith.mulf %132, %141 : vector<48x64xf32>
    %143 = vector.broadcast %124 : vector<1x64xf32> to vector<48x64xf32>
    %144 = arith.mulf %142, %143 : vector<48x64xf32>
    %145 = vector.broadcast %126 : vector<1x64xf32> to vector<48x64xf32>
    %146 = arith.addf %144, %145 : vector<48x64xf32>
    %c0_88 = arith.constant 0 : index
    %c0_89 = arith.constant 0 : index
    %c0_90 = arith.constant 0 : index
    %147 = vector.load %arg12[%c0_88, %c0_89, %c0_90] : memref<2x64x256xf32, #tpu.memory_space<vmem>>, vector<1x64x256xf32>
    %148 = vector.shape_cast %147 : vector<1x64x256xf32> to vector<64x256xf32>
    %cst_91 = arith.constant dense<0.000000e+00> : vector<48x256xf32>
    %149 = tpu.matmul %146, %148, %cst_91 {dimension_numbers = #tpu.dot_dimension_numbers<[1], [0], [0], [1], [0, 0, 1, 1], [], []>} : vector<48x64xf32>, vector<64x256xf32>, vector<48x256xf32> -> vector<48x256xf32>
    %c0_92 = arith.constant 0 : index
    %c0_93 = arith.constant 0 : index
    %c0_94 = arith.constant 0 : index
    %150 = vector.load %arg13[%c0_92, %c0_93, %c0_94] : memref<2x1x256xf32, #tpu.memory_space<vmem>>, vector<1x1x256xf32>
    %151 = vector.shape_cast %150 : vector<1x1x256xf32> to vector<1x256xf32>
    %152 = vector.broadcast %151 : vector<1x256xf32> to vector<48x256xf32>
    %153 = arith.addf %149, %152 : vector<48x256xf32>
    %cst_95 = arith.constant 5.000000e-01 : f32
    %154 = vector.broadcast %cst_95 : f32 to vector<48x256xf32>
    %155 = arith.mulf %154, %153 : vector<48x256xf32>
    %cst_96 = arith.constant 4.471500e-02 : f32
    %156 = vector.broadcast %cst_96 : f32 to vector<48x256xf32>
    %157 = arith.mulf %156, %153 : vector<48x256xf32>
    %158 = arith.mulf %157, %153 : vector<48x256xf32>
    %159 = arith.mulf %158, %153 : vector<48x256xf32>
    %160 = arith.addf %153, %159 : vector<48x256xf32>
    %cst_97 = arith.constant 0.797884583 : f32
    %161 = vector.broadcast %cst_97 : f32 to vector<48x256xf32>
    %162 = arith.mulf %161, %160 : vector<48x256xf32>
    %163 = math.tanh %162 : vector<48x256xf32>
    %cst_98 = arith.constant 1.000000e+00 : f32
    %164 = vector.broadcast %cst_98 : f32 to vector<48x256xf32>
    %165 = arith.addf %164, %163 : vector<48x256xf32>
    %166 = arith.mulf %155, %165 : vector<48x256xf32>
    %c0_99 = arith.constant 0 : index
    %c0_100 = arith.constant 0 : index
    %c0_101 = arith.constant 0 : index
    %167 = vector.load %arg14[%c0_99, %c0_100, %c0_101] : memref<2x256x64xf32, #tpu.memory_space<vmem>>, vector<1x256x64xf32>
    %168 = vector.shape_cast %167 : vector<1x256x64xf32> to vector<256x64xf32>
    %cst_102 = arith.constant dense<0.000000e+00> : vector<48x64xf32>
    %169 = tpu.matmul %166, %168, %cst_102 {dimension_numbers = #tpu.dot_dimension_numbers<[1], [0], [0], [1], [0, 0, 1, 1], [], []>} : vector<48x256xf32>, vector<256x64xf32>, vector<48x64xf32> -> vector<48x64xf32>
    %c0_103 = arith.constant 0 : index
    %c0_104 = arith.constant 0 : index
    %c0_105 = arith.constant 0 : index
    %170 = vector.load %arg15[%c0_103, %c0_104, %c0_105] : memref<2x1x64xf32, #tpu.memory_space<vmem>>, vector<1x1x64xf32>
    %171 = vector.shape_cast %170 : vector<1x1x64xf32> to vector<1x64xf32>
    %172 = vector.broadcast %171 : vector<1x64xf32> to vector<48x64xf32>
    %173 = arith.addf %169, %172 : vector<48x64xf32>
    %174 = arith.addf %122, %173 : vector<48x64xf32>
    %c1 = arith.constant 1 : index
    %c0_106 = arith.constant 0 : index
    %c0_107 = arith.constant 0 : index
    %175 = vector.load %arg4[%c1, %c0_106, %c0_107] : memref<2x1x64xf32, #tpu.memory_space<vmem>>, vector<1x1x64xf32>
    %176 = vector.shape_cast %175 : vector<1x1x64xf32> to vector<1x64xf32>
    %c1_108 = arith.constant 1 : index
    %c0_109 = arith.constant 0 : index
    %c0_110 = arith.constant 0 : index
    %177 = vector.load %arg5[%c1_108, %c0_109, %c0_110] : memref<2x1x64xf32, #tpu.memory_space<vmem>>, vector<1x1x64xf32>
    %178 = vector.shape_cast %177 : vector<1x1x64xf32> to vector<1x64xf32>
    %cst_111 = arith.constant dense<0.000000e+00> : vector<48xf32>
    %179 = vector.multi_reduction <add>, %174, %cst_111 [1] : vector<48x64xf32> to vector<48xf32>
    %180 = vector.shape_cast %179 : vector<48xf32> to vector<48x1xf32>
    %cst_112 = arith.constant 6.400000e+01 : f32
    %181 = vector.broadcast %cst_112 : f32 to vector<48x1xf32>
    %182 = arith.divf %180, %181 : vector<48x1xf32>
    %183 = vector.broadcast %182 : vector<48x1xf32> to vector<48x64xf32>
    %184 = arith.subf %174, %183 : vector<48x64xf32>
    %185 = arith.mulf %184, %184 : vector<48x64xf32>
    %cst_113 = arith.constant dense<0.000000e+00> : vector<48xf32>
    %186 = vector.multi_reduction <add>, %185, %cst_113 [1] : vector<48x64xf32> to vector<48xf32>
    %187 = vector.shape_cast %186 : vector<48xf32> to vector<48x1xf32>
    %cst_114 = arith.constant 6.400000e+01 : f32
    %188 = vector.broadcast %cst_114 : f32 to vector<48x1xf32>
    %189 = arith.divf %187, %188 : vector<48x1xf32>
    %cst_115 = arith.constant 9.99999997E-7 : f32
    %190 = vector.broadcast %cst_115 : f32 to vector<48x1xf32>
    %191 = arith.addf %189, %190 : vector<48x1xf32>
    %192 = math.rsqrt %191 : vector<48x1xf32>
    %193 = vector.broadcast %192 : vector<48x1xf32> to vector<48x64xf32>
    %194 = arith.mulf %184, %193 : vector<48x64xf32>
    %195 = vector.broadcast %176 : vector<1x64xf32> to vector<48x64xf32>
    %196 = arith.mulf %194, %195 : vector<48x64xf32>
    %197 = vector.broadcast %178 : vector<1x64xf32> to vector<48x64xf32>
    %198 = arith.addf %196, %197 : vector<48x64xf32>
    %c1_116 = arith.constant 1 : index
    %c0_117 = arith.constant 0 : index
    %c0_118 = arith.constant 0 : index
    %199 = vector.load %arg6[%c1_116, %c0_117, %c0_118] : memref<2x64x192xf32, #tpu.memory_space<vmem>>, vector<1x64x192xf32>
    %200 = vector.shape_cast %199 : vector<1x64x192xf32> to vector<64x192xf32>
    %cst_119 = arith.constant dense<0.000000e+00> : vector<48x192xf32>
    %201 = tpu.matmul %198, %200, %cst_119 {dimension_numbers = #tpu.dot_dimension_numbers<[1], [0], [0], [1], [0, 0, 1, 1], [], []>} : vector<48x64xf32>, vector<64x192xf32>, vector<48x192xf32> -> vector<48x192xf32>
    %c1_120 = arith.constant 1 : index
    %c0_121 = arith.constant 0 : index
    %c0_122 = arith.constant 0 : index
    %202 = vector.load %arg7[%c1_120, %c0_121, %c0_122] : memref<2x1x192xf32, #tpu.memory_space<vmem>>, vector<1x1x192xf32>
    %203 = vector.shape_cast %202 : vector<1x1x192xf32> to vector<1x192xf32>
    %204 = vector.broadcast %203 : vector<1x192xf32> to vector<48x192xf32>
    %205 = arith.addf %201, %204 : vector<48x192xf32>
    %c0_123 = arith.constant 0 : index
    %c0_124 = arith.constant 0 : index
    %206 = vector.load %arg19[%c0_123, %c0_124] : memref<48x192xf32, #tpu.memory_space<vmem>>, vector<48x192xf32>
    tpu.vector_store %arg19[%c0_123, %c0_124], %205 {strides = array<i32>} : memref<48x192xf32, #tpu.memory_space<vmem>>, vector<48x192xf32>,
    %c0_125 = arith.constant 0 : index
    %c0_126 = arith.constant 0 : index
    %207 = vector.load %arg19[%c0_125, %c0_126] : memref<48x192xf32, #tpu.memory_space<vmem>>, vector<48x16xf32>
    %cst_127 = arith.constant 2.500000e-01 : f32
    %208 = vector.broadcast %cst_127 : f32 to vector<48x16xf32>
    %209 = arith.mulf %207, %208 : vector<48x16xf32>
    %c0_128 = arith.constant 0 : index
    %c64_129 = arith.constant 64 : index
    %210 = vector.load %arg19[%c0_128, %c64_129] : memref<48x192xf32, #tpu.memory_space<vmem>>, vector<48x16xf32>
    %c0_130 = arith.constant 0 : index
    %c128_131 = arith.constant 128 : index
    %211 = vector.load %arg19[%c0_130, %c128_131] : memref<48x192xf32, #tpu.memory_space<vmem>>, vector<48x16xf32>
    %cst_132 = arith.constant dense<0.000000e+00> : vector<48x48xf32>
    %212 = tpu.matmul %209, %210, %cst_132 {dimension_numbers = #tpu.dot_dimension_numbers<[1], [1], [0], [0], [0, 0, 1, 0], [], []>} : vector<48x16xf32>, vector<48x16xf32>, vector<48x48xf32> -> vector<48x48xf32>
    %213 = arith.addf %212, %5 : vector<48x48xf32>
    %cst_133 = arith.constant dense<0xFF800000> : vector<48xf32>
    %214 = vector.multi_reduction <maximumf>, %213, %cst_133 [1] : vector<48x48xf32> to vector<48xf32>
    %215 = vector.shape_cast %214 : vector<48xf32> to vector<48x1xf32>
    %216 = vector.broadcast %215 : vector<48x1xf32> to vector<48x48xf32>
    %217 = arith.subf %213, %216 : vector<48x48xf32>
    %218 = math.exp %217 : vector<48x48xf32>
    %cst_134 = arith.constant dense<0.000000e+00> : vector<48xf32>
    %219 = vector.multi_reduction <add>, %218, %cst_134 [1] : vector<48x48xf32> to vector<48xf32>
    %220 = vector.shape_cast %219 : vector<48xf32> to vector<48x1xf32>
    %221 = tpu.reciprocal %220 {approx = true} : vector<48x1xf32> -> vector<48x1xf32>
    %222 = vector.broadcast %221 : vector<48x1xf32> to vector<48x48xf32>
    %223 = arith.mulf %218, %222 : vector<48x48xf32>
    %cst_135 = arith.constant dense<0.000000e+00> : vector<48x16xf32>
    %224 = tpu.matmul %223, %211, %cst_135 {dimension_numbers = #tpu.dot_dimension_numbers<[1], [0], [0], [1], [0, 0, 1, 1], [], []>} : vector<48x48xf32>, vector<48x16xf32>, vector<48x16xf32> -> vector<48x16xf32>
    %c0_136 = arith.constant 0 : index
    %c0_137 = arith.constant 0 : index
    %225 = vector.load %arg20[%c0_136, %c0_137] : memref<48x64xf32, #tpu.memory_space<vmem>>, vector<48x16xf32>
    tpu.vector_store %arg20[%c0_136, %c0_137], %224 {strides = array<i32>} : memref<48x64xf32, #tpu.memory_space<vmem>>, vector<48x16xf32>,
    %c0_138 = arith.constant 0 : index
    %c16_139 = arith.constant 16 : index
    %226 = vector.load %arg19[%c0_138, %c16_139] : memref<48x192xf32, #tpu.memory_space<vmem>>, vector<48x16xf32>
    %cst_140 = arith.constant 2.500000e-01 : f32
    %227 = vector.broadcast %cst_140 : f32 to vector<48x16xf32>
    %228 = arith.mulf %226, %227 : vector<48x16xf32>
    %c0_141 = arith.constant 0 : index
    %c80_142 = arith.constant 80 : index
    %229 = vector.load %arg19[%c0_141, %c80_142] : memref<48x192xf32, #tpu.memory_space<vmem>>, vector<48x16xf32>
    %c0_143 = arith.constant 0 : index
    %c144_144 = arith.constant 144 : index
    %230 = vector.load %arg19[%c0_143, %c144_144] : memref<48x192xf32, #tpu.memory_space<vmem>>, vector<48x16xf32>
    %cst_145 = arith.constant dense<0.000000e+00> : vector<48x48xf32>
    %231 = tpu.matmul %228, %229, %cst_145 {dimension_numbers = #tpu.dot_dimension_numbers<[1], [1], [0], [0], [0, 0, 1, 0], [], []>} : vector<48x16xf32>, vector<48x16xf32>, vector<48x48xf32> -> vector<48x48xf32>
    %232 = arith.addf %231, %5 : vector<48x48xf32>
    %cst_146 = arith.constant dense<0xFF800000> : vector<48xf32>
    %233 = vector.multi_reduction <maximumf>, %232, %cst_146 [1] : vector<48x48xf32> to vector<48xf32>
    %234 = vector.shape_cast %233 : vector<48xf32> to vector<48x1xf32>
    %235 = vector.broadcast %234 : vector<48x1xf32> to vector<48x48xf32>
    %236 = arith.subf %232, %235 : vector<48x48xf32>
    %237 = math.exp %236 : vector<48x48xf32>
    %cst_147 = arith.constant dense<0.000000e+00> : vector<48xf32>
    %238 = vector.multi_reduction <add>, %237, %cst_147 [1] : vector<48x48xf32> to vector<48xf32>
    %239 = vector.shape_cast %238 : vector<48xf32> to vector<48x1xf32>
    %240 = tpu.reciprocal %239 {approx = true} : vector<48x1xf32> -> vector<48x1xf32>
    %241 = vector.broadcast %240 : vector<48x1xf32> to vector<48x48xf32>
    %242 = arith.mulf %237, %241 : vector<48x48xf32>
    %cst_148 = arith.constant dense<0.000000e+00> : vector<48x16xf32>
    %243 = tpu.matmul %242, %230, %cst_148 {dimension_numbers = #tpu.dot_dimension_numbers<[1], [0], [0], [1], [0, 0, 1, 1], [], []>} : vector<48x48xf32>, vector<48x16xf32>, vector<48x16xf32> -> vector<48x16xf32>
    %c0_149 = arith.constant 0 : index
    %c16_150 = arith.constant 16 : index
    %244 = vector.load %arg20[%c0_149, %c16_150] : memref<48x64xf32, #tpu.memory_space<vmem>>, vector<48x16xf32>
    tpu.vector_store %arg20[%c0_149, %c16_150], %243 {strides = array<i32>} : memref<48x64xf32, #tpu.memory_space<vmem>>, vector<48x16xf32>,
    %c0_151 = arith.constant 0 : index
    %c32_152 = arith.constant 32 : index
    %245 = vector.load %arg19[%c0_151, %c32_152] : memref<48x192xf32, #tpu.memory_space<vmem>>, vector<48x16xf32>
    %cst_153 = arith.constant 2.500000e-01 : f32
    %246 = vector.broadcast %cst_153 : f32 to vector<48x16xf32>
    %247 = arith.mulf %245, %246 : vector<48x16xf32>
    %c0_154 = arith.constant 0 : index
    %c96_155 = arith.constant 96 : index
    %248 = vector.load %arg19[%c0_154, %c96_155] : memref<48x192xf32, #tpu.memory_space<vmem>>, vector<48x16xf32>
    %c0_156 = arith.constant 0 : index
    %c160_157 = arith.constant 160 : index
    %249 = vector.load %arg19[%c0_156, %c160_157] : memref<48x192xf32, #tpu.memory_space<vmem>>, vector<48x16xf32>
    %cst_158 = arith.constant dense<0.000000e+00> : vector<48x48xf32>
    %250 = tpu.matmul %247, %248, %cst_158 {dimension_numbers = #tpu.dot_dimension_numbers<[1], [1], [0], [0], [0, 0, 1, 0], [], []>} : vector<48x16xf32>, vector<48x16xf32>, vector<48x48xf32> -> vector<48x48xf32>
    %251 = arith.addf %250, %5 : vector<48x48xf32>
    %cst_159 = arith.constant dense<0xFF800000> : vector<48xf32>
    %252 = vector.multi_reduction <maximumf>, %251, %cst_159 [1] : vector<48x48xf32> to vector<48xf32>
    %253 = vector.shape_cast %252 : vector<48xf32> to vector<48x1xf32>
    %254 = vector.broadcast %253 : vector<48x1xf32> to vector<48x48xf32>
    %255 = arith.subf %251, %254 : vector<48x48xf32>
    %256 = math.exp %255 : vector<48x48xf32>
    %cst_160 = arith.constant dense<0.000000e+00> : vector<48xf32>
    %257 = vector.multi_reduction <add>, %256, %cst_160 [1] : vector<48x48xf32> to vector<48xf32>
    %258 = vector.shape_cast %257 : vector<48xf32> to vector<48x1xf32>
    %259 = tpu.reciprocal %258 {approx = true} : vector<48x1xf32> -> vector<48x1xf32>
    %260 = vector.broadcast %259 : vector<48x1xf32> to vector<48x48xf32>
    %261 = arith.mulf %256, %260 : vector<48x48xf32>
    %cst_161 = arith.constant dense<0.000000e+00> : vector<48x16xf32>
    %262 = tpu.matmul %261, %249, %cst_161 {dimension_numbers = #tpu.dot_dimension_numbers<[1], [0], [0], [1], [0, 0, 1, 1], [], []>} : vector<48x48xf32>, vector<48x16xf32>, vector<48x16xf32> -> vector<48x16xf32>
    %c0_162 = arith.constant 0 : index
    %c32_163 = arith.constant 32 : index
    %263 = vector.load %arg20[%c0_162, %c32_163] : memref<48x64xf32, #tpu.memory_space<vmem>>, vector<48x16xf32>
    tpu.vector_store %arg20[%c0_162, %c32_163], %262 {strides = array<i32>} : memref<48x64xf32, #tpu.memory_space<vmem>>, vector<48x16xf32>,
    %c0_164 = arith.constant 0 : index
    %c48_165 = arith.constant 48 : index
    %264 = vector.load %arg19[%c0_164, %c48_165] : memref<48x192xf32, #tpu.memory_space<vmem>>, vector<48x16xf32>
    %cst_166 = arith.constant 2.500000e-01 : f32
    %265 = vector.broadcast %cst_166 : f32 to vector<48x16xf32>
    %266 = arith.mulf %264, %265 : vector<48x16xf32>
    %c0_167 = arith.constant 0 : index
    %c112_168 = arith.constant 112 : index
    %267 = vector.load %arg19[%c0_167, %c112_168] : memref<48x192xf32, #tpu.memory_space<vmem>>, vector<48x16xf32>
    %c0_169 = arith.constant 0 : index
    %c176_170 = arith.constant 176 : index
    %268 = vector.load %arg19[%c0_169, %c176_170] : memref<48x192xf32, #tpu.memory_space<vmem>>, vector<48x16xf32>
    %cst_171 = arith.constant dense<0.000000e+00> : vector<48x48xf32>
    %269 = tpu.matmul %266, %267, %cst_171 {dimension_numbers = #tpu.dot_dimension_numbers<[1], [1], [0], [0], [0, 0, 1, 0], [], []>} : vector<48x16xf32>, vector<48x16xf32>, vector<48x48xf32> -> vector<48x48xf32>
    %270 = arith.addf %269, %5 : vector<48x48xf32>
    %cst_172 = arith.constant dense<0xFF800000> : vector<48xf32>
    %271 = vector.multi_reduction <maximumf>, %270, %cst_172 [1] : vector<48x48xf32> to vector<48xf32>
    %272 = vector.shape_cast %271 : vector<48xf32> to vector<48x1xf32>
    %273 = vector.broadcast %272 : vector<48x1xf32> to vector<48x48xf32>
    %274 = arith.subf %270, %273 : vector<48x48xf32>
    %275 = math.exp %274 : vector<48x48xf32>
    %cst_173 = arith.constant dense<0.000000e+00> : vector<48xf32>
    %276 = vector.multi_reduction <add>, %275, %cst_173 [1] : vector<48x48xf32> to vector<48xf32>
    %277 = vector.shape_cast %276 : vector<48xf32> to vector<48x1xf32>
    %278 = tpu.reciprocal %277 {approx = true} : vector<48x1xf32> -> vector<48x1xf32>
    %279 = vector.broadcast %278 : vector<48x1xf32> to vector<48x48xf32>
    %280 = arith.mulf %275, %279 : vector<48x48xf32>
    %cst_174 = arith.constant dense<0.000000e+00> : vector<48x16xf32>
    %281 = tpu.matmul %280, %268, %cst_174 {dimension_numbers = #tpu.dot_dimension_numbers<[1], [0], [0], [1], [0, 0, 1, 1], [], []>} : vector<48x48xf32>, vector<48x16xf32>, vector<48x16xf32> -> vector<48x16xf32>
    %c0_175 = arith.constant 0 : index
    %c48_176 = arith.constant 48 : index
    %282 = vector.load %arg20[%c0_175, %c48_176] : memref<48x64xf32, #tpu.memory_space<vmem>>, vector<48x16xf32>
    tpu.vector_store %arg20[%c0_175, %c48_176], %281 {strides = array<i32>} : memref<48x64xf32, #tpu.memory_space<vmem>>, vector<48x16xf32>,
    %c0_177 = arith.constant 0 : index
    %c0_178 = arith.constant 0 : index
    %283 = vector.load %arg20[%c0_177, %c0_178] : memref<48x64xf32, #tpu.memory_space<vmem>>, vector<48x64xf32>
    %c1_179 = arith.constant 1 : index
    %c0_180 = arith.constant 0 : index
    %c0_181 = arith.constant 0 : index
    %284 = vector.load %arg8[%c1_179, %c0_180, %c0_181] : memref<2x64x64xf32, #tpu.memory_space<vmem>>, vector<1x64x64xf32>
    %285 = vector.shape_cast %284 : vector<1x64x64xf32> to vector<64x64xf32>
    %cst_182 = arith.constant dense<0.000000e+00> : vector<48x64xf32>
    %286 = tpu.matmul %283, %285, %cst_182 {dimension_numbers = #tpu.dot_dimension_numbers<[1], [0], [0], [1], [0, 0, 1, 1], [], []>} : vector<48x64xf32>, vector<64x64xf32>, vector<48x64xf32> -> vector<48x64xf32>
    %c1_183 = arith.constant 1 : index
    %c0_184 = arith.constant 0 : index
    %c0_185 = arith.constant 0 : index
    %287 = vector.load %arg9[%c1_183, %c0_184, %c0_185] : memref<2x1x64xf32, #tpu.memory_space<vmem>>, vector<1x1x64xf32>
    %288 = vector.shape_cast %287 : vector<1x1x64xf32> to vector<1x64xf32>
    %289 = vector.broadcast %288 : vector<1x64xf32> to vector<48x64xf32>
    %290 = arith.addf %286, %289 : vector<48x64xf32>
    %291 = arith.addf %174, %290 : vector<48x64xf32>
    %c1_186 = arith.constant 1 : index
    %c0_187 = arith.constant 0 : index
    %c0_188 = arith.constant 0 : index
    %292 = vector.load %arg10[%c1_186, %c0_187, %c0_188] : memref<2x1x64xf32, #tpu.memory_space<vmem>>, vector<1x1x64xf32>
    %293 = vector.shape_cast %292 : vector<1x1x64xf32> to vector<1x64xf32>
    %c1_189 = arith.constant 1 : index
    %c0_190 = arith.constant 0 : index
    %c0_191 = arith.constant 0 : index
    %294 = vector.load %arg11[%c1_189, %c0_190, %c0_191] : memref<2x1x64xf32, #tpu.memory_space<vmem>>, vector<1x1x64xf32>
    %295 = vector.shape_cast %294 : vector<1x1x64xf32> to vector<1x64xf32>
    %cst_192 = arith.constant dense<0.000000e+00> : vector<48xf32>
    %296 = vector.multi_reduction <add>, %291, %cst_192 [1] : vector<48x64xf32> to vector<48xf32>
    %297 = vector.shape_cast %296 : vector<48xf32> to vector<48x1xf32>
    %cst_193 = arith.constant 6.400000e+01 : f32
    %298 = vector.broadcast %cst_193 : f32 to vector<48x1xf32>
    %299 = arith.divf %297, %298 : vector<48x1xf32>
    %300 = vector.broadcast %299 : vector<48x1xf32> to vector<48x64xf32>
    %301 = arith.subf %291, %300 : vector<48x64xf32>
    %302 = arith.mulf %301, %301 : vector<48x64xf32>
    %cst_194 = arith.constant dense<0.000000e+00> : vector<48xf32>
    %303 = vector.multi_reduction <add>, %302, %cst_194 [1] : vector<48x64xf32> to vector<48xf32>
    %304 = vector.shape_cast %303 : vector<48xf32> to vector<48x1xf32>
    %cst_195 = arith.constant 6.400000e+01 : f32
    %305 = vector.broadcast %cst_195 : f32 to vector<48x1xf32>
    %306 = arith.divf %304, %305 : vector<48x1xf32>
    %cst_196 = arith.constant 9.99999997E-7 : f32
    %307 = vector.broadcast %cst_196 : f32 to vector<48x1xf32>
    %308 = arith.addf %306, %307 : vector<48x1xf32>
    %309 = math.rsqrt %308 : vector<48x1xf32>
    %310 = vector.broadcast %309 : vector<48x1xf32> to vector<48x64xf32>
    %311 = arith.mulf %301, %310 : vector<48x64xf32>
    %312 = vector.broadcast %293 : vector<1x64xf32> to vector<48x64xf32>
    %313 = arith.mulf %311, %312 : vector<48x64xf32>
    %314 = vector.broadcast %295 : vector<1x64xf32> to vector<48x64xf32>
    %315 = arith.addf %313, %314 : vector<48x64xf32>
    %c1_197 = arith.constant 1 : index
    %c0_198 = arith.constant 0 : index
    %c0_199 = arith.constant 0 : index
    %316 = vector.load %arg12[%c1_197, %c0_198, %c0_199] : memref<2x64x256xf32, #tpu.memory_space<vmem>>, vector<1x64x256xf32>
    %317 = vector.shape_cast %316 : vector<1x64x256xf32> to vector<64x256xf32>
    %cst_200 = arith.constant dense<0.000000e+00> : vector<48x256xf32>
    %318 = tpu.matmul %315, %317, %cst_200 {dimension_numbers = #tpu.dot_dimension_numbers<[1], [0], [0], [1], [0, 0, 1, 1], [], []>} : vector<48x64xf32>, vector<64x256xf32>, vector<48x256xf32> -> vector<48x256xf32>
    %c1_201 = arith.constant 1 : index
    %c0_202 = arith.constant 0 : index
    %c0_203 = arith.constant 0 : index
    %319 = vector.load %arg13[%c1_201, %c0_202, %c0_203] : memref<2x1x256xf32, #tpu.memory_space<vmem>>, vector<1x1x256xf32>
    %320 = vector.shape_cast %319 : vector<1x1x256xf32> to vector<1x256xf32>
    %321 = vector.broadcast %320 : vector<1x256xf32> to vector<48x256xf32>
    %322 = arith.addf %318, %321 : vector<48x256xf32>
    %cst_204 = arith.constant 5.000000e-01 : f32
    %323 = vector.broadcast %cst_204 : f32 to vector<48x256xf32>
    %324 = arith.mulf %323, %322 : vector<48x256xf32>
    %cst_205 = arith.constant 4.471500e-02 : f32
    %325 = vector.broadcast %cst_205 : f32 to vector<48x256xf32>
    %326 = arith.mulf %325, %322 : vector<48x256xf32>
    %327 = arith.mulf %326, %322 : vector<48x256xf32>
    %328 = arith.mulf %327, %322 : vector<48x256xf32>
    %329 = arith.addf %322, %328 : vector<48x256xf32>
    %cst_206 = arith.constant 0.797884583 : f32
    %330 = vector.broadcast %cst_206 : f32 to vector<48x256xf32>
    %331 = arith.mulf %330, %329 : vector<48x256xf32>
    %332 = math.tanh %331 : vector<48x256xf32>
    %cst_207 = arith.constant 1.000000e+00 : f32
    %333 = vector.broadcast %cst_207 : f32 to vector<48x256xf32>
    %334 = arith.addf %333, %332 : vector<48x256xf32>
    %335 = arith.mulf %324, %334 : vector<48x256xf32>
    %c1_208 = arith.constant 1 : index
    %c0_209 = arith.constant 0 : index
    %c0_210 = arith.constant 0 : index
    %336 = vector.load %arg14[%c1_208, %c0_209, %c0_210] : memref<2x256x64xf32, #tpu.memory_space<vmem>>, vector<1x256x64xf32>
    %337 = vector.shape_cast %336 : vector<1x256x64xf32> to vector<256x64xf32>
    %cst_211 = arith.constant dense<0.000000e+00> : vector<48x64xf32>
    %338 = tpu.matmul %335, %337, %cst_211 {dimension_numbers = #tpu.dot_dimension_numbers<[1], [0], [0], [1], [0, 0, 1, 1], [], []>} : vector<48x256xf32>, vector<256x64xf32>, vector<48x64xf32> -> vector<48x64xf32>
    %c1_212 = arith.constant 1 : index
    %c0_213 = arith.constant 0 : index
    %c0_214 = arith.constant 0 : index
    %339 = vector.load %arg15[%c1_212, %c0_213, %c0_214] : memref<2x1x64xf32, #tpu.memory_space<vmem>>, vector<1x1x64xf32>
    %340 = vector.shape_cast %339 : vector<1x1x64xf32> to vector<1x64xf32>
    %341 = vector.broadcast %340 : vector<1x64xf32> to vector<48x64xf32>
    %342 = arith.addf %338, %341 : vector<48x64xf32>
    %343 = arith.addf %291, %342 : vector<48x64xf32>
    %c0_215 = arith.constant 0 : index
    %c0_216 = arith.constant 0 : index
    %344 = vector.load %arg16[%c0_215, %c0_216] : memref<1x64xf32, #tpu.memory_space<vmem>>, vector<1x64xf32>
    %c0_217 = arith.constant 0 : index
    %c0_218 = arith.constant 0 : index
    %345 = vector.load %arg17[%c0_217, %c0_218] : memref<1x64xf32, #tpu.memory_space<vmem>>, vector<1x64xf32>
    %cst_219 = arith.constant dense<0.000000e+00> : vector<48xf32>
    %346 = vector.multi_reduction <add>, %343, %cst_219 [1] : vector<48x64xf32> to vector<48xf32>
    %347 = vector.shape_cast %346 : vector<48xf32> to vector<48x1xf32>
    %cst_220 = arith.constant 6.400000e+01 : f32
    %348 = vector.broadcast %cst_220 : f32 to vector<48x1xf32>
    %349 = arith.divf %347, %348 : vector<48x1xf32>
    %350 = vector.broadcast %349 : vector<48x1xf32> to vector<48x64xf32>
    %351 = arith.subf %343, %350 : vector<48x64xf32>
    %352 = arith.mulf %351, %351 : vector<48x64xf32>
    %cst_221 = arith.constant dense<0.000000e+00> : vector<48xf32>
    %353 = vector.multi_reduction <add>, %352, %cst_221 [1] : vector<48x64xf32> to vector<48xf32>
    %354 = vector.shape_cast %353 : vector<48xf32> to vector<48x1xf32>
    %cst_222 = arith.constant 6.400000e+01 : f32
    %355 = vector.broadcast %cst_222 : f32 to vector<48x1xf32>
    %356 = arith.divf %354, %355 : vector<48x1xf32>
    %cst_223 = arith.constant 9.99999997E-7 : f32
    %357 = vector.broadcast %cst_223 : f32 to vector<48x1xf32>
    %358 = arith.addf %356, %357 : vector<48x1xf32>
    %359 = math.rsqrt %358 : vector<48x1xf32>
    %360 = vector.broadcast %359 : vector<48x1xf32> to vector<48x64xf32>
    %361 = arith.mulf %351, %360 : vector<48x64xf32>
    %362 = vector.broadcast %344 : vector<1x64xf32> to vector<48x64xf32>
    %363 = arith.mulf %361, %362 : vector<48x64xf32>
    %364 = vector.broadcast %345 : vector<1x64xf32> to vector<48x64xf32>
    %365 = arith.addf %363, %364 : vector<48x64xf32>
    %366 = vector.extract_strided_slice %365 {offsets = [0, 0], sizes = [1, 64], strides = [1, 1]} : vector<48x64xf32> to vector<1x64xf32>
    %c0_224 = arith.constant 0 : index
    %c0_225 = arith.constant 0 : index
    %367 = vector.load %arg18[%c0_224, %c0_225] : memref<2x64xf32, #tpu.memory_space<vmem>>, vector<1x64xf32>
    tpu.vector_store %arg18[%c0_224, %c0_225], %366 {strides = array<i32>} : memref<2x64xf32, #tpu.memory_space<vmem>>, vector<1x64xf32>,
    %368 = vector.extract_strided_slice %365 {offsets = [24, 0], sizes = [1, 64], strides = [1, 1]} : vector<48x64xf32> to vector<1x64xf32>
    %c1_226 = arith.constant 1 : index
    %c0_227 = arith.constant 0 : index
    %369 = vector.load %arg18[%c1_226, %c0_227] : memref<2x64xf32, #tpu.memory_space<vmem>>, vector<1x64xf32>
    tpu.vector_store %arg18[%c1_226, %c0_227], %368 {strides = array<i32>} : memref<2x64xf32, #tpu.memory_space<vmem>>, vector<1x64xf32>,
    return
  }
}

</mosaic_0001>

<bundles_post_ra>
// kernel: feature_extractor_forward.1
= control target key start
LH: loop header
LB: loop body
LE: loop exit
PB: predicated region body
PF: predicated region fallthrough
CT: control target
= control target key end

     0   :  { %s9425_s0 = inlined_call_operand.vmem [shape: f32[48,192], index: 0, kind: input, shape index: {}]   ;;  %s9426_s1 = inlined_call_operand.vmem [shape: f32[192,64], index: 1, kind: input, shape index: {}]   ;;  %s9427_s2 = inlined_call_operand.vmem [shape: f32[48,64], index: 2, kind: input, shape index: {}]   ;;  %s9428_s3 = inlined_call_operand.vmem [shape: f32[48,48], index: 3, kind: input, shape index: {}]   ;;  %s9429_s4 = inlined_call_operand.vmem [shape: f32[2,1,64], index: 4, kind: input, shape index: {}]   ;;  %s9430_s5 = inlined_call_operand.vmem [shape: f32[2,1,64], index: 5, kind: input, shape index: {}]   ;;  %s9431_s6 = inlined_call_operand.vmem [shape: f32[2,64,192], index: 6, kind: input, shape index: {}]   ;;  %s9432_s7 = inlined_call_operand.vmem [shape: f32[2,1,192], index: 7, kind: input, shape index: {}]   ;;  %s9433_s8 = inlined_call_operand.vmem [shape: f32[2,64,64], index: 8, kind: input, shape index: {}]   ;;  %s9434_s9 = inlined_call_operand.vmem [shape: f32[2,1,64], index: 9, kind: input, shape index: {}]   ;;  %s9435_s10 = inlined_call_operand.vmem [shape: f32[2,1,64], index: 10, kind: input, shape index: {}]   ;;  %s9436_s11 = inlined_call_operand.vmem [shape: f32[2,1,64], index: 11, kind: input, shape index: {}]   ;;  %s9437_s12 = inlined_call_operand.vmem [shape: f32[2,64,256], index: 12, kind: input, shape index: {}]   ;;  %s9438_s13 = inlined_call_operand.vmem [shape: f32[2,1,256], index: 13, kind: input, shape index: {}]   ;;  %s9439_s14 = inlined_call_operand.vmem [shape: f32[2,256,64], index: 14, kind: input, shape index: {}]   ;;  %s9440_s15 = inlined_call_operand.vmem [shape: f32[2,1,64], index: 15, kind: input, shape index: {}]   ;;  %s9441_s16 = inlined_call_operand.vmem [shape: f32[1,64], index: 16, kind: input, shape index: {}]   ;;  %s9442_s17 = inlined_call_operand.vmem [shape: f32[1,64], index: 17, kind: input, shape index: {}]   ;;  %s9443_s18 = inlined_call_operand.hbm [shape: f32[2,64], index: 18, kind: output, shape index: {}]  }
   0x1   :  { %9451 = sst [smem:[#allocation7_spill]] %s9425_s0 }
   0x2   :  { %9452 = sst [smem:[#allocation8_spill]] %s9426_s1 }
   0x3   :  { %9453 = sst [smem:[#allocation9_spill]] %s9427_s2 }
   0x4   :  { %s9454_s29 = sld [smem:[#allocation8_spill]]  ;;  %v7189_v3 = vmov 0.0|0.0   ;;  %vm102_vm0 = vcmask 523264   ;;  %s9455_s19 = sld [smem:[#allocation7_spill]] }
   0x5   :  { %6211 = vmatprep.subr.bf16.mxu0 %v7189_v3 }
   0xa   :  { %v72_v0 = vld [vmem:[%s9454_s29] sm:$0xff]  ;;  %v73_v1 = vld [vmem:[%s9454_s29 + $0x8] sm:$0xff]  ;;  %v74_v2 = vld [vmem:[%s9454_s29 + $0x10] sm:$0xff] }
   0xb   :  { %v6212_v4 = vpack.c.bf16 %v73_v1, %v72_v0  ;;  %v75_v5 = vld [vmem:[%s9454_s29 + $0x18] sm:$0xff]  ;;  %v76_v7 = vld [vmem:[%s9454_s29 + $0x20] sm:$0xff]  ;;  %v77_v8 = vld [vmem:[%s9454_s29 + $0x28] sm:$0xff] }
   0xc   :  { %v6215_v6 = vpack.c.bf16 %v75_v5, %v74_v2  ;;  %v6218_v9 = vpack.c.bf16 %v77_v8, %v76_v7  ;;  %v78_v10 = vld [vmem:[%s9454_s29 + $0x30] sm:$0xff]  ;;  %v79_v11 = vld [vmem:[%s9454_s29 + $0x38] sm:$0xff]  ;;  %v61_v12 = vld [vmem:[%s9455_s19 + $0x8] sm:$0xff] }
   0xd   :  { %6213 = vmatpush1.bf16.msra.mxu0 %v6212_v4  ;;  %5225 = vmatprep.mubr.msk.f32.mxu0 %vm102_vm0, %v61_v12  ;;  %v6221_v13 = vpack.c.bf16 %v79_v11, %v78_v10  ;;  %v80_v14 = vld [vmem:[%s9454_s29 + $0x40] sm:$0xff]  ;;  %v81_v15 = vld [vmem:[%s9454_s29 + $0x48] sm:$0xff] }
   0xe   :  { %6214 = vmatprep.subr.bf16.mxu0 %v7189_v3 }
  0x11   :  { %6216 = vmatpush1.bf16.msra.mxu0 %v6215_v6 }
  0x12   :  { %6217 = vmatprep.subr.bf16.mxu0 %v7189_v3 }
  0x15   :  { %6219 = vmatpush1.bf16.msra.mxu0 %v6218_v9 }
  0x16   :  { %6220 = vmatprep.subr.bf16.mxu0 %v7189_v3 }
  0x17   :  { %23 = vsyncpa [#allocation5], 0  ;;  %v6224_v16 = vpack.c.bf16 %v81_v15, %v80_v14  ;;  %v82_v17 = vld [vmem:[%s9454_s29 + $0x50] sm:$0xff]  ;;  %v83_v18 = vld [vmem:[%s9454_s29 + $0x58] sm:$0xff]  ;;  %s9456_s21 = sld [smem:[#allocation9_spill]]  ;;  %vm522_vm1 = vcmask 130048  }
  0x18   :  { %v6227_v19 = vpack.c.bf16 %v83_v18, %v82_v17  ;;  %v84_v20 = vld [vmem:[%s9454_s29 + $0x60] sm:$0xff]  ;;  %v85_v21 = vld [vmem:[%s9454_s29 + $0x68] sm:$0xff]  ;;  %v86_v23 = vld [vmem:[%s9454_s29 + $0x70] sm:$0xff]  ;;  %s7191_s23 = smov 64   ;;  %s7192_s24 = smov 48   ;;  %vm648_vm3 = vcmask 392192  }
  0x19   :  { %6222 = vmatpush1.bf16.msra.mxu0 %v6221_v13  ;;  %v6230_v22 = vpack.c.bf16 %v85_v21, %v84_v20  ;;  %v87_v24 = vld [vmem:[%s9454_s29 + $0x78] sm:$0xff]  ;;  %v88_v26 = vld [vmem:[%s9454_s29 + $0x80] sm:$0xff]  ;;  %v89_v27 = vld [vmem:[%s9454_s29 + $0x88] sm:$0xff]  ;;  %s7193_s25 = smov 32   ;;  %s7194_s26 = smov 112   ;;  %vm1234_vm4 = vcmask 261248  }
  0x1a   :  { %6223 = vmatprep.subr.bf16.mxu0 %v7189_v3  ;;  %v6233_v25 = vpack.c.bf16 %v87_v24, %v86_v23  ;;  %v6236_v28 = vpack.c.bf16 %v89_v27, %v88_v26  ;;  %v90_v29 = vld [vmem:[%s9454_s29 + $0x90] sm:$0xff]  ;;  %v91_v30 = vld [vmem:[%s9454_s29 + $0x98] sm:$0xff]  ;;  %v92_v32 = vld [vmem:[%s9454_s29 + $0xa0] sm:$0xff]  ;;  %s7195_s28 = smov 96   ;;  %s9449_s30 = smov 16   ;;  %vm1641_vm5 = vcmask 392448  }
  0x1b   :  { %v6239_v31 = vpack.c.bf16 %v91_v30, %v90_v29  ;;  %v93_v33 = vld [vmem:[%s9454_s29 + $0xa8] sm:$0xff]  ;;  %v94_v35 = vld [vmem:[%s9454_s29 + $0xb0] sm:$0xff]  ;;  %v95_v36 = vld [vmem:[%s9454_s29 + $0xb8] sm:$0xff]  ;;  %s9447_s29 = smov 80   ;;  %vm2048_vm6 = vcmask 523648   ;;  %vm5208_vm7 = vcmask 516096  }
  0x1c   :  { %v6242_v34 = vpack.c.bf16 %v93_v33, %v92_v32  ;;  %v6245_v37 = vpack.c.bf16 %v95_v36, %v94_v35  ;;  %v60_v38 = vld [vmem:[%s9455_s19] sm:$0xff]  ;;  %v63_v39 = vld [vmem:[%s9455_s19 + $0x18] sm:$0xff]  ;;  %v62_v40 = vld [vmem:[%s9455_s19 + $0x10] sm:$0xff] }
  0x1d   :  { %6225 = vmatpush1.bf16.msra.mxu0 %v6224_v16  ;;  %v65_v41 = vld [vmem:[%s9455_s19 + $0x28] sm:$0xff]  ;;  %v64_v42 = vld [vmem:[%s9455_s19 + $0x20] sm:$0xff]  ;;  %v67_v43 = vld [vmem:[%s9455_s19 + $0x38] sm:$0xff] }
  0x1e   :  { %6226 = vmatprep.subr.bf16.mxu0 %v7189_v3  ;;  %v66_v44 = vld [vmem:[%s9455_s19 + $0x30] sm:$0xff]  ;;  %v69_v45 = vld [vmem:[%s9455_s19 + $0x48] sm:$0xff]  ;;  %v68_v46 = vld [vmem:[%s9455_s19 + $0x40] sm:$0xff] }
  0x1f   :  { %v71_v47 = vld [vmem:[%s9455_s19 + $0x58] sm:$0xff]  ;;  %v70_v48 = vld [vmem:[%s9455_s19 + $0x50] sm:$0xff]  ;;  %v96_v49 = vld [vmem:[%s9456_s21] sm:$0xff] }
  0x20   :  { %v97_v53 = vld [vmem:[%s9456_s21 + $0x8] sm:$0xff]  ;;  %v98_v58 = vld [vmem:[%s9456_s21 + $0x10] sm:$0xff]  ;;  %v99_v63 = vld [vmem:[%s9456_s21 + $0x18] sm:$0xff] }
  0x21   :  { %6228 = vmatpush1.bf16.msra.mxu0 %v6227_v19  ;;  %v100_v4 = vld [vmem:[%s9456_s21 + $0x20] sm:$0xff]  ;;  %v101_v9 = vld [vmem:[%s9456_s21 + $0x28] sm:$0xff]  ;;  %vm7616_vm2 = vmpackc.low %vm522_vm1, %vm522_vm1 }
  0x22   :  { %6229 = vmatprep.subr.bf16.mxu0 %v7189_v3 }
  0x25   :  { %6231 = vmatpush1.bf16.msra.mxu0 %v6230_v22 }
  0x26   :  { %6232 = vmatprep.subr.bf16.mxu0 %v7189_v3 }
  0x29   :  { %6234 = vmatpush1.bf16.msra.mxu0 %v6233_v25 }
  0x2a   :  { %6235 = vmatprep.subr.bf16.mxu0 %v7189_v3 }
  0x2d   :  { %6237 = vmatpush1.bf16.msra.mxu0 %v6236_v28 }
  0x2e   :  { %6238 = vmatprep.subr.bf16.mxu0 %v7189_v3 }
  0x31   :  { %6240 = vmatpush1.bf16.msra.mxu0 %v6239_v31 }
  0x32   :  { %6241 = vmatprep.subr.bf16.mxu0 %v7189_v3 }
  0x35   :  { %6243 = vmatpush1.bf16.msra.mxu0 %v6242_v34 }
  0x36   :  { %6244 = vmatprep.subr.bf16.mxu0 %v7189_v3 }
  0x39   :  { %6246 = vmatpush1.bf16.msra.mxu0 %v6245_v37 }
  0x3c   :  { %186 = vmatmul.mubr.f32.vlgmr.msra.gmra.mrb[0].mxu0 %v60_v38 }
  0x3d   :  { %5226 = vmatprep.mubr.msk.f32.mxu0 %vm102_vm0, %v63_v39 }
  0x40   :  { %191 = vmatmul.mubr.f32.gmra.mrb[2].mxu0 %v62_v40 }
  0x41   :  { %5227 = vmatprep.mubr.msk.f32.mxu0 %vm102_vm0, %v65_v41 }
  0x44   :  { %196 = vmatmul.mubr.f32.gmra.mrb[4].mxu0 %v64_v42 }
  0x45   :  { %5228 = vmatprep.mubr.msk.f32.mxu0 %vm102_vm0, %v67_v43  ;;  %v328_v43 = vld [vmem:[%s9431_s6 + $0x8] sm:$0xff] }
  0x48   :  { %201 = vmatmul.mubr.f32.gmra.mrb[6].mxu0 %v66_v44  ;;  %v330_v44 = vld [vmem:[%s9431_s6 + $0x18] sm:$0xff] }
  0x49   :  { %5229 = vmatprep.mubr.msk.f32.mxu0 %vm102_vm0, %v69_v45 }
  0x4c   :  { %206 = vmatmul.mubr.f32.gmra.mrb[8].mxu0 %v68_v46  ;;  %v6247_v46 = vpack.c.bf16 %v330_v44, %v328_v43 }
  0x4d   :  { %5230 = vmatprep.mubr.msk.f32.mxu0 %vm102_vm0, %v71_v47  ;;  %v327_v47 = vld [vmem:[%s9431_s6] sm:$0xff] }
  0x4e   :  { %6248 = vmatprep.subr.bf16.mxu1 %v6247_v46 }
  0x50   :  { %211 = vmatmul.mubr.f32.gmra.mrb[10].mxu0 %v70_v48  ;;  %v329_v48 = vld [vmem:[%s9431_s6 + $0x10] sm:$0xff] }
 0x10f   :  { %v187_v50 = vpop.f32.mrb[0].mxu0 }
 0x110   :  { %v7411_v51 = vadd.f32 %v187_v50, %v96_v49  ;;  %v189_v52 = vpop.f32.mrb[1].mxu0  ;;  %v6249_v49 = vpack.c.bf16 %v329_v48, %v327_v47 }
 0x111   :  { %v332_v52 = vld [vmem:[%s9431_s6 + $0x28] sm:$0xff] }
 0x112   :  { %v224_v54 = vsel %vm102_vm0, %v7411_v51, 0.0  ;;  %6250 = vmatpush1.bf16.msra.mxu1 %v6249_v49 }
 0x113   :  { %v192_v55 = vpop.f32.mrb[2].mxu0  ;;  %225 = vadd.xlane.f32.xlu0 %v224_v54 }
 0x114   :  { %v7418_v56 = vadd.f32 %v192_v55, %v97_v53  ;;  %v194_v57 = vpop.f32.mrb[3].mxu0  ;;  %v334_v53 = vld [vmem:[%s9431_s6 + $0x38] sm:$0xff]  ;;  %v331_v55 = vld [vmem:[%s9431_s6 + $0x20] sm:$0xff] }
 0x115   :  { %v6251_v54 = vpack.c.bf16 %v334_v53, %v332_v52  ;;  %v333_v57 = vld [vmem:[%s9431_s6 + $0x30] sm:$0xff] }
 0x116   :  { %v227_v59 = vsel %vm102_vm0, %v7418_v56, 0.0 }
 0x117   :  { %v197_v60 = vpop.f32.mrb[4].mxu0  ;;  %228 = vadd.xlane.f32.xlu0 %v227_v59  ;;  %6252 = vmatprep.subr.bf16.mxu1 %v6251_v54  ;;  %v336_v59 = vld [vmem:[%s9431_s6 + $0x48] sm:$0xff] }
 0x118   :  { %v7425_v61 = vadd.f32 %v197_v60, %v98_v58  ;;  %v199_v62 = vpop.f32.mrb[5].mxu0  ;;  %v6253_v58 = vpack.c.bf16 %v333_v57, %v331_v55  ;;  %v338_v60 = vld [vmem:[%s9431_s6 + $0x58] sm:$0xff] }
 0x119   :  { %v6255_v62 = vpack.c.bf16 %v338_v60, %v336_v59  ;;  %v345_v60 = vlaneseq }
 0x11a   :  { %v230_v0 = vsel %vm102_vm0, %v7425_v61, 0.0  ;;  %6254 = vmatpush1.bf16.msra.mxu1 %v6253_v58 }
 0x11b   :  { %v202_v1 = vpop.f32.mrb[6].mxu0  ;;  %231 = vadd.xlane.f32.xlu1 %v230_v0  ;;  %v337_v0 = vld [vmem:[%s9431_s6 + $0x50] sm:$0xff]  ;;  %6256 = vmatprep.subr.bf16.mxu1 %v6255_v62  ;;  %v346_v62 = vshrl.u32 %v345_v60, 7 }
 0x11c   :  { %v7432_v2 = vadd.f32 %v202_v1, %v99_v63  ;;  %v204_v3 = vpop.f32.mrb[7].mxu0  ;;  %v335_v63 = vld [vmem:[%s9431_s6 + $0x40] sm:$0xff] }
 0x11d   :  { %v6257_v1 = vpack.c.bf16 %v337_v0, %v335_v63  ;;  %v340_v3 = vld [vmem:[%s9431_s6 + $0x68] sm:$0xff]  ;;  %v343_v63 = vld [vmem:[%s9432_s7] sm:$0x3]  ;;  %v7563_v0 = vsub.s32 1, %v346_v62 }
 0x11e   :  { %v233_v5 = vsel %vm102_vm0, %v7432_v2, 0.0 }
 0x11f   :  { %v207_v6 = vpop.f32.mrb[8].mxu0  ;;  %234 = vadd.xlane.f32.xlu1 %v233_v5  ;;  %6258 = vmatpush1.bf16.msra.mxu1 %v6257_v1  ;;  %v352_v1 = vrot.slane %v343_v63, %v7563_v0 }
 0x120   :  { %v7439_v7 = vadd.f32 %v207_v6, %v100_v4  ;;  %v209_v8 = vpop.f32.mrb[9].mxu0  ;;  %v342_v4 = vld [vmem:[%s9431_s6 + $0x78] sm:$0xff]  ;;  %v339_v6 = vld [vmem:[%s9431_s6 + $0x60] sm:$0xff] }
 0x121   :  { %v6259_v5 = vpack.c.bf16 %v342_v4, %v340_v3  ;;  %v341_v8 = vld [vmem:[%s9431_s6 + $0x70] sm:$0xff] }
 0x122   :  { %v236_v10 = vsel %vm102_vm0, %v7439_v7, 0.0 }
 0x123   :  { %v212_v11 = vpop.f32.mrb[10].mxu0  ;;  %237 = vadd.xlane.f32.xlu0 %v236_v10  ;;  %6260 = vmatprep.subr.bf16.mxu1 %v6259_v5  ;;  %v7190_v10 = vmov 0.0  }
 0x124   :  { %v7446_v12 = vadd.f32 %v212_v11, %v101_v9  ;;  %v214_v13 = vpop.f32.mrb[11].mxu0  ;;  %v6261_v9 = vpack.c.bf16 %v341_v8, %v339_v6  ;;  %437 = vmatprep.mubr.f32.mxu1 %v7190_v10 }
 0x126   :  { %v239_v14 = vsel %vm102_vm0, %v7446_v12, 0.0  ;;  %6262 = vmatpush1.bf16.msra.mxu1 %v6261_v9 }
 0x127   :  { %240 = vadd.xlane.f32.xlu1 %v239_v14 }
 0x1a0   :  { %v226_v15 = vpop.xlane.xlu0 %225 }
 0x1a1   :  { %v243_v16 = vmul.f32 0.015625, %v226_v15 }
 0x1a3   :  { %v7451_v17 = vsub.f32 %v7411_v51, %v243_v16 }
 0x1a4   :  { %v229_v18 = vpop.xlane.xlu0 %228 }
 0x1a5   :  { %v244_v19 = vmul.f32 0.015625, %v229_v18  ;;  %v255_v20 = vmul.f32 %v7451_v17, %v7451_v17 }
 0x1a7   :  { %v7456_v21 = vsub.f32 %v7418_v56, %v244_v19  ;;  %v261_v22 = vsel %vm102_vm0, %v255_v20, 0.0 }
 0x1a8   :  { %v232_v23 = vpop.xlane.xlu1 %231  ;;  %262 = vadd.xlane.f32.xlu0 %v261_v22 }
 0x1a9   :  { %v245_v24 = vmul.f32 0.015625, %v232_v23  ;;  %v256_v25 = vmul.f32 %v7456_v21, %v7456_v21 }
 0x1ab   :  { %v7462_v26 = vsub.f32 %v7425_v61, %v245_v24  ;;  %v264_v27 = vsel %vm102_vm0, %v256_v25, 0.0 }
 0x1ac   :  { %v235_v28 = vpop.xlane.xlu1 %234  ;;  %265 = vadd.xlane.f32.xlu1 %v264_v27 }
 0x1ad   :  { %v246_v29 = vmul.f32 0.015625, %v235_v28  ;;  %v257_v30 = vmul.f32 %v7462_v26, %v7462_v26  ;;  %v5231_v28 = vld [vmem:[%s9429_s4] ss:$0 sm:$0xff] }
 0x1af   :  { %v7468_v31 = vsub.f32 %v7432_v2, %v246_v29  ;;  %v267_v32 = vsel %vm102_vm0, %v257_v30, 0.0 }
 0x1b0   :  { %268 = vadd.xlane.f32.xlu0 %v267_v32  ;;  %v238_v33 = vpop.xlane.xlu0 %237 }
 0x1b1   :  { %v247_v34 = vmul.f32 0.015625, %v238_v33  ;;  %v258_v35 = vmul.f32 %v7468_v31, %v7468_v31  ;;  %v5232_v33 = vld [vmem:[%s9430_s5] ss:$0 sm:$0xff] }
 0x1b3   :  { %v7474_v36 = vsub.f32 %v7439_v7, %v247_v34  ;;  %v270_v37 = vsel %vm102_vm0, %v258_v35, 0.0 }
 0x1b4   :  { %v241_v38 = vpop.xlane.xlu1 %240  ;;  %271 = vadd.xlane.f32.xlu1 %v270_v37 }
 0x1b5   :  { %v248_v39 = vmul.f32 0.015625, %v241_v38  ;;  %v259_v40 = vmul.f32 %v7474_v36, %v7474_v36 }
 0x1b7   :  { %v7480_v41 = vsub.f32 %v7446_v12, %v248_v39  ;;  %v273_v42 = vsel %vm102_vm0, %v259_v40, 0.0 }
 0x1b8   :  { %274 = vadd.xlane.f32.xlu0 %v273_v42 }
 0x1b9   :  { %v260_v45 = vmul.f32 %v7480_v41, %v7480_v41 }
 0x1bb   :  { %v276_v50 = vsel %vm102_vm0, %v260_v45, 0.0 }
 0x1bc   :  { %277 = vadd.xlane.f32.xlu1 %v276_v50 }
 0x235   :  { %v263_v11 = vpop.xlane.xlu0 %262 }
 0x236   :  { %v279_v13 = vmul.f32 0.015625, %v263_v11 }
 0x238   :  { %v285_v14 = vadd.f32 1e-06, %v279_v13 }
 0x239   :  { %v266_v15 = vpop.xlane.xlu1 %265 }
 0x23a   :  { %6867 = vrsqrt.f32 %v285_v14  ;;  %v280_v16 = vmul.f32 0.015625, %v266_v15 }
 0x23c   :  { %v286_v18 = vadd.f32 1e-06, %v280_v16 }
 0x23d   :  { %v269_v19 = vpop.xlane.xlu0 %268 }
 0x23e   :  { %6869 = vrsqrt.f32 %v286_v18  ;;  %v281_v20 = vmul.f32 0.015625, %v269_v19 }
 0x240   :  { %v287_v22 = vadd.f32 1e-06, %v281_v20 }
 0x241   :  { %v272_v23 = vpop.xlane.xlu1 %271 }
 0x242   :  { %6871 = vrsqrt.f32 %v287_v22  ;;  %v282_v24 = vmul.f32 0.015625, %v272_v23 }
 0x244   :  { %v6868_v25 = vpop.eup %6867  ;;  %v288_v27 = vadd.f32 1e-06, %v282_v24 }
 0x245   :  { %v275_v29 = vpop.xlane.xlu0 %274  ;;  %v297_v30 = vmul.f32 %v6868_v25, %v7451_v17 }
 0x246   :  { %6873 = vrsqrt.f32 %v288_v27  ;;  %v283_v32 = vmul.f32 0.015625, %v275_v29 }
 0x247   :  { %v309_v34 = vmul.f32 %v5231_v28, %v297_v30 }
 0x248   :  { %v6870_v35 = vpop.eup %6869  ;;  %v289_v37 = vadd.f32 1e-06, %v283_v32 }
 0x249   :  { %v278_v38 = vpop.xlane.xlu1 %277  ;;  %v321_v39 = vadd.f32 %v5232_v33, %v309_v34  ;;  %v298_v40 = vmul.f32 %v6870_v35, %v7456_v21 }
 0x24a   :  { %6875 = vrsqrt.f32 %v289_v37  ;;  %v284_v42 = vmul.f32 0.015625, %v278_v38 }
 0x24b   :  { %5233 = vmatmul.mubr.msk.f32.vlgmr.msra.gmra.mrb[0].mxu1 %vm102_vm0, %v321_v39  ;;  %v310_v43 = vmul.f32 %v5231_v28, %v298_v40 }
 0x24c   :  { %v6872_v44 = vpop.eup %6871  ;;  %v290_v17 = vadd.f32 1e-06, %v284_v42  ;;  %443 = vmatprep.mubr.f32.mxu1 %v7190_v10 }
 0x24d   :  { %v322_v45 = vadd.f32 %v5232_v33, %v310_v43  ;;  %v299_v46 = vmul.f32 %v6872_v44, %v7462_v26 }
 0x24e   :  { %6877 = vrsqrt.f32 %v290_v17 }
 0x24f   :  { %5234 = vmatmul.mubr.msk.f32.gmra.mrb[2].mxu1 %vm102_vm0, %v322_v45  ;;  %v311_v47 = vmul.f32 %v5231_v28, %v299_v46 }
 0x250   :  { %v6874_v48 = vpop.eup %6873  ;;  %449 = vmatprep.mubr.f32.mxu1 %v7190_v10 }
 0x251   :  { %v323_v21 = vadd.f32 %v5232_v33, %v311_v47  ;;  %v300_v49 = vmul.f32 %v6874_v48, %v7468_v31 }
 0x253   :  { %5235 = vmatmul.mubr.msk.f32.gmra.mrb[4].mxu1 %vm102_vm0, %v323_v21  ;;  %v312_v50 = vmul.f32 %v5231_v28, %v300_v49 }
 0x254   :  { %v6876_v52 = vpop.eup %6875  ;;  %455 = vmatprep.mubr.f32.mxu1 %v7190_v10 }
 0x255   :  { %v324_v53 = vadd.f32 %v5232_v33, %v312_v50  ;;  %v301_v54 = vmul.f32 %v6876_v52, %v7474_v36  ;;  %v7558_v36 = vsub.s32 0, %v346_v62 }
 0x257   :  { %5236 = vmatmul.mubr.msk.f32.gmra.mrb[6].mxu1 %vm102_vm0, %v324_v53  ;;  %v313_v26 = vmul.f32 %v5231_v28, %v301_v54 }
 0x258   :  { %v6878_v55 = vpop.eup %6877  ;;  %461 = vmatprep.mubr.f32.mxu1 %v7190_v10 }
 0x259   :  { %v325_v57 = vadd.f32 %v5232_v33, %v313_v26  ;;  %v302_v58 = vmul.f32 %v6878_v55, %v7480_v41  ;;  %v348_v41 = vrot.slane %v343_v63, %v7558_v36 }
 0x25b   :  { %5237 = vmatmul.mubr.msk.f32.gmra.mrb[8].mxu1 %vm102_vm0, %v325_v57  ;;  %v314_v31 = vmul.f32 %v5231_v28, %v302_v58 }
 0x25c   :  { %467 = vmatprep.mubr.f32.mxu1 %v7190_v10 }
 0x25d   :  { %v326_v59 = vadd.f32 %v5232_v33, %v314_v31 }
 0x25f   :  { %5238 = vmatmul.mubr.msk.f32.gmra.mrb[10].mxu1 %vm102_vm0, %v326_v59 }
 0x31e   :  { %v439_v3 = vpop.f32.mrb[0].mxu1 }
 0x31f   :  { %v440_v4 = vadd.f32 %v439_v3, %v348_v41  ;;  %v441_v5 = vpop.f32.mrb[1].mxu1 }
 0x320   :  { %v442_v6 = vadd.f32 %v441_v5, %v352_v1 }
 0x321   :  { %474 = vst [vmem:[#allocation2] sm:$0xff] %v440_v4  ;;  %v7567_v8 = vmul.f32 0.25, %v440_v4 }
 0x322   :  { %475 = vst.msk [vmem:[#allocation2 + $0x8] sm:$0xff] %vm102_vm0, %v442_v6  ;;  %v445_v9 = vpop.f32.mrb[2].mxu1 }
 0x323   :  { %v446_v11 = vadd.f32 %v445_v9, %v348_v41  ;;  %v447_v13 = vpop.f32.mrb[3].mxu1  ;;  %5837 = vmatprep.mubr.msk.f32.mxu1 %vm522_vm1, %v7567_v8 }
 0x324   :  { %v448_v14 = vadd.f32 %v447_v13, %v352_v1 }
 0x325   :  { %476 = vst [vmem:[#allocation2 + $0x10] sm:$0xff] %v446_v11  ;;  %v6657_v15 = vpack.i.bf16 %v446_v11, %v440_v4  ;;  %v7606_v39 = vmul.f32 0.25, %v446_v11 }
 0x326   :  { %477 = vst.msk [vmem:[#allocation2 + $0x18] sm:$0xff] %vm102_vm0, %v448_v14  ;;  %v451_v16 = vpop.f32.mrb[4].mxu1 }
 0x327   :  { %v453_v18 = vpop.f32.mrb[5].mxu1  ;;  %6658 = vrot.lane.b32.xlu0 %v6657_v15, %s7191_s23  ;;  %v7575_v22 = vadd.f32 %v451_v16, %v348_v41 }
 0x328   :  { %v454_v19 = vadd.f32 %v453_v18, %v352_v1 }
 0x329   :  { %v7630_v26 = vld [vmem:[#allocation2 + $0x8] sm:$0xff]  ;;  %v7650_v4 = vmul.f32 0.25, %v7575_v22 }
 0x32a   :  { %479 = vst.msk [vmem:[#allocation2 + $0x28] sm:$0xff] %vm102_vm0, %v454_v19  ;;  %v457_v20 = vpop.f32.mrb[6].mxu1 }
 0x32b   :  { %v7577_v23 = vadd.f32 %v457_v20, %v348_v41  ;;  %v459_v24 = vpop.f32.mrb[7].mxu1 }
 0x32c   :  { %v460_v25 = vadd.f32 %v459_v24, %v352_v1 }
 0x32d   :  { %v7581_v27 = vpack.i.bf16 %v7577_v23, %v7575_v22  ;;  %v7628_v52 = vld [vmem:[#allocation2 + $0x18] sm:$0xff]  ;;  %v7663_v13 = vmul.f32 0.25, %v7577_v23 }
 0x32e   :  { %481 = vst.msk [vmem:[#allocation2 + $0x38] sm:$0xff] %vm102_vm0, %v460_v25  ;;  %v463_v28 = vpop.f32.mrb[8].mxu1  ;;  %v6281_v57 = vpack.c.bf16 %v7628_v52, %v7630_v26 }
 0x32f   :  { %v465_v29 = vpop.f32.mrb[9].mxu1  ;;  %6678 = vrot.lane.b32.xlu0 %v7581_v27, %s7192_s24  ;;  %6663 = vrot.lane.b32.xlu1 %v7581_v27, %s7191_s23  ;;  %v7589_v33 = vadd.f32 %v463_v28, %v348_v41 }
 0x330   :  { %v466_v30 = vadd.f32 %v465_v29, %v352_v1 }
 0x331   :  { %v7652_v5 = vld [vmem:[#allocation2 + $0x28] sm:$0xff] }
 0x332   :  { %483 = vst.msk [vmem:[#allocation2 + $0x48] sm:$0xff] %vm102_vm0, %v466_v30  ;;  %v469_v32 = vpop.f32.mrb[10].mxu1  ;;  %v7696_v30 = vld [vmem:[%s9428_s3 + $0x8] sm:$0xff] }
 0x333   :  { %v7591_v34 = vadd.f32 %v469_v32, %v348_v41  ;;  %v471_v35 = vpop.f32.mrb[11].mxu1  ;;  %6683 = vrot.lane.b32.xlu0 %v6657_v15, %s7193_s25  ;;  %v7701_v32 = vld [vmem:[%s9428_s3] sm:$0xff] }
 0x334   :  { %v472_v37 = vadd.f32 %v471_v35, %v352_v1 }
 0x335   :  { %v7596_v38 = vpack.i.bf16 %v7591_v34, %v7589_v33  ;;  %v7643_v1 = vld [vmem:[#allocation2 + $0x38] sm:$0xff]  ;;  %v7679_v22 = vmul.f32 0.25, %v7591_v34 }
 0x336   :  { %485 = vst.msk [vmem:[#allocation2 + $0x58] sm:$0xff] %vm102_vm0, %v472_v37  ;;  %v6285_v6 = vpack.c.bf16 %v7643_v1, %v7652_v5 }
 0x337   :  { %6668 = vrot.lane.b32.xlu1 %v7596_v38, %s7191_s23 }
 0x339   :  { %v7668_v16 = vld [vmem:[#allocation2 + $0x48] sm:$0xff] }
 0x33b   :  { %6673 = vrot.lane.b32.xlu1 %v6657_v15, %s7192_s24  ;;  %v7666_v15 = vmul.f32 0.25, %v7589_v33 }
 0x33d   :  { %v7660_v11 = vld [vmem:[#allocation2 + $0x58] sm:$0xff] }
 0x33e   :  { %v6289_v20 = vpack.c.bf16 %v7660_v11, %v7668_v16 }
 0x33f   :  { %858 = vrot.lane.b32.xlu1 %v7567_v8, %s7194_s26 }
 0x343   :  { %6688 = vrot.lane.b32.xlu1 %v7581_v27, %s7193_s25 }
 0x347   :  { %860 = vrot.lane.b32.xlu1 %v7606_v39, %s7194_s26 }
 0x34b   :  { %6693 = vrot.lane.b32.xlu1 %v7596_v38, %s7192_s24 }
 0x34f   :  { %6698 = vrot.lane.b32.xlu1 %v7596_v38, %s7193_s25 }
 0x399   :  { %v6659_v40 = vpop.permute.xlu0 %6658 }
 0x39a   :  { %v6661_v42 = vunpack.i.h.bf16 %v6659_v40  ;;  %v6660_v43 = vunpack.i.l.bf16 %v6659_v40  ;;  %v7708_v40 = vld [vmem:[%s9428_s3 + $0x18] sm:$0xff] }
 0x39c   :  { %v6263_v17 = vpack.c.bf16 %v6661_v42, %v6660_v43 }
 0x39e   :  { %6265 = vmatprep.subr.msk.bf16.mxu1 %vm7616_vm2, %v6263_v17 }
 0x39f   :  { %6268 = vmatpush3.bf16.xpose.msk.msra.mxu1 %vm7616_vm2, %v6263_v17  ;;  %v7714_v17 = vld [vmem:[%s9428_s3 + $0x10] sm:$0xff] }
 0x3a1   :  { %v6664_v45 = vpop.permute.xlu1 %6663  ;;  %v6679_v53 = vpop.permute.xlu0 %6678 }
 0x3a2   :  { %v6666_v46 = vunpack.i.h.bf16 %v6664_v45  ;;  %v6665_v47 = vunpack.i.l.bf16 %v6664_v45  ;;  %v6681_v58 = vunpack.i.h.bf16 %v6679_v53  ;;  %v6680_v31 = vunpack.i.l.bf16 %v6679_v53 }
 0x3a4   :  { %v6269_v48 = vpack.c.bf16 %v6666_v46, %v6665_v47  ;;  %v6299_v41 = vpack.c.bf16 %v6681_v58, %v6680_v31 }
 0x3a5   :  { %v6684_v9 = vpop.permute.xlu0 %6683 }
 0x3a6   :  { %6271 = vmatprep.subr.msk.bf16.mxu1 %vm7616_vm2, %v6269_v48  ;;  %v6686_v18 = vunpack.i.h.bf16 %v6684_v9  ;;  %v6685_v19 = vunpack.i.l.bf16 %v6684_v9 }
 0x3a7   :  { %6274 = vmatpush3.bf16.xpose.msk.msra.mxu1 %vm7616_vm2, %v6269_v48 }
 0x3a8   :  { %v7681_v24 = vpack.c.bf16 %v6686_v18, %v6685_v19 }
 0x3a9   :  { %v6669_v21 = vpop.permute.xlu1 %6668 }
 0x3aa   :  { %v6671_v49 = vunpack.i.h.bf16 %v6669_v21  ;;  %v6670_v50 = vunpack.i.l.bf16 %v6669_v21 }
 0x3ac   :  { %v6275_v54 = vpack.c.bf16 %v6671_v49, %v6670_v50  ;;  %v7723_v49 = vld [vmem:[%s9428_s3 + $0x20] sm:$0xff]  ;;  %v7728_v50 = vld [vmem:[%s9428_s3 + $0x28] sm:$0xff] }
 0x3ad   :  { %v6674_v55 = vpop.permute.xlu1 %6673 }
 0x3ae   :  { %v6676_v59 = vunpack.i.h.bf16 %v6674_v55  ;;  %v6675_v60 = vunpack.i.l.bf16 %v6674_v55  ;;  %6277 = vmatprep.subr.msk.bf16.mxu1 %vm7616_vm2, %v6275_v54 }
 0x3af   :  { %6280 = vmatpush3.bf16.xpose.msk.msra.mxu1 %vm7616_vm2, %v6275_v54 }
 0x3b0   :  { %v6293_v62 = vpack.c.bf16 %v6676_v59, %v6675_v60  ;;  %6282 = vmatprep.subr.bf16.mxu1 %v6281_v57 }
 0x3b1   :  { %v859_v63 = vpop.permute.xlu1 %858 }
 0x3b2   :  { %6295 = vmatprep.subr.msk.bf16.mxu0 %vm7616_vm2, %v6293_v62  ;;  %5879 = vmatprep.mubr.msk.f32.mxu0 %vm522_vm1, %v859_v63 }
 0x3b3   :  { %6298 = vmatpush3.bf16.xpose.msk.msra.mxu0 %vm7616_vm2, %v6293_v62 }
 0x3b4   :  { %6301 = vmatprep.subr.msk.bf16.mxu0 %vm7616_vm2, %v6299_v41 }
 0x3b5   :  { %v7647_v3 = vpop.permute.xlu1 %6688 }
 0x3b6   :  { %5838 = vmatmul.mubr.msk.f32.vlgmr.msra.gmra.mrb[12].mxu1 %vm522_vm1, %v7606_v39 }
 0x3b7   :  { %5840 = vmatprep.mubr.msk.f32.mxu1 %vm522_vm1, %v7650_v4  ;;  %6284 = vmatpush3.bf16.msra.mxu1 %v6281_v57 }
 0x3b8   :  { %6286 = vmatprep.subr.bf16.mxu1 %v6285_v6 }
 0x3b9   :  { %v861_v14 = vpop.permute.xlu1 %860 }
 0x3ba   :  { %5841 = vmatmul.mubr.msk.f32.gmra.mrb[14].mxu1 %vm522_vm1, %v7663_v13 }
 0x3bb   :  { %5843 = vmatprep.mubr.msk.f32.mxu1 %vm522_vm1, %v7666_v15  ;;  %6288 = vmatpush3.bf16.msra.mxu1 %v6285_v6 }
 0x3bc   :  { %6304 = vmatpush3.bf16.xpose.msk.msra.mxu0 %vm7616_vm2, %v6299_v41  ;;  %6290 = vmatprep.subr.bf16.mxu1 %v6289_v20 }
 0x3bd   :  { %v6694_v23 = vpop.permute.xlu1 %6693 }
 0x3be   :  { %v6696_v25 = vunpack.i.h.bf16 %v6694_v23  ;;  %v6695_v28 = vunpack.i.l.bf16 %v6694_v23  ;;  %5844 = vmatmul.mubr.msk.f32.gmra.mrb[16].mxu1 %vm522_vm1, %v7679_v22 }
 0x3bf   :  { %6292 = vmatpush3.bf16.msra.mxu1 %v6289_v20 }
 0x3c0   :  { %v6305_v29 = vpack.c.bf16 %v6696_v25, %v6695_v28  ;;  %6325 = vmatprep.subr.msk.bf16.mxu1 %vm7616_vm2, %v7681_v24 }
 0x3c1   :  { %v7741_v63 = vpop.permute.xlu1 %6698 }
 0x3c2   :  { %6307 = vmatprep.subr.msk.bf16.mxu0 %vm7616_vm2, %v6305_v29 }
 0x3c4   :  { %6310 = vmatpush3.bf16.xpose.msk.msra.mxu0 %vm7616_vm2, %v6305_v29 }
 0x3cb   :  { %5880 = vmatmul.mubr.msk.f32.vlgmr.msra.gmra.mrb[12].mxu0 %vm522_vm1, %v861_v14 }
 0x489   :  { %v5839_v33 = vpop.f32.mrb[12].mxu1 }
 0x48a   :  { %v625_v34 = vadd.f32 %v5839_v33, %v7696_v30  ;;  %v619_v35 = vpop.f32.mrb[13].mxu1 }
 0x48b   :  { %v620_v37 = vadd.f32 %v619_v35, %v7701_v32 }
 0x48c   :  { %v652_v42 = vsel %vm648_vm3, %v625_v34, -inf }
 0x48d   :  { %653 = vmax.xlane.f32.xlu0 %v652_v42  ;;  %v5842_v43 = vpop.f32.mrb[14].mxu1  ;;  %v649_v45 = vsel %vm648_vm3, %v620_v37, -inf }
 0x48e   :  { %v635_v46 = vadd.f32 %v5842_v43, %v7708_v40  ;;  %v629_v47 = vpop.f32.mrb[15].mxu1  ;;  %650 = vmax.xlane.f32.xlu1 %v649_v45 }
 0x48f   :  { %v630_v48 = vadd.f32 %v629_v47, %v7714_v17 }
 0x490   :  { %v658_v21 = vsel %vm648_vm3, %v635_v46, -inf }
 0x491   :  { %659 = vmax.xlane.f32.xlu0 %v658_v21  ;;  %v5845_v53 = vpop.f32.mrb[16].mxu1  ;;  %v655_v58 = vsel %vm648_vm3, %v630_v48, -inf }
 0x492   :  { %v639_v54 = vpop.f32.mrb[17].mxu1  ;;  %v645_v57 = vadd.f32 %v5845_v53, %v7728_v50 }
 0x493   :  { %v640_v55 = vadd.f32 %v639_v54, %v7723_v49 }
 0x494   :  { %v664_v59 = vsel %vm648_vm3, %v645_v57, -inf }
 0x495   :  { %656 = vmax.xlane.f32.xlu0 %v655_v58  ;;  %v661_v31 = vsel %vm648_vm3, %v640_v55, -inf }
 0x496   :  { %662 = vmax.xlane.f32.xlu1 %v661_v31 }
 0x499   :  { %665 = vmax.xlane.f32.xlu0 %v664_v59 }
 0x49e   :  { %v7735_v60 = vpop.f32.mrb[12].mxu0 }
 0x49f   :  { %v978_v62 = vpop.f32.mrb[13].mxu0 }
 0x4a7   :  { %862 = vrot.lane.b32.xlu1 %v7650_v4, %s7194_s26 }
 0x4af   :  { %864 = vrot.lane.b32.xlu0 %v7663_v13, %s7194_s26 }
 0x51a   :  { %v654_v41 = vpop.xlane.xlu0 %653 }
 0x51b   :  { %v668_v6 = vsub.f32 %v625_v34, %v654_v41  ;;  %v651_v9 = vpop.xlane.xlu1 %650 }
 0x51c   :  { %v667_v14 = vsub.f32 %v620_v37, %v651_v9 }
 0x51d   :  { %v675_v18 = vmul.f32 1.442695, %v668_v6 }
 0x51e   :  { %v673_v19 = vmul.f32 1.442695, %v667_v14  ;;  %v660_v20 = vpop.xlane.xlu0 %659 }
 0x51f   :  { %6879 = vpow2.f32 %v675_v18  ;;  %v670_v23 = vsub.f32 %v635_v46, %v660_v20 }
 0x520   :  { %6881 = vpow2.f32 %v673_v19 }
 0x521   :  { %v679_v25 = vmul.f32 1.442695, %v670_v23 }
 0x522   :  { %v657_v28 = vpop.xlane.xlu0 %656 }
 0x523   :  { %6883 = vpow2.f32 %v679_v25  ;;  %v669_v29 = vsub.f32 %v630_v48, %v657_v28  ;;  %v663_v33 = vpop.xlane.xlu1 %662 }
 0x524   :  { %v671_v58 = vsub.f32 %v640_v55, %v663_v33  ;;  %v7771_v55 = vadd.f32 %v978_v62, %v7701_v32  ;;  %v6690_v33 = vunpack.i.l.bf16 %v7647_v3 }
 0x525   :  { %v677_v35 = vmul.f32 1.442695, %v669_v29 }
 0x526   :  { %v666_v42 = vpop.xlane.xlu0 %665  ;;  %v681_v31 = vmul.f32 1.442695, %v671_v58 }
 0x527   :  { %6885 = vpow2.f32 %v677_v35  ;;  %v863_v43 = vpop.permute.xlu1 %862  ;;  %v672_v59 = vsub.f32 %v645_v57, %v666_v42  ;;  %v7777_v57 = vadd.f32 %v7735_v60, %v7696_v30  ;;  %v6691_v60 = vunpack.i.h.bf16 %v7647_v3 }
 0x528   :  { %5882 = vmatprep.mubr.msk.f32.mxu0 %vm522_vm1, %v863_v43  ;;  %6887 = vpow2.f32 %v681_v31  ;;  %v6701_v3 = vunpack.i.h.bf16 %v7741_v63 }
 0x529   :  { %v6880_v34 = vpop.eup %6879  ;;  %v683_v41 = vmul.f32 1.442695, %v672_v59 }
 0x52a   :  { %v6882_v45 = vpop.eup %6881  ;;  %v865_v37 = vpop.permute.xlu0 %864  ;;  %v688_v47 = vsel %vm648_vm3, %v6880_v34, 0.0 }
 0x52b   :  { %689 = vadd.xlane.f32.xlu0 %v688_v47  ;;  %5883 = vmatmul.mubr.msk.f32.gmra.mrb[14].mxu0 %vm522_vm1, %v865_v37  ;;  %v685_v46 = vsel %vm648_vm3, %v6882_v45, 0.0  ;;  %6889 = vpow2.f32 %v683_v41  ;;  %v6329_v37 = vpack.c.bf16 %v6691_v60, %v6690_v33 }
 0x52c   :  { %686 = vadd.xlane.f32.xlu1 %v685_v46 }
 0x52d   :  { %v6884_v21 = vpop.eup %6883 }
 0x52e   :  { %v694_v48 = vsel %vm648_vm3, %v6884_v21, 0.0 }
 0x52f   :  { %695 = vadd.xlane.f32.xlu0 %v694_v48  ;;  %v6700_v48 = vunpack.i.l.bf16 %v7741_v63 }
 0x531   :  { %v6886_v53 = vpop.eup %6885 }
 0x532   :  { %v691_v54 = vsel %vm648_vm3, %v6886_v53, 0.0  ;;  %v6888_v6 = vpop.eup %6887 }
 0x533   :  { %692 = vadd.xlane.f32.xlu0 %v691_v54  ;;  %v697_v9 = vsel %vm648_vm3, %v6888_v6, 0.0  ;;  %v6335_v54 = vpack.c.bf16 %v6701_v3, %v6700_v48 }
 0x535   :  { %v7754_v14 = vpop.eup %6889 }
 0x536   :  { %v700_v18 = vsel %vm648_vm3, %v7754_v14, 0.0 }
 0x53d   :  { %866 = vrot.lane.b32.xlu1 %v7666_v15, %s7194_s26 }
 0x549   :  { %868 = vrot.lane.b32.xlu0 %v7679_v22, %s7194_s26 }
 0x561   :  { %698 = vadd.xlane.f32.xlu1 %v697_v9 }
 0x568   :  { %701 = vadd.xlane.f32.xlu0 %v700_v18 }
 0x572   :  { %1265 = vrot.lane.b32.xlu1 %v7567_v8, %s7195_s28  ;;  %v1007_v8 = vsel %vm648_vm3, %v7771_v55, -inf }
 0x576   :  { %1269 = vrot.lane.b32.xlu1 %v7650_v4, %s7195_s28 }
 0x57a   :  { %1273 = vrot.lane.b32.xlu1 %v7666_v15, %s7195_s28 }
 0x57e   :  { %1267 = vrot.lane.b32.xlu0 %v7606_v39, %s7195_s28  ;;  %v1010_v39 = vsel %vm648_vm3, %v7777_v57, -inf }
 0x582   :  { %1271 = vrot.lane.b32.xlu0 %v7663_v13, %s7195_s28 }
 0x586   :  { %1275 = vrot.lane.b32.xlu0 %v7679_v22, %s7195_s28 }
 0x59e   :  { %1008 = vmax.xlane.f32.xlu1 %v1007_v8 }
 0x5a5   :  { %1011 = vmax.xlane.f32.xlu0 %v1010_v39 }
 0x5b8   :  { %v690_v19 = vpop.xlane.xlu0 %689 }
 0x5b9   :  { %6891 = vrcp.f32 %v690_v19  ;;  %v687_v20 = vpop.xlane.xlu1 %686 }
 0x5ba   :  { %6893 = vrcp.f32 %v687_v20 }
 0x5bc   :  { %v696_v23 = vpop.xlane.xlu0 %695 }
 0x5bd   :  { %v867_v25 = vpop.permute.xlu1 %866  ;;  %6895 = vrcp.f32 %v696_v23 }
 0x5be   :  { %5885 = vmatprep.mubr.msk.f32.mxu0 %vm522_vm1, %v867_v25 }
 0x5c0   :  { %v693_v62 = vpop.xlane.xlu0 %692 }
 0x5c1   :  { %6897 = vrcp.f32 %v693_v62 }
 0x5c3   :  { %v6892_v28 = vpop.eup %6891 }
 0x5c4   :  { %v6894_v29 = vpop.eup %6893  ;;  %v869_v35 = vpop.permute.xlu0 %868  ;;  %v710_v43 = vmul.f32 %v6892_v28, %v6880_v34 }
 0x5c5   :  { %5886 = vmatmul.mubr.msk.f32.gmra.mrb[16].mxu0 %vm522_vm1, %v869_v35  ;;  %v709_v42 = vmul.f32 %v6894_v29, %v6882_v45 }
 0x5c7   :  { %5858 = vmatprep.mubr.msk.f32.mxu1 %vm648_vm3, %v709_v42  ;;  %v6896_v47 = vpop.eup %6895 }
 0x5c8   :  { %5859 = vmatmul.mubr.msk.f32.vlgmr.msra.gmra.mrb[18].mxu1 %vm648_vm3, %v710_v43  ;;  %v712_v34 = vmul.f32 %v6896_v47, %v6884_v21 }
 0x5c9   :  { %6328 = vmatpush3.bf16.xpose.msk.msra.mxu1 %vm7616_vm2, %v7681_v24 }
 0x5ca   :  { %6331 = vmatprep.subr.msk.bf16.mxu1 %vm7616_vm2, %v6329_v37 }
 0x5cb   :  { %v6898_v46 = vpop.eup %6897 }
 0x5cc   :  { %v711_v45 = vmul.f32 %v6898_v46, %v6886_v53 }
 0x5ce   :  { %5861 = vmatprep.mubr.msk.f32.mxu1 %vm648_vm3, %v711_v45 }
 0x5cf   :  { %5862 = vmatmul.mubr.msk.f32.gmra.mrb[20].mxu1 %vm648_vm3, %v712_v34 }
 0x5d1   :  { %6334 = vmatpush3.bf16.xpose.msk.msra.mxu1 %vm7616_vm2, %v6329_v37 }
 0x5d2   :  { %6337 = vmatprep.subr.msk.bf16.mxu1 %vm7616_vm2, %v6335_v54 }
 0x5d9   :  { %6340 = vmatpush3.bf16.xpose.msk.msra.mxu1 %vm7616_vm2, %v6335_v54 }
 0x5ee   :  { %v699_v24 = vpop.xlane.xlu1 %698 }
 0x5ef   :  { %6899 = vrcp.f32 %v699_v24 }
 0x5f2   :  { %v1266_v31 = vpop.permute.xlu1 %1265 }
 0x5f5   :  { %v702_v58 = vpop.xlane.xlu0 %701 }
 0x5f6   :  { %6901 = vrcp.f32 %v702_v58 }
 0x5f9   :  { %v6900_v63 = vpop.eup %6899  ;;  %v1268_v8 = vpop.permute.xlu0 %1267 }
 0x5fa   :  { %v713_v21 = vmul.f32 %v6900_v63, %v6888_v6  ;;  %v1270_v6 = vpop.permute.xlu1 %1269 }
 0x5fc   :  { %5864 = vmatprep.mubr.msk.f32.mxu1 %vm648_vm3, %v713_v21 }
 0x5fd   :  { %v1272_v23 = vpop.permute.xlu0 %1271 }
 0x5fe   :  { %v5884_v53 = vpop.f32.mrb[14].mxu0 }
 0x5ff   :  { %v988_v59 = vpop.f32.mrb[15].mxu0  ;;  %v994_v39 = vadd.f32 %v5884_v53, %v7708_v40 }
 0x600   :  { %v6902_v41 = vpop.eup %6901  ;;  %v989_v9 = vadd.f32 %v988_v59, %v7714_v17 }
 0x601   :  { %v714_v18 = vmul.f32 %v6902_v41, %v7754_v14  ;;  %v1016_v20 = vsel %vm648_vm3, %v994_v39, -inf  ;;  %v1274_v14 = vpop.permute.xlu1 %1273  ;;  %v1276_v25 = vpop.permute.xlu0 %1275 }
 0x602   :  { %v1013_v19 = vsel %vm648_vm3, %v989_v9, -inf }
 0x603   :  { %1014 = vmax.xlane.f32.xlu0 %v1013_v19  ;;  %5865 = vmatmul.mubr.msk.f32.gmra.mrb[22].mxu1 %vm648_vm3, %v714_v18  ;;  %v6702_v19 = vpack.i.bf16 %v7628_v52, %v7630_v26 }
 0x604   :  { %5921 = vmatprep.mubr.msk.f32.mxu1 %vm522_vm1, %v1266_v31 }
 0x607   :  { %1017 = vmax.xlane.f32.xlu0 %v1016_v20  ;;  %5922 = vmatmul.mubr.msk.f32.vlgmr.msra.gmra.mrb[24].mxu1 %vm522_vm1, %v1268_v8 }
 0x608   :  { %5924 = vmatprep.mubr.msk.f32.mxu1 %vm522_vm1, %v1270_v6  ;;  %v6712_v6 = vpack.i.bf16 %v7660_v11, %v7668_v16 }
 0x60b   :  { %5925 = vmatmul.mubr.msk.f32.gmra.mrb[26].mxu1 %vm522_vm1, %v1272_v23 }
 0x60c   :  { %5927 = vmatprep.mubr.msk.f32.mxu1 %vm522_vm1, %v1274_v14 }
 0x60f   :  { %5928 = vmatmul.mubr.msk.f32.gmra.mrb[28].mxu1 %vm522_vm1, %v1276_v25 }
 0x62b   :  { %v1009_v28 = vpop.xlane.xlu1 %1008 }
 0x62c   :  { %v1025_v60 = vsub.f32 %v7771_v55, %v1009_v28 }
 0x62e   :  { %v1031_v35 = vmul.f32 1.442695, %v1025_v60 }
 0x632   :  { %v1012_v62 = vpop.xlane.xlu0 %1011 }
 0x633   :  { %v1026_v29 = vsub.f32 %v7777_v57, %v1012_v62 }
 0x635   :  { %v1033_v33 = vmul.f32 1.442695, %v1026_v29 }
 0x637   :  { %6903 = vpow2.f32 %v1033_v33 }
 0x638   :  { %6905 = vpow2.f32 %v1031_v35 }
 0x641   :  { %v7822_v24 = vpop.eup %6903 }
 0x642   :  { %v6906_v21 = vpop.eup %6905  ;;  %v1046_v53 = vsel %vm648_vm3, %v7822_v24, 0.0 }
 0x643   :  { %v1043_v31 = vsel %vm648_vm3, %v6906_v21, 0.0 }
 0x690   :  { %v1015_v42 = vpop.xlane.xlu0 %1014 }
 0x691   :  { %v1027_v43 = vsub.f32 %v989_v9, %v1015_v42 }
 0x693   :  { %v1035_v37 = vmul.f32 1.442695, %v1027_v43 }
 0x694   :  { %v1018_v47 = vpop.xlane.xlu0 %1017 }
 0x695   :  { %v1028_v46 = vsub.f32 %v994_v39, %v1018_v47  ;;  %6907 = vpow2.f32 %v1035_v37 }
 0x697   :  { %v1037_v3 = vmul.f32 1.442695, %v1028_v46 }
 0x698   :  { %v5887_v48 = vpop.f32.mrb[16].mxu0 }
 0x699   :  { %6909 = vpow2.f32 %v1037_v3  ;;  %v1004_v45 = vadd.f32 %v5887_v48, %v7728_v50  ;;  %v998_v34 = vpop.f32.mrb[17].mxu0 }
 0x69a   :  { %v7819_v57 = vadd.f32 %v998_v34, %v7723_v49 }
 0x69b   :  { %v5860_v55 = vpop.f32.mrb[18].mxu1  ;;  %v1022_v54 = vsel %vm648_vm3, %v1004_v45, -inf }
 0x69c   :  { %829 = vst.msk [vmem:[#allocation3 + $0x8] sm:$0xff] %vm522_vm1, %v5860_v55  ;;  %v799_v58 = vpop.f32.mrb[19].mxu1  ;;  %1023 = vmax.xlane.f32.xlu0 %v1022_v54  ;;  %v1019_v63 = vsel %vm648_vm3, %v7819_v57, -inf }
 0x69d   :  { %828 = vst.msk [vmem:[#allocation3] sm:$0xff] %vm522_vm1, %v799_v58  ;;  %1020 = vmax.xlane.f32.xlu1 %v1019_v63 }
 0x69f   :  { %v7831_v59 = vpop.eup %6907 }
 0x6a0   :  { %1047 = vadd.xlane.f32.xlu0 %v1046_v53  ;;  %v1049_v39 = vsel %vm648_vm3, %v7831_v59, 0.0 }
 0x6a1   :  { %1044 = vadd.xlane.f32.xlu1 %v1043_v31 }
 0x6a2   :  { %v5863_v41 = vpop.f32.mrb[20].mxu1 }
 0x6a3   :  { %v7833_v9 = vpop.eup %6909  ;;  %831 = vst.msk [vmem:[#allocation3 + $0x18] sm:$0xff] %vm522_vm1, %v5863_v41  ;;  %v809_v18 = vpop.f32.mrb[21].mxu1  ;;  %v6707_v41 = vpack.i.bf16 %v7643_v1, %v7652_v5 }
 0x6a4   :  { %830 = vst.msk [vmem:[#allocation3 + $0x10] sm:$0xff] %vm522_vm1, %v809_v18  ;;  %v1052_v8 = vsel %vm648_vm3, %v7833_v9, 0.0 }
 0x6a5   :  { %1053 = vadd.xlane.f32.xlu0 %v1052_v8  ;;  %1050 = vadd.xlane.f32.xlu1 %v1049_v39 }
 0x6bb   :  { %6703 = vrot.lane.b32.xlu0 %v6702_v19, %s7194_s26 }
 0x6bf   :  { %6713 = vrot.lane.b32.xlu0 %v6712_v6, %s7194_s26 }
 0x6d6   :  { %v5866_v20 = vpop.f32.mrb[22].mxu1 }
 0x6d7   :  { %833 = vst.msk [vmem:[#allocation3 + $0x28] sm:$0xff] %vm522_vm1, %v5866_v20  ;;  %v819_v23 = vpop.f32.mrb[23].mxu1 }
 0x6d8   :  { %832 = vst.msk [vmem:[#allocation3 + $0x20] sm:$0xff] %vm522_vm1, %v819_v23 }
 0x6da   :  { %v5923_v14 = vpop.f32.mrb[24].mxu1 }
 0x6db   :  { %v1391_v25 = vadd.f32 %v5923_v14, %v7696_v30  ;;  %v1385_v62 = vpop.f32.mrb[25].mxu1 }
 0x6dd   :  { %v1417_v28 = vsel %vm648_vm3, %v1391_v25, -inf }
 0x6de   :  { %1418 = vmax.xlane.f32.xlu0 %v1417_v28  ;;  %v5926_v52 = vpop.f32.mrb[26].mxu1 }
 0x6df   :  { %v7852_v26 = vadd.f32 %v5926_v52, %v7708_v40  ;;  %v1395_v11 = vpop.f32.mrb[27].mxu1 }
 0x6e0   :  { %v1396_v5 = vadd.f32 %v1395_v11, %v7714_v17 }
 0x6e1   :  { %v1423_v16 = vsel %vm648_vm3, %v7852_v26, -inf }
 0x6e2   :  { %1424 = vmax.xlane.f32.xlu0 %v1423_v16  ;;  %v5929_v29 = vpop.f32.mrb[28].mxu1 }
 0x6e3   :  { %v7857_v60 = vadd.f32 %v5929_v29, %v7728_v50  ;;  %v1405_v33 = vpop.f32.mrb[29].mxu1 }
 0x6e4   :  { %v7882_v28 = vadd.f32 %v1405_v33, %v7723_v49 }
 0x6e5   :  { %v1429_v35 = vsel %vm648_vm3, %v7857_v60, -inf }
 0x6e6   :  { %1430 = vmax.xlane.f32.xlu0 %v1429_v35  ;;  %v1426_v52 = vsel %vm648_vm3, %v7882_v28, -inf }
 0x6fc   :  { %6728 = vrot.lane.b32.xlu0 %v6712_v6, %s7195_s28 }
 0x729   :  { %v1024_v42 = vpop.xlane.xlu0 %1023 }
 0x72a   :  { %v1030_v43 = vsub.f32 %v1004_v45, %v1024_v42  ;;  %v1021_v37 = vpop.xlane.xlu1 %1020 }
 0x72b   :  { %v1029_v18 = vsub.f32 %v7819_v57, %v1021_v37 }
 0x72c   :  { %v1041_v47 = vmul.f32 1.442695, %v1030_v43 }
 0x72d   :  { %v1048_v46 = vpop.xlane.xlu0 %1047  ;;  %v1039_v8 = vmul.f32 1.442695, %v1029_v18 }
 0x72e   :  { %6911 = vpow2.f32 %v1041_v47  ;;  %v1045_v3 = vpop.xlane.xlu1 %1044 }
 0x72f   :  { %6913 = vrcp.f32 %v1045_v3 }
 0x730   :  { %6915 = vpow2.f32 %v1039_v8 }
 0x732   :  { %v1054_v48 = vpop.xlane.xlu0 %1053  ;;  %v1051_v11 = vpop.xlane.xlu1 %1050 }
 0x736   :  { %v6704_v34 = vpop.permute.xlu0 %6703 }
 0x737   :  { %v6706_v55 = vunpack.i.h.bf16 %v6704_v34  ;;  %v6705_v54 = vunpack.i.l.bf16 %v6704_v34 }
 0x738   :  { %v7862_v58 = vpop.eup %6911 }
 0x739   :  { %v1058_v63 = vsel %vm648_vm3, %v7862_v58, 0.0  ;;  %v6311_v53 = vpack.c.bf16 %v6706_v55, %v6705_v54  ;;  %v6914_v31 = vpop.eup %6913 }
 0x73a   :  { %1059 = vadd.xlane.f32.xlu1 %v1058_v63  ;;  %v1067_v45 = vmul.f32 %v6914_v31, %v6906_v21  ;;  %v6714_v39 = vpop.permute.xlu0 %6713  ;;  %v7872_v14 = vpop.eup %6915  ;;  %v1386_v21 = vadd.f32 %v1385_v62, %v7701_v32 }
 0x73b   :  { %6312 = vmatprep.subr.bf16.mxu0 %v6311_v53  ;;  %v1055_v1 = vsel %vm648_vm3, %v7872_v14, 0.0  ;;  %v6716_v33 = vunpack.i.h.bf16 %v6714_v39  ;;  %v6715_v35 = vunpack.i.l.bf16 %v6714_v39 }
 0x73c   :  { %6314 = vmatpush3.bf16.msra.mxu0 %v6311_v53  ;;  %5900 = vmatprep.mubr.msk.f32.mxu0 %vm648_vm3, %v1067_v45 }
 0x73d   :  { %v6319_v55 = vpack.c.bf16 %v6716_v33, %v6715_v35 }
 0x74b   :  { %6708 = vrot.lane.b32.xlu1 %v6707_v41, %s7194_s26 }
 0x74f   :  { %6718 = vrot.lane.b32.xlu1 %v6702_v19, %s7195_s28  ;;  %v1414_v19 = vsel %vm648_vm3, %v1386_v21, -inf }
 0x76b   :  { %v1419_v6 = vpop.xlane.xlu0 %1418 }
 0x76c   :  { %v1433_v20 = vsub.f32 %v1391_v25, %v1419_v6  ;;  %v1420_v25 = vsel %vm648_vm3, %v1396_v5, -inf }
 0x76e   :  { %v1440_v23 = vmul.f32 1.442695, %v1433_v20 }
 0x770   :  { %6917 = vpow2.f32 %v1440_v23 }
 0x771   :  { %6919 = vrcp.f32 %v1048_v46 }
 0x772   :  { %6921 = vrcp.f32 %v1051_v11 }
 0x773   :  { %1056 = vadd.xlane.f32.xlu1 %v1055_v1  ;;  %6923 = vrcp.f32 %v1054_v48 }
 0x777   :  { %1415 = vmax.xlane.f32.xlu1 %v1414_v19 }
 0x77a   :  { %v7879_v57 = vpop.eup %6917 }
 0x77b   :  { %1421 = vmax.xlane.f32.xlu1 %v1420_v25  ;;  %v1453_v62 = vsel %vm648_vm3, %v7879_v57, 0.0  ;;  %v6920_v54 = vpop.eup %6919 }
 0x77c   :  { %1454 = vadd.xlane.f32.xlu0 %v1453_v62  ;;  %v1068_v46 = vmul.f32 %v6920_v54, %v7822_v24 }
 0x77f   :  { %1427 = vmax.xlane.f32.xlu1 %v1426_v52 }
 0x790   :  { %6723 = vrot.lane.b32.xlu1 %v6707_v41, %s7195_s28  ;;  %v1425_v41 = vpop.xlane.xlu0 %1424 }
 0x792   :  { %6738 = vrot.lane.b32.xlu0 %v7581_v27, %s9449_s30  ;;  %v6922_v27 = vpop.eup %6921 }
 0x793   :  { %v6924_v53 = vpop.eup %6923  ;;  %v1069_v31 = vmul.f32 %v6922_v27, %v7831_v59 }
 0x794   :  { %v1070_v48 = vmul.f32 %v6924_v53, %v7833_v9  ;;  %v1431_v39 = vpop.xlane.xlu0 %1430 }
 0x795   :  { %v1437_v54 = vsub.f32 %v7857_v60, %v1431_v39 }
 0x797   :  { %v1448_v27 = vmul.f32 1.442695, %v1437_v54 }
 0x798   :  { %v6729_v62 = vpop.permute.xlu0 %6728 }
 0x799   :  { %v6731_v52 = vunpack.i.h.bf16 %v6729_v62  ;;  %v6730_v11 = vunpack.i.l.bf16 %v6729_v62 }
 0x7c7   :  { %v1060_v16 = vpop.xlane.xlu1 %1059 }
 0x7c8   :  { %6925 = vrcp.f32 %v1060_v16 }
 0x7cb   :  { %v6709_v29 = vpop.permute.xlu1 %6708 }
 0x7cc   :  { %v6711_v42 = vunpack.i.h.bf16 %v6709_v29  ;;  %v6710_v43 = vunpack.i.l.bf16 %v6709_v29 }
 0x7ce   :  { %v6315_v37 = vpack.c.bf16 %v6711_v42, %v6710_v43  ;;  %v1649_v43 = vld [vmem:[#allocation2 + $0x10] sm:$0xff] }
 0x7cf   :  { %v6719_v47 = vpop.permute.xlu1 %6718 }
 0x7d0   :  { %v6721_v3 = vunpack.i.h.bf16 %v6719_v47  ;;  %v6720_v34 = vunpack.i.l.bf16 %v6719_v47  ;;  %6316 = vmatprep.subr.bf16.mxu0 %v6315_v37 }
 0x7d1   :  { %6318 = vmatpush3.bf16.msra.mxu0 %v6315_v37  ;;  %v1648_v37 = vld [vmem:[#allocation2] sm:$0xff] }
 0x7d2   :  { %6320 = vmatprep.subr.bf16.mxu0 %v6319_v55  ;;  %v6341_v63 = vpack.c.bf16 %v6721_v3, %v6720_v34  ;;  %v6926_v20 = vpop.eup %6925  ;;  %v6732_v47 = vpack.i.bf16 %v1649_v43, %v1648_v37  ;;  %v1654_v3 = vmul.f32 0.25, %v1648_v37  ;;  %v1435_v34 = vsub.f32 %v7852_v26, %v1425_v41 }
 0x7d3   :  { %v1072_v9 = vmul.f32 %v6926_v20, %v7862_v58 }
 0x7d5   :  { %6322 = vmatpush3.bf16.msra.mxu0 %v6319_v55  ;;  %v1444_v55 = vmul.f32 1.442695, %v1435_v34 }
 0x7d6   :  { %6342 = vmatprep.subr.bf16.mxu0 %v6341_v63 }
 0x7d8   :  { %5901 = vmatmul.mubr.msk.f32.vlgmr.msra.gmra.mrb[18].mxu0 %vm648_vm3, %v1068_v46 }
 0x7d9   :  { %5903 = vmatprep.mubr.msk.f32.mxu0 %vm648_vm3, %v1069_v31  ;;  %6344 = vmatpush3.bf16.msra.mxu0 %v6341_v63  ;;  %v1655_v31 = vmul.f32 0.25, %v1649_v43 }
 0x7dc   :  { %5904 = vmatmul.mubr.msk.f32.gmra.mrb[20].mxu0 %vm648_vm3, %v1070_v48 }
 0x800   :  { %v1057_v45 = vpop.xlane.xlu1 %1056 }
 0x801   :  { %6927 = vrcp.f32 %v1057_v45 }
 0x804   :  { %v1416_v18 = vpop.xlane.xlu1 %1415 }
 0x805   :  { %v1432_v8 = vsub.f32 %v1386_v21, %v1416_v18 }
 0x807   :  { %v1438_v24 = vmul.f32 1.442695, %v1432_v8 }
 0x808   :  { %v1422_v6 = vpop.xlane.xlu1 %1421 }
 0x809   :  { %6929 = vpow2.f32 %v1438_v24  ;;  %v1434_v59 = vsub.f32 %v1396_v5, %v1422_v6 }
 0x80b   :  { %v6928_v23 = vpop.eup %6927  ;;  %v1442_v1 = vmul.f32 1.442695, %v1434_v59 }
 0x80c   :  { %v1428_v19 = vpop.xlane.xlu1 %1427  ;;  %v1071_v25 = vmul.f32 %v6928_v23, %v7872_v14  ;;  %v6349_v14 = vpack.c.bf16 %v6731_v52, %v6730_v11 }
 0x80d   :  { %6931 = vpow2.f32 %v1442_v1  ;;  %v1436_v63 = vsub.f32 %v7882_v28, %v1428_v19  ;;  %v1455_v28 = vpop.xlane.xlu0 %1454 }
 0x80e   :  { %5906 = vmatprep.mubr.msk.f32.mxu0 %vm648_vm3, %v1071_v25  ;;  %6933 = vpow2.f32 %v1444_v55 }
 0x80f   :  { %5907 = vmatmul.mubr.msk.f32.gmra.mrb[22].mxu0 %vm648_vm3, %v1072_v9  ;;  %6935 = vpow2.f32 %v1448_v27 }
 0x810   :  { %v6724_v21 = vpop.permute.xlu1 %6723 }
 0x811   :  { %v6726_v16 = vunpack.i.h.bf16 %v6724_v21  ;;  %v6725_v29 = vunpack.i.l.bf16 %v6724_v21  ;;  %v6739_v48 = vpop.permute.xlu0 %6738 }
 0x812   :  { %v6741_v20 = vunpack.i.h.bf16 %v6739_v48  ;;  %v6740_v23 = vunpack.i.l.bf16 %v6739_v48 }
 0x813   :  { %v6930_v5 = vpop.eup %6929  ;;  %v6345_v33 = vpack.c.bf16 %v6726_v16, %v6725_v29 }
 0x814   :  { %v1450_v35 = vsel %vm648_vm3, %v6930_v5, 0.0  ;;  %v6359_v21 = vpack.c.bf16 %v6741_v20, %v6740_v23 }
 0x815   :  { %1451 = vadd.xlane.f32.xlu1 %v1450_v35  ;;  %6346 = vmatprep.subr.bf16.mxu0 %v6345_v33 }
 0x816   :  { %6348 = vmatpush3.bf16.msra.mxu0 %v6345_v33 }
 0x817   :  { %v7903_v42 = vpop.eup %6931  ;;  %6350 = vmatprep.subr.bf16.mxu0 %v6349_v14 }
 0x818   :  { %v1456_v58 = vsel %vm648_vm3, %v7903_v42, 0.0  ;;  %v6934_v46 = vpop.eup %6933 }
 0x819   :  { %1457 = vadd.xlane.f32.xlu0 %v1456_v58  ;;  %v1459_v53 = vsel %vm648_vm3, %v6934_v46, 0.0  ;;  %v7919_v26 = vpop.eup %6935 }
 0x81a   :  { %6352 = vmatpush3.bf16.msra.mxu0 %v6349_v14 }
 0x826   :  { %6733 = vrot.lane.b32.xlu1 %v6732_v47, %s9449_s30 }
 0x82f   :  { %6743 = vrot.lane.b32.xlu0 %v7596_v38, %s9449_s30  ;;  %v1446_v38 = vmul.f32 1.442695, %v1436_v63 }
 0x831   :  { %6937 = vpow2.f32 %v1446_v38 }
 0x832   :  { %6939 = vrcp.f32 %v1455_v28 }
 0x833   :  { %1672 = vrot.lane.b32.xlu0 %v1654_v3, %s9447_s29 }
 0x837   :  { %1676 = vrot.lane.b32.xlu0 %v7650_v4, %s9447_s29  ;;  %v1465_v4 = vsel %vm648_vm3, %v7919_v26, 0.0 }
 0x83b   :  { %1680 = vrot.lane.b32.xlu0 %v7666_v15, %s9447_s29  ;;  %v6938_v60 = vpop.eup %6937 }
 0x83c   :  { %v1462_v15 = vsel %vm648_vm3, %v6938_v60, 0.0 }
 0x84a   :  { %1460 = vadd.xlane.f32.xlu1 %v1459_v53 }
 0x84e   :  { %1466 = vadd.xlane.f32.xlu1 %v1465_v4 }
 0x852   :  { %1463 = vadd.xlane.f32.xlu1 %v1462_v15 }
 0x863   :  { %1674 = vrot.lane.b32.xlu1 %v1655_v31, %s9447_s29 }
 0x867   :  { %1678 = vrot.lane.b32.xlu1 %v7663_v13, %s9447_s29  ;;  %v6940_v13 = vpop.eup %6939 }
 0x868   :  { %v1475_v19 = vmul.f32 %v6940_v13, %v7879_v57 }
 0x86b   :  { %1682 = vrot.lane.b32.xlu1 %v7679_v22, %s9447_s29 }
 0x8a2   :  { %v1452_v45 = vpop.xlane.xlu1 %1451 }
 0x8a3   :  { %6941 = vrcp.f32 %v1452_v45 }
 0x8a6   :  { %v1458_v41 = vpop.xlane.xlu0 %1457  ;;  %v6734_v18 = vpop.permute.xlu1 %6733 }
 0x8a7   :  { %6943 = vrcp.f32 %v1458_v41  ;;  %v6736_v8 = vunpack.i.h.bf16 %v6734_v18  ;;  %v6735_v24 = vunpack.i.l.bf16 %v6734_v18 }
 0x8a9   :  { %v6353_v39 = vpack.c.bf16 %v6736_v8, %v6735_v24 }
 0x8aa   :  { %v6744_v52 = vpop.permute.xlu0 %6743 }
 0x8ab   :  { %v7929_v6 = vpop.f32.mrb[18].mxu0  ;;  %6355 = vmatprep.subr.msk.bf16.mxu0 %vm7616_vm2, %v6353_v39  ;;  %v6746_v57 = vunpack.i.h.bf16 %v6744_v52  ;;  %v6745_v16 = vunpack.i.l.bf16 %v6744_v52 }
 0x8ac   :  { %v7933_v59 = vpop.f32.mrb[19].mxu0 }
 0x8ad   :  { %v6942_v22 = vpop.eup %6941  ;;  %v6365_v29 = vpack.c.bf16 %v6746_v57, %v6745_v16 }
 0x8ae   :  { %v1474_v1 = vmul.f32 %v6942_v22, %v6930_v5  ;;  %v1673_v3 = vpop.permute.xlu0 %1672 }
 0x8af   :  { %v7936_v25 = vpop.f32.mrb[20].mxu0 }
 0x8b0   :  { %v7938_v9 = vpop.f32.mrb[21].mxu0  ;;  %5942 = vmatprep.mubr.msk.f32.mxu0 %vm648_vm3, %v1474_v1 }
 0x8b1   :  { %v6944_v62 = vpop.eup %6943  ;;  %5943 = vmatmul.mubr.msk.f32.vlgmr.msra.gmra.mrb[24].mxu0 %vm648_vm3, %v1475_v19 }
 0x8b2   :  { %6358 = vmatpush3.bf16.xpose.msk.msra.mxu0 %vm7616_vm2, %v6353_v39  ;;  %v1476_v11 = vmul.f32 %v6944_v62, %v7903_v42  ;;  %v1677_v27 = vpop.permute.xlu0 %1676 }
 0x8b3   :  { %6361 = vmatprep.subr.msk.bf16.mxu0 %vm7616_vm2, %v6359_v21 }
 0x8b4   :  { %5945 = vmatprep.mubr.msk.f32.mxu0 %vm648_vm3, %v1476_v11 }
 0x8b6   :  { %v1681_v38 = vpop.permute.xlu0 %1680 }
 0x8ba   :  { %6364 = vmatpush3.bf16.xpose.msk.msra.mxu0 %vm7616_vm2, %v6359_v21 }
 0x8bb   :  { %6367 = vmatprep.subr.msk.bf16.mxu0 %vm7616_vm2, %v6365_v29 }
 0x8c2   :  { %6370 = vmatpush3.bf16.xpose.msk.msra.mxu0 %vm7616_vm2, %v6365_v29 }
 0x8d7   :  { %v1461_v5 = vpop.xlane.xlu1 %1460 }
 0x8d8   :  { %6945 = vrcp.f32 %v1461_v5 }
 0x8db   :  { %v1467_v33 = vpop.xlane.xlu1 %1466 }
 0x8dc   :  { %6947 = vrcp.f32 %v1467_v33 }
 0x8df   :  { %v1464_v35 = vpop.xlane.xlu1 %1463 }
 0x8e0   :  { %6949 = vrcp.f32 %v1464_v35 }
 0x8e2   :  { %v6946_v14 = vpop.eup %6945  ;;  %v7954_v42 = vpop.f32.mrb[22].mxu0 }
 0x8e3   :  { %v7956_v58 = vpop.f32.mrb[23].mxu0  ;;  %v1477_v43 = vmul.f32 %v6946_v14, %v6934_v46  ;;  %v1675_v54 = vpop.permute.xlu1 %1674 }
 0x8e5   :  { %5946 = vmatmul.mubr.msk.f32.gmra.mrb[26].mxu0 %vm648_vm3, %v1477_v43 }
 0x8e6   :  { %v6948_v37 = vpop.eup %6947 }
 0x8e7   :  { %v1479_v55 = vmul.f32 %v6948_v37, %v7919_v26  ;;  %v1679_v63 = vpop.permute.xlu1 %1678 }
 0x8ea   :  { %v6950_v47 = vpop.eup %6949 }
 0x8eb   :  { %v1478_v34 = vmul.f32 %v6950_v47, %v6938_v60  ;;  %v1683_v46 = vpop.permute.xlu1 %1682 }
 0x8ed   :  { %5948 = vmatprep.mubr.msk.f32.mxu0 %vm648_vm3, %v1478_v34 }
 0x8ee   :  { %5949 = vmatmul.mubr.msk.f32.gmra.mrb[28].mxu0 %vm648_vm3, %v1479_v55 }
 0x8ef   :  { %5963 = vmatprep.mubr.msk.f32.mxu0 %vm522_vm1, %v1673_v3 }
 0x8f2   :  { %5964 = vmatmul.mubr.msk.f32.vlgmr.msra.gmra.mrb[30].mxu0 %vm522_vm1, %v1675_v54 }
 0x8f3   :  { %5966 = vmatprep.mubr.msk.f32.mxu0 %vm522_vm1, %v1677_v27 }
 0x8f6   :  { %5967 = vmatmul.mubr.msk.f32.gmra.mrb[32].mxu0 %vm522_vm1, %v1679_v63 }
 0x8f7   :  { %5969 = vmatprep.mubr.msk.f32.mxu0 %vm522_vm1, %v1681_v38 }
 0x8fa   :  { %5970 = vmatmul.mubr.msk.f32.gmra.mrb[34].mxu0 %vm522_vm1, %v1683_v46 }
 0x8fb   :  { %2409 = vmatprep.mubr.f32.mxu0 %v7190_v10 }
 0x984   :  { %v7969_v53 = vpop.f32.mrb[24].mxu0 }
 0x985   :  { %v7971_v26 = vpop.f32.mrb[25].mxu0 }
 0x9b8   :  { %v7973_v4 = vpop.f32.mrb[26].mxu0 }
 0x9b9   :  { %v7975_v60 = vpop.f32.mrb[27].mxu0 }
 0x9c1   :  { %v7977_v15 = vpop.f32.mrb[28].mxu0 }
 0x9c2   :  { %v7979_v31 = vpop.f32.mrb[29].mxu0 }
 0x9c5   :  { %v5965_v28 = vpop.f32.mrb[30].mxu0 }
 0x9c6   :  { %v1798_v48 = vadd.f32 %v5965_v28, %v7696_v30  ;;  %v1792_v45 = vpop.f32.mrb[31].mxu0 }
 0x9c7   :  { %v1793_v41 = vadd.f32 %v1792_v45, %v7701_v32 }
 0x9c8   :  { %v1824_v18 = vsel %vm648_vm3, %v1798_v48, -inf }
 0x9c9   :  { %1825 = vmax.xlane.f32.xlu1 %v1824_v18  ;;  %v5968_v8 = vpop.f32.mrb[32].mxu0  ;;  %v1821_v24 = vsel %vm648_vm3, %v1793_v41, -inf }
 0x9ca   :  { %v1802_v39 = vpop.f32.mrb[33].mxu0  ;;  %1822 = vmax.xlane.f32.xlu0 %v1821_v24  ;;  %v1808_v22 = vadd.f32 %v5968_v8, %v7708_v40  ;;  %v1660_v40 = vld [vmem:[#allocation2 + $0x8] sm:$0xff] }
 0x9cb   :  { %v1803_v13 = vadd.f32 %v1802_v39, %v7714_v17  ;;  %v1661_v17 = vld [vmem:[#allocation2 + $0x18] sm:$0xff] }
 0x9cc   :  { %v1830_v62 = vsel %vm648_vm3, %v1808_v22, -inf  ;;  %v6747_v52 = vpack.i.bf16 %v1661_v17, %v1660_v40 }
 0x9cd   :  { %v5971_v20 = vpop.f32.mrb[34].mxu0  ;;  %v1827_v23 = vsel %vm648_vm3, %v1803_v13, -inf }
 0x9ce   :  { %v1818_v30 = vadd.f32 %v5971_v20, %v7728_v50  ;;  %v1812_v1 = vpop.f32.mrb[35].mxu0  ;;  %1828 = vmax.xlane.f32.xlu0 %v1827_v23 }
 0x9cf   :  { %v1813_v19 = vadd.f32 %v1812_v1, %v7723_v49  ;;  %v1665_v1 = vld [vmem:[#allocation2 + $0x58] sm:$0xff] }
 0x9d0   :  { %v1836_v32 = vsel %vm648_vm3, %v1818_v30, -inf }
 0x9d1   :  { %1837 = vmax.xlane.f32.xlu1 %v1836_v32  ;;  %v1833_v21 = vsel %vm648_vm3, %v1813_v19, -inf  ;;  %v1664_v32 = vld [vmem:[#allocation2 + $0x48] sm:$0xff] }
 0x9d2   :  { %1831 = vmax.xlane.f32.xlu0 %v1830_v62  ;;  %v1663_v62 = vld [vmem:[#allocation2 + $0x38] sm:$0xff] }
 0x9d6   :  { %1834 = vmax.xlane.f32.xlu0 %v1833_v21  ;;  %v1662_v21 = vld [vmem:[#allocation2 + $0x28] sm:$0xff] }
 0x9d7   :  { %v6752_v17 = vpack.i.bf16 %v1663_v62, %v1662_v21 }
 0x9ec   :  { %6748 = vrot.lane.b32.xlu0 %v6747_v52, %s9447_s29 }
 0xa56   :  { %v1826_v11 = vpop.xlane.xlu1 %1825 }
 0xa57   :  { %v1840_v50 = vsub.f32 %v1798_v48, %v1826_v11  ;;  %v1823_v57 = vpop.xlane.xlu0 %1822 }
 0xa58   :  { %v1839_v16 = vsub.f32 %v1793_v41, %v1823_v57 }
 0xa59   :  { %v1847_v29 = vmul.f32 1.442695, %v1840_v50 }
 0xa5a   :  { %v1845_v5 = vmul.f32 1.442695, %v1839_v16 }
 0xa5b   :  { %6951 = vpow2.f32 %v1847_v29  ;;  %v1829_v49 = vpop.xlane.xlu0 %1828 }
 0xa5c   :  { %6953 = vpow2.f32 %v1845_v5  ;;  %v1841_v33 = vsub.f32 %v1803_v13, %v1829_v49 }
 0xa5e   :  { %v1849_v35 = vmul.f32 1.442695, %v1841_v33  ;;  %v1838_v14 = vpop.xlane.xlu1 %1837 }
 0xa5f   :  { %v1844_v43 = vsub.f32 %v1818_v30, %v1838_v14  ;;  %v1832_v37 = vpop.xlane.xlu0 %1831 }
 0xa60   :  { %6955 = vpow2.f32 %v1849_v35  ;;  %v1842_v47 = vsub.f32 %v1808_v22, %v1832_v37 }
 0xa61   :  { %v1855_v3 = vmul.f32 1.442695, %v1844_v43 }
 0xa62   :  { %v1851_v34 = vmul.f32 1.442695, %v1842_v47 }
 0xa63   :  { %v1835_v55 = vpop.xlane.xlu0 %1834 }
 0xa64   :  { %6957 = vpow2.f32 %v1851_v34  ;;  %v1843_v54 = vsub.f32 %v1813_v19, %v1835_v55  ;;  %v6757_v19 = vpack.i.bf16 %v1665_v1, %v1664_v32  ;;  %v2068_v1 = vld [vmem:[%s9433_s8 + $0x38] sm:$0xff] }
 0xa65   :  { %v7994_v27 = vpop.eup %6951  ;;  %6959 = vpow2.f32 %v1855_v3 }
 0xa66   :  { %v6954_v63 = vpop.eup %6953  ;;  %v1853_v38 = vmul.f32 1.442695, %v1843_v54  ;;  %v1860_v46 = vsel %vm648_vm3, %v7994_v27, 0.0 }
 0xa67   :  { %1861 = vadd.xlane.f32.xlu1 %v1860_v46  ;;  %v6749_v28 = vpop.permute.xlu0 %6748  ;;  %v1857_v48 = vsel %vm648_vm3, %v6954_v63, 0.0 }
 0xa68   :  { %v6751_v45 = vunpack.i.h.bf16 %v6749_v28  ;;  %v6750_v41 = vunpack.i.l.bf16 %v6749_v28  ;;  %1858 = vadd.xlane.f32.xlu0 %v1857_v48  ;;  %6961 = vpow2.f32 %v1853_v38 }
 0xa6a   :  { %v7999_v18 = vpop.eup %6955  ;;  %v6371_v8 = vpack.c.bf16 %v6751_v45, %v6750_v41  ;;  %v2061_v41 = vld [vmem:[%s9433_s8] sm:$0xff] }
 0xa6b   :  { %v1863_v24 = vsel %vm648_vm3, %v7999_v18, 0.0 }
 0xa6c   :  { %1864 = vadd.xlane.f32.xlu0 %v1863_v24  ;;  %6372 = vmatprep.subr.bf16.mxu1 %v6371_v8 }
 0xa6d   :  { %6374 = vmatpush3.bf16.msra.mxu1 %v6371_v8  ;;  %v2063_v8 = vld [vmem:[%s9433_s8 + $0x10] sm:$0xff] }
 0xa6e   :  { %v8003_v39 = vpop.eup %6957 }
 0xa6f   :  { %v1866_v13 = vsel %vm648_vm3, %v8003_v39, 0.0  ;;  %v8007_v22 = vpop.eup %6959 }
 0xa70   :  { %1867 = vadd.xlane.f32.xlu1 %v1866_v13  ;;  %v1872_v20 = vsel %vm648_vm3, %v8007_v22, 0.0 }
 0xa72   :  { %v8011_v23 = vpop.eup %6961 }
 0xa73   :  { %v1869_v30 = vsel %vm648_vm3, %v8011_v23, 0.0 }
 0xa74   :  { %1873 = vadd.xlane.f32.xlu1 %v1872_v20  ;;  %v2066_v20 = vld [vmem:[%s9433_s8 + $0x28] sm:$0xff] }
 0xa78   :  { %1870 = vadd.xlane.f32.xlu1 %v1869_v30  ;;  %v2067_v30 = vld [vmem:[%s9433_s8 + $0x30] sm:$0xff] }
 0xa79   :  { %v6395_v32 = vpack.c.bf16 %v2068_v1, %v2067_v30 }
 0xa82   :  { %6758 = vrot.lane.b32.xlu0 %v6757_v19, %s9447_s29 }
 0xa86   :  { %1218 = vrot.lane.b32.xlu0 %v7929_v6, %s9449_s30 }
 0xa89   :  { %6753 = vrot.lane.b32.xlu1 %v6752_v17, %s9447_s29 }
 0xa8a   :  { %1625 = vrot.lane.b32.xlu0 %v7969_v53, %s7193_s25 }
 0xa8d   :  { %1216 = vrot.lane.b32.xlu1 %v7933_v59, %s9449_s30 }
 0xa8e   :  { %1222 = vrot.lane.b32.xlu0 %v7936_v25, %s9449_s30 }
 0xa91   :  { %1623 = vrot.lane.b32.xlu1 %v7971_v26, %s7193_s25 }
 0xa92   :  { %1629 = vrot.lane.b32.xlu0 %v7973_v4, %s7193_s25 }
 0xa95   :  { %1220 = vrot.lane.b32.xlu1 %v7938_v9, %s9449_s30 }
 0xa99   :  { %1627 = vrot.lane.b32.xlu1 %v7975_v60, %s7193_s25 }
 0xaf4   :  { %v1862_v53 = vpop.xlane.xlu1 %1861 }
 0xaf5   :  { %v1859_v6 = vpop.xlane.xlu0 %1858 }
 0xaf6   :  { %6963 = vrcp.f32 %v1859_v6 }
 0xaf7   :  { %6965 = vrcp.f32 %v1862_v53 }
 0xaf9   :  { %v1865_v40 = vpop.xlane.xlu0 %1864 }
 0xafa   :  { %6967 = vrcp.f32 %v1865_v40 }
 0xafd   :  { %v1868_v59 = vpop.xlane.xlu1 %1867  ;;  %v6759_v52 = vpop.permute.xlu0 %6758 }
 0xafe   :  { %v6761_v16 = vunpack.i.h.bf16 %v6759_v52  ;;  %v6760_v29 = vunpack.i.l.bf16 %v6759_v52  ;;  %6969 = vrcp.f32 %v1868_v59 }
 0xb00   :  { %v6964_v25 = vpop.eup %6963  ;;  %v6379_v43 = vpack.c.bf16 %v6761_v16, %v6760_v29  ;;  %v5311_v29 = vld [vmem:[%s9434_s9] ss:$0 sm:$0xff] }
 0xb01   :  { %v1874_v11 = vpop.xlane.xlu1 %1873  ;;  %v1219_v50 = vpop.permute.xlu0 %1218  ;;  %v1881_v26 = vmul.f32 %v6964_v25, %v6954_v63 }
 0xb02   :  { %1236 = vst.msk [vmem:[#allocation3 + $0x8] sm:$0xff] %vm1234_vm4, %v1219_v50  ;;  %v6966_v37 = vpop.eup %6965 }
 0xb03   :  { %5984 = vmatprep.mubr.msk.f32.mxu1 %vm648_vm3, %v1881_v26  ;;  %v1882_v34 = vmul.f32 %v6966_v37, %v7994_v27 }
 0xb04   :  { %v6968_v3 = vpop.eup %6967 }
 0xb05   :  { %v1871_v9 = vpop.xlane.xlu1 %1870  ;;  %v1626_v4 = vpop.permute.xlu0 %1625  ;;  %v1883_v63 = vmul.f32 %v6968_v3, %v7999_v18  ;;  %v2062_v18 = vld [vmem:[%s9433_s8 + $0x8] sm:$0xff] }
 0xb06   :  { %1643 = vst.msk [vmem:[#allocation3 + $0x8] sm:$0xff] %vm1641_vm5, %v1626_v4  ;;  %6971 = vrcp.f32 %v1871_v9  ;;  %v6383_v24 = vpack.c.bf16 %v2062_v18, %v2061_v41 }
 0xb07   :  { %6973 = vrcp.f32 %v1874_v11 }
 0xb08   :  { %v6970_v55 = vpop.eup %6969 }
 0xb09   :  { %v6754_v60 = vpop.permute.xlu1 %6753  ;;  %v1223_v57 = vpop.permute.xlu0 %1222  ;;  %v1884_v46 = vmul.f32 %v6970_v55, %v8003_v39  ;;  %v2064_v39 = vld [vmem:[%s9433_s8 + $0x18] sm:$0xff] }
 0xb0a   :  { %v6756_v5 = vunpack.i.h.bf16 %v6754_v60  ;;  %v6755_v49 = vunpack.i.l.bf16 %v6754_v60  ;;  %1238 = vst.msk [vmem:[#allocation3 + $0x18] sm:$0xff] %vm1234_vm4, %v1223_v57  ;;  %v6387_v13 = vpack.c.bf16 %v2064_v39, %v2063_v8 }
 0xb0c   :  { %v6375_v33 = vpack.c.bf16 %v6756_v5, %v6755_v49 }
 0xb0d   :  { %v1217_v35 = vpop.permute.xlu1 %1216  ;;  %v1630_v14 = vpop.permute.xlu0 %1629 }
 0xb0e   :  { %1235 = vst.msk [vmem:[#allocation3] sm:$0xff] %vm1234_vm4, %v1217_v35  ;;  %6376 = vmatprep.subr.bf16.mxu1 %v6375_v33 }
 0xb0f   :  { %1645 = vst.msk [vmem:[#allocation3 + $0x18] sm:$0xff] %vm1641_vm5, %v1630_v14  ;;  %6378 = vmatpush3.bf16.msra.mxu1 %v6375_v33 }
 0xb10   :  { %6380 = vmatprep.subr.bf16.mxu1 %v6379_v43  ;;  %v6972_v38 = vpop.eup %6971 }
 0xb11   :  { %v1624_v47 = vpop.permute.xlu1 %1623  ;;  %v6974_v28 = vpop.eup %6973  ;;  %v1885_v45 = vmul.f32 %v6972_v38, %v8011_v23 }
 0xb12   :  { %1642 = vst.msk [vmem:[#allocation3] sm:$0xff] %vm1641_vm5, %v1624_v47  ;;  %v1886_v27 = vmul.f32 %v6974_v28, %v8007_v22  ;;  %v2065_v22 = vld [vmem:[%s9433_s8 + $0x20] sm:$0xff] }
 0xb13   :  { %6382 = vmatpush3.bf16.msra.mxu1 %v6379_v43  ;;  %v6391_v23 = vpack.c.bf16 %v2066_v20, %v2065_v22 }
 0xb14   :  { %6384 = vmatprep.subr.bf16.mxu1 %v6383_v24 }
 0xb15   :  { %v1221_v54 = vpop.permute.xlu1 %1220 }
 0xb16   :  { %1237 = vst.msk [vmem:[#allocation3 + $0x10] sm:$0xff] %vm1234_vm4, %v1221_v54  ;;  %5985 = vmatmul.mubr.msk.f32.vlgmr.msra.gmra.mrb[30].mxu1 %vm648_vm3, %v1882_v34 }
 0xb17   :  { %5987 = vmatprep.mubr.msk.f32.mxu1 %vm648_vm3, %v1883_v63  ;;  %6386 = vmatpush3.bf16.msra.mxu1 %v6383_v24 }
 0xb18   :  { %6388 = vmatprep.subr.bf16.mxu1 %v6387_v13 }
 0xb19   :  { %v1628_v48 = vpop.permute.xlu1 %1627 }
 0xb1a   :  { %1644 = vst.msk [vmem:[#allocation3 + $0x10] sm:$0xff] %vm1641_vm5, %v1628_v48  ;;  %5988 = vmatmul.mubr.msk.f32.gmra.mrb[32].mxu1 %vm648_vm3, %v1884_v46 }
 0xb1b   :  { %5990 = vmatprep.mubr.msk.f32.mxu1 %vm648_vm3, %v1885_v45  ;;  %6390 = vmatpush3.bf16.msra.mxu1 %v6387_v13 }
 0xb1c   :  { %6392 = vmatprep.subr.bf16.mxu1 %v6391_v23 }
 0xb1e   :  { %5991 = vmatmul.mubr.msk.f32.gmra.mrb[34].mxu1 %vm648_vm3, %v1886_v27 }
 0xb1f   :  { %6394 = vmatpush3.bf16.msra.mxu1 %v6391_v23 }
 0xb20   :  { %6396 = vmatprep.subr.bf16.mxu1 %v6395_v32 }
 0xb23   :  { %6398 = vmatpush3.bf16.msra.mxu1 %v6395_v32 }
 0xbe9   :  { %v5986_v19 = vpop.f32.mrb[30].mxu1 }
 0xbea   :  { %2032 = vrot.lane.b32.xlu0 %v5986_v19, %s7192_s24  ;;  %v1995_v62 = vpop.f32.mrb[31].mxu1 }
 0xbeb   :  { %2030 = vrot.lane.b32.xlu1 %v1995_v62, %s7192_s24 }
 0xbed   :  { %v5989_v21 = vpop.f32.mrb[32].mxu1 }
 0xbee   :  { %1226 = vrot.lane.b32.xlu0 %v7954_v42, %s9449_s30  ;;  %v2005_v17 = vpop.f32.mrb[33].mxu1 }
 0xbef   :  { %1224 = vrot.lane.b32.xlu1 %v7956_v58, %s9449_s30 }
 0xbf1   :  { %v5992_v6 = vpop.f32.mrb[34].mxu1 }
 0xbf2   :  { %2036 = vrot.lane.b32.xlu0 %v5989_v21, %s7192_s24  ;;  %v2015_v53 = vpop.f32.mrb[35].mxu1 }
 0xbf3   :  { %2034 = vrot.lane.b32.xlu1 %v2005_v17, %s7192_s24 }
 0xbf6   :  { %1633 = vrot.lane.b32.xlu0 %v7977_v15, %s7193_s25 }
 0xbf7   :  { %1631 = vrot.lane.b32.xlu1 %v7979_v31, %s7193_s25 }
 0xbfa   :  { %2040 = vrot.lane.b32.xlu0 %v5992_v6, %s7192_s24 }
 0xbfb   :  { %2038 = vrot.lane.b32.xlu1 %v2015_v53, %s7192_s24 }
 0xc5c   :  { %v2033_v42 = vpop.permute.xlu0 %2032 }
 0xc5d   :  { %2050 = vst.msk [vmem:[#allocation3 + $0x8] sm:$0xff] %vm2048_vm6, %v2033_v42  ;;  %v2031_v58 = vpop.permute.xlu1 %2030 }
 0xc5e   :  { %2049 = vst.msk [vmem:[#allocation3] sm:$0xff] %vm2048_vm6, %v2031_v58 }
 0xc60   :  { %v1227_v40 = vpop.permute.xlu0 %1226 }
 0xc61   :  { %1240 = vst.msk [vmem:[#allocation3 + $0x28] sm:$0xff] %vm1234_vm4, %v1227_v40  ;;  %v1225_v59 = vpop.permute.xlu1 %1224 }
 0xc62   :  { %1239 = vst.msk [vmem:[#allocation3 + $0x20] sm:$0xff] %vm1234_vm4, %v1225_v59 }
 0xc64   :  { %v2037_v15 = vpop.permute.xlu0 %2036  ;;  %v2056_v25 = vld [vmem:[#allocation3 + $0x8] sm:$0xff] }
 0xc65   :  { %2052 = vst.msk [vmem:[#allocation3 + $0x18] sm:$0xff] %vm2048_vm6, %v2037_v15  ;;  %v2035_v31 = vpop.permute.xlu1 %2034  ;;  %v2055_v52 = vld [vmem:[#allocation3] sm:$0xff] }
 0xc66   :  { %2051 = vst.msk [vmem:[#allocation3 + $0x10] sm:$0xff] %vm2048_vm6, %v2035_v31  ;;  %6009 = vmatprep.mubr.msk.f32.mxu1 %vm102_vm0, %v2055_v52 }
 0xc67   :  { %6010 = vmatmul.mubr.msk.f32.vlgmr.msra.gmra.mrb[36].mxu1 %vm102_vm0, %v2056_v25 }
 0xc68   :  { %v1634_v11 = vpop.permute.xlu0 %1633 }
 0xc69   :  { %1647 = vst.msk [vmem:[#allocation3 + $0x28] sm:$0xff] %vm1641_vm5, %v1634_v11  ;;  %v1632_v50 = vpop.permute.xlu1 %1631 }
 0xc6a   :  { %1646 = vst.msk [vmem:[#allocation3 + $0x20] sm:$0xff] %vm1641_vm5, %v1632_v50 }
 0xc6c   :  { %v2041_v26 = vpop.permute.xlu0 %2040  ;;  %v2058_v60 = vld [vmem:[#allocation3 + $0x18] sm:$0xff] }
 0xc6d   :  { %2054 = vst.msk [vmem:[#allocation3 + $0x28] sm:$0xff] %vm2048_vm6, %v2041_v26  ;;  %v2039_v9 = vpop.permute.xlu1 %2038  ;;  %v2057_v4 = vld [vmem:[#allocation3 + $0x10] sm:$0xff] }
 0xc6e   :  { %2053 = vst.msk [vmem:[#allocation3 + $0x20] sm:$0xff] %vm2048_vm6, %v2039_v9  ;;  %6012 = vmatprep.mubr.msk.f32.mxu1 %vm102_vm0, %v2057_v4  ;;  %v2300_v9 = vld [vmem:[%s9437_s12 + $0x8] sm:$0xff]  ;;  %v2302_v4 = vld [vmem:[%s9437_s12 + $0x18] sm:$0xff] }
 0xc6f   :  { %6013 = vmatmul.mubr.msk.f32.gmra.mrb[38].mxu1 %vm102_vm0, %v2058_v60  ;;  %v6399_v60 = vpack.c.bf16 %v2302_v4, %v2300_v9 }
 0xc71   :  { %6400 = vmatprep.subr.bf16.mxu0 %v6399_v60 }
 0xc74   :  { %v2060_v16 = vld [vmem:[#allocation3 + $0x28] sm:$0xff] }
 0xc75   :  { %v2059_v57 = vld [vmem:[#allocation3 + $0x20] sm:$0xff] }
 0xc76   :  { %6015 = vmatprep.mubr.msk.f32.mxu1 %vm102_vm0, %v2059_v57  ;;  %v2299_v57 = vld [vmem:[%s9437_s12] sm:$0xff] }
 0xc77   :  { %6016 = vmatmul.mubr.msk.f32.gmra.mrb[40].mxu1 %vm102_vm0, %v2060_v16  ;;  %v2301_v16 = vld [vmem:[%s9437_s12 + $0x10] sm:$0xff] }
 0xd3a   :  { %v6011_v5 = vpop.f32.mrb[36].mxu1 }
 0xd3b   :  { %v2166_v49 = vadd.f32 %v6011_v5, %v5311_v29  ;;  %v2160_v33 = vpop.f32.mrb[37].mxu1  ;;  %v2304_v5 = vld [vmem:[%s9437_s12 + $0x28] sm:$0xff] }
 0xd3c   :  { %v2161_v35 = vadd.f32 %v5311_v29, %v2160_v33 }
 0xd3d   :  { %v8110_v14 = vadd.f32 %v2166_v49, %v7418_v56  ;;  %v2306_v49 = vld [vmem:[%s9437_s12 + $0x38] sm:$0xff] }
 0xd3e   :  { %v8113_v43 = vadd.f32 %v2161_v35, %v7411_v51  ;;  %v6403_v33 = vpack.c.bf16 %v2306_v49, %v2304_v5  ;;  %v2303_v35 = vld [vmem:[%s9437_s12 + $0x20] sm:$0xff] }
 0xd3f   :  { %v2200_v37 = vsel %vm102_vm0, %v8110_v14, 0.0 }
 0xd40   :  { %2201 = vadd.xlane.f32.xlu0 %v2200_v37  ;;  %v2197_v47 = vsel %vm102_vm0, %v8113_v43, 0.0  ;;  %v2305_v37 = vld [vmem:[%s9437_s12 + $0x30] sm:$0xff] }
 0xd41   :  { %2198 = vadd.xlane.f32.xlu1 %v2197_v47  ;;  %v6405_v47 = vpack.c.bf16 %v2305_v37, %v2303_v35 }
 0xd42   :  { %v6014_v3 = vpop.f32.mrb[38].mxu1 }
 0xd43   :  { %v2170_v34 = vpop.f32.mrb[39].mxu1  ;;  %v2176_v55 = vadd.f32 %v6014_v3, %v5311_v29  ;;  %v2308_v3 = vld [vmem:[%s9437_s12 + $0x48] sm:$0xff] }
 0xd44   :  { %v2171_v54 = vadd.f32 %v5311_v29, %v2170_v34  ;;  %v2310_v34 = vld [vmem:[%s9437_s12 + $0x58] sm:$0xff] }
 0xd45   :  { %v8123_v56 = vadd.f32 %v2176_v55, %v7432_v2  ;;  %v6407_v55 = vpack.c.bf16 %v2310_v34, %v2308_v3 }
 0xd46   :  { %v8120_v63 = vadd.f32 %v2171_v54, %v7425_v61  ;;  %v2307_v54 = vld [vmem:[%s9437_s12 + $0x40] sm:$0xff] }
 0xd47   :  { %v2206_v45 = vsel %vm102_vm0, %v8123_v56, 0.0 }
 0xd48   :  { %v2203_v51 = vsel %vm102_vm0, %v8120_v63, 0.0 }
 0xd49   :  { %2204 = vadd.xlane.f32.xlu0 %v2203_v51  ;;  %v2309_v51 = vld [vmem:[%s9437_s12 + $0x50] sm:$0xff] }
 0xd4a   :  { %v6017_v38 = vpop.f32.mrb[40].mxu1 }
 0xd4b   :  { %v2186_v46 = vadd.f32 %v6017_v38, %v5311_v29  ;;  %v2180_v28 = vpop.f32.mrb[41].mxu1  ;;  %v6409_v38 = vpack.c.bf16 %v2309_v51, %v2307_v54 }
 0xd4c   :  { %v2181_v48 = vadd.f32 %v5311_v29, %v2180_v28  ;;  %v6401_v29 = vpack.c.bf16 %v2301_v16, %v2299_v57  ;;  %v2314_v28 = vld [vmem:[%s9437_s12 + $0x78] sm:$0xff]  ;;  %v5319_v57 = vld [vmem:[%s9436_s11] ss:$0 sm:$0xff] }
 0xd4d   :  { %v8130_v27 = vadd.f32 %v2186_v46, %v7446_v12  ;;  %2207 = vadd.xlane.f32.xlu0 %v2206_v45  ;;  %v2312_v46 = vld [vmem:[%s9437_s12 + $0x68] sm:$0xff]  ;;  %v2311_v45 = vld [vmem:[%s9437_s12 + $0x60] sm:$0xff] }
 0xd4e   :  { %v8133_v61 = vadd.f32 %v2181_v48, %v7439_v7  ;;  %6402 = vmatpush1.bf16.msra.mxu0 %v6401_v29  ;;  %v6411_v48 = vpack.c.bf16 %v2314_v28, %v2312_v46 }
 0xd4f   :  { %v2212_v2 = vsel %vm102_vm0, %v8130_v27, 0.0  ;;  %6404 = vmatprep.subr.bf16.mxu0 %v6403_v33 }
 0xd50   :  { %v2209_v41 = vsel %vm102_vm0, %v8133_v61, 0.0 }
 0xd51   :  { %2213 = vadd.xlane.f32.xlu0 %v2212_v2  ;;  %2210 = vadd.xlane.f32.xlu1 %v2209_v41  ;;  %v2313_v2 = vld [vmem:[%s9437_s12 + $0x70] sm:$0xff] }
 0xd52   :  { %6406 = vmatpush1.bf16.msra.mxu0 %v6405_v47  ;;  %v6413_v41 = vpack.c.bf16 %v2313_v2, %v2311_v45 }
 0xd53   :  { %6408 = vmatprep.subr.bf16.mxu0 %v6407_v55 }
 0xd56   :  { %6410 = vmatpush1.bf16.msra.mxu0 %v6409_v38 }
 0xd57   :  { %6412 = vmatprep.subr.bf16.mxu0 %v6411_v48 }
 0xd5a   :  { %6414 = vmatpush1.bf16.msra.mxu0 %v6413_v41  ;;  %v2556_v41 = vld [vmem:[%s9439_s14 + $0x10] sm:$0xff] }
 0xdcd   :  { %v2202_v18 = vpop.xlane.xlu0 %2201 }
 0xdce   :  { %v2216_v8 = vmul.f32 0.015625, %v2202_v18  ;;  %v2199_v24 = vpop.xlane.xlu1 %2198  ;;  %v2570_v18 = vld [vmem:[%s9439_s14 + $0x80] sm:$0xff] }
 0xdcf   :  { %v2215_v39 = vmul.f32 0.015625, %v2199_v24  ;;  %v2554_v24 = vld [vmem:[%s9439_s14] sm:$0xff] }
 0xdd0   :  { %v8140_v13 = vsub.f32 %v8110_v14, %v2216_v8  ;;  %v2571_v8 = vld [vmem:[%s9439_s14 + $0x88] sm:$0xff] }
 0xdd1   :  { %v8143_v12 = vsub.f32 %v8113_v43, %v2215_v39  ;;  %v6415_v39 = vpack.c.bf16 %v2571_v8, %v2570_v18  ;;  %v2557_v18 = vld [vmem:[%s9439_s14 + $0x18] sm:$0xff] }
 0xdd2   :  { %v2228_v7 = vmul.f32 %v8140_v13, %v8140_v13  ;;  %v6421_v8 = vpack.c.bf16 %v2557_v18, %v2556_v41 }
 0xdd3   :  { %v2227_v22 = vmul.f32 %v8143_v12, %v8143_v12  ;;  %6416 = vmatprep.subr.bf16.mxu1 %v6415_v39  ;;  %v2575_v39 = vld [vmem:[%s9439_s14 + $0xa8] sm:$0xff] }
 0xdd4   :  { %v2236_v20 = vsel %vm102_vm0, %v2228_v7, 0.0  ;;  %v2555_v7 = vld [vmem:[%s9439_s14 + $0x8] sm:$0xff] }
 0xdd5   :  { %2237 = vadd.xlane.f32.xlu0 %v2236_v20  ;;  %v2233_v23 = vsel %vm102_vm0, %v2227_v22, 0.0  ;;  %v6417_v22 = vpack.c.bf16 %v2555_v7, %v2554_v24  ;;  %v2574_v24 = vld [vmem:[%s9439_s14 + $0xa0] sm:$0xff] }
 0xdd6   :  { %v2205_v30 = vpop.xlane.xlu0 %2204  ;;  %2234 = vadd.xlane.f32.xlu1 %v2233_v23  ;;  %v6423_v7 = vpack.c.bf16 %v2575_v39, %v2574_v24 }
 0xdd7   :  { %v2217_v1 = vmul.f32 0.015625, %v2205_v30  ;;  %6418 = vmatpush3.bf16.msra.mxu1 %v6417_v22  ;;  %v2558_v22 = vld [vmem:[%s9439_s14 + $0x20] sm:$0xff] }
 0xdd9   :  { %v8152_v32 = vsub.f32 %v8120_v63, %v2217_v1 }
 0xdda   :  { %v2208_v19 = vpop.xlane.xlu0 %2207 }
 0xddb   :  { %v2218_v62 = vmul.f32 0.015625, %v2208_v19  ;;  %v2229_v21 = vmul.f32 %v8152_v32, %v8152_v32 }
 0xddd   :  { %v8157_v17 = vsub.f32 %v8123_v56, %v2218_v62  ;;  %v2239_v6 = vsel %vm102_vm0, %v2229_v21, 0.0 }
 0xdde   :  { %v2214_v53 = vpop.xlane.xlu0 %2213  ;;  %2240 = vadd.xlane.f32.xlu1 %v2239_v6  ;;  %v2211_v42 = vpop.xlane.xlu1 %2210 }
 0xddf   :  { %v2220_v58 = vmul.f32 0.015625, %v2214_v53  ;;  %v2219_v40 = vmul.f32 0.015625, %v2211_v42  ;;  %v2230_v59 = vmul.f32 %v8157_v17, %v8157_v17 }
 0xde1   :  { %v8163_v15 = vsub.f32 %v8130_v27, %v2220_v58  ;;  %v8166_v31 = vsub.f32 %v8133_v61, %v2219_v40  ;;  %v2242_v52 = vsel %vm102_vm0, %v2230_v59, 0.0 }
 0xde2   :  { %2243 = vadd.xlane.f32.xlu0 %v2242_v52  ;;  %v5318_v52 = vld [vmem:[%s9435_s10] ss:$0 sm:$0xff] }
 0xde3   :  { %v2232_v25 = vmul.f32 %v8163_v15, %v8163_v15  ;;  %v2231_v11 = vmul.f32 %v8166_v31, %v8166_v31 }
 0xde5   :  { %v2248_v50 = vsel %vm102_vm0, %v2232_v25, 0.0  ;;  %v2245_v26 = vsel %vm102_vm0, %v2231_v11, 0.0 }
 0xde6   :  { %2249 = vadd.xlane.f32.xlu0 %v2248_v50  ;;  %2246 = vadd.xlane.f32.xlu1 %v2245_v26 }
 0xe62   :  { %v2238_v20 = vpop.xlane.xlu0 %2237 }
 0xe63   :  { %v2252_v23 = vmul.f32 0.015625, %v2238_v20  ;;  %v2235_v30 = vpop.xlane.xlu1 %2234  ;;  %v2559_v20 = vld [vmem:[%s9439_s14 + $0x28] sm:$0xff] }
 0xe64   :  { %v2251_v1 = vmul.f32 0.015625, %v2235_v30  ;;  %v2576_v30 = vld [vmem:[%s9439_s14 + $0xb0] sm:$0xff] }
 0xe65   :  { %v2258_v19 = vadd.f32 1e-06, %v2252_v23  ;;  %v6425_v23 = vpack.c.bf16 %v2559_v20, %v2558_v22 }
 0xe66   :  { %v2257_v62 = vadd.f32 1e-06, %v2251_v1  ;;  %v2577_v1 = vld [vmem:[%s9439_s14 + $0xb8] sm:$0xff] }
 0xe67   :  { %6975 = vrsqrt.f32 %v2258_v19  ;;  %v6427_v19 = vpack.c.bf16 %v2577_v1, %v2576_v30 }
 0xe68   :  { %6977 = vrsqrt.f32 %v2257_v62  ;;  %v2560_v62 = vld [vmem:[%s9439_s14 + $0x30] sm:$0xff] }
 0xe6b   :  { %v2241_v21 = vpop.xlane.xlu1 %2240 }
 0xe6c   :  { %v2253_v6 = vmul.f32 0.015625, %v2241_v21  ;;  %v2561_v21 = vld [vmem:[%s9439_s14 + $0x38] sm:$0xff] }
 0xe6e   :  { %v2259_v53 = vadd.f32 1e-06, %v2253_v6  ;;  %v6429_v6 = vpack.c.bf16 %v2561_v21, %v2560_v62 }
 0xe6f   :  { %v2244_v42 = vpop.xlane.xlu0 %2243 }
 0xe70   :  { %6979 = vrsqrt.f32 %v2259_v53  ;;  %v2254_v58 = vmul.f32 0.015625, %v2244_v42  ;;  %v2578_v53 = vld [vmem:[%s9439_s14 + $0xc0] sm:$0xff]  ;;  %v2579_v42 = vld [vmem:[%s9439_s14 + $0xc8] sm:$0xff] }
 0xe71   :  { %v6976_v40 = vpop.eup %6975 }
 0xe72   :  { %v6978_v59 = vpop.eup %6977  ;;  %v2260_v25 = vadd.f32 1e-06, %v2254_v58  ;;  %v2270_v9 = vmul.f32 %v6976_v40, %v8140_v13  ;;  %v6431_v58 = vpack.c.bf16 %v2579_v42, %v2578_v53  ;;  %v2562_v40 = vld [vmem:[%s9439_s14 + $0x40] sm:$0xff] }
 0xe73   :  { %v2269_v11 = vmul.f32 %v6978_v59, %v8143_v12  ;;  %v2250_v50 = vpop.xlane.xlu0 %2249  ;;  %v2247_v26 = vpop.xlane.xlu1 %2246  ;;  %v2563_v59 = vld [vmem:[%s9439_s14 + $0x48] sm:$0xff] }
 0xe74   :  { %6981 = vrsqrt.f32 %v2260_v25  ;;  %v2256_v4 = vmul.f32 0.015625, %v2250_v50  ;;  %v2255_v60 = vmul.f32 0.015625, %v2247_v26  ;;  %v2282_v33 = vmul.f32 %v5318_v52, %v2270_v9  ;;  %v2580_v25 = vld [vmem:[%s9439_s14 + $0xd0] sm:$0xff]  ;;  %v2565_v9 = vld [vmem:[%s9439_s14 + $0x58] sm:$0xff] }
 0xe75   :  { %v2281_v16 = vmul.f32 %v5318_v52, %v2269_v11  ;;  %v2581_v11 = vld [vmem:[%s9439_s14 + $0xd8] sm:$0xff]  ;;  %v2564_v26 = vld [vmem:[%s9439_s14 + $0x50] sm:$0xff] }
 0xe76   :  { %v2262_v29 = vadd.f32 1e-06, %v2256_v4  ;;  %v2261_v5 = vadd.f32 1e-06, %v2255_v60  ;;  %v2294_v13 = vadd.f32 %v5319_v57, %v2282_v33  ;;  %v6435_v50 = vpack.c.bf16 %v2581_v11, %v2580_v25  ;;  %v2582_v60 = vld [vmem:[%s9439_s14 + $0xe0] sm:$0xff]  ;;  %v2584_v33 = vld [vmem:[%s9439_s14 + $0xf0] sm:$0xff] }
 0xe77   :  { %v2293_v49 = vadd.f32 %v5319_v57, %v2281_v16  ;;  %v6437_v4 = vpack.c.bf16 %v2565_v9, %v2564_v26 }
 0xe78   :  { %6983 = vrsqrt.f32 %v2262_v29  ;;  %v2566_v29 = vld [vmem:[%s9439_s14 + $0x60] sm:$0xff] }
 0xe79   :  { %6985 = vrsqrt.f32 %v2261_v5  ;;  %5320 = vmatmul.mubr.msk.f32.vlgmr.msra.gmra.mrb[36].mxu0 %vm102_vm0, %v2293_v49  ;;  %v2567_v5 = vld [vmem:[%s9439_s14 + $0x68] sm:$0xff] }
 0xe7a   :  { %v6980_v12 = vpop.eup %6979  ;;  %2415 = vmatprep.mubr.f32.mxu0 %v7190_v10  ;;  %v6441_v49 = vpack.c.bf16 %v2567_v5, %v2566_v29 }
 0xe7b   :  { %v2271_v35 = vmul.f32 %v6980_v12, %v8152_v32  ;;  %v2585_v12 = vld [vmem:[%s9439_s14 + $0xf8] sm:$0xff] }
 0xe7d   :  { %5321 = vmatmul.mubr.msk.f32.gmra.mrb[38].mxu0 %vm102_vm0, %v2294_v13  ;;  %v2283_v37 = vmul.f32 %v5318_v52, %v2271_v35  ;;  %v6443_v13 = vpack.c.bf16 %v2585_v12, %v2584_v33  ;;  %v2568_v35 = vld [vmem:[%s9439_s14 + $0x70] sm:$0xff] }
 0xe7e   :  { %v6982_v47 = vpop.eup %6981  ;;  %2421 = vmatprep.mubr.f32.mxu0 %v7190_v10 }
 0xe7f   :  { %v2295_v3 = vadd.f32 %v5319_v57, %v2283_v37  ;;  %v2272_v34 = vmul.f32 %v6982_v47, %v8157_v17  ;;  %v2569_v37 = vld [vmem:[%s9439_s14 + $0x78] sm:$0xff] }
 0xe80   :  { %v6445_v47 = vpack.c.bf16 %v2569_v37, %v2568_v35 }
 0xe81   :  { %5322 = vmatmul.mubr.msk.f32.gmra.mrb[40].mxu0 %vm102_vm0, %v2295_v3  ;;  %v2284_v55 = vmul.f32 %v5318_v52, %v2272_v34  ;;  %v2315_v3 = vld [vmem:[%s9438_s13] sm:$0x3] }
 0xe82   :  { %v6984_v54 = vpop.eup %6983  ;;  %2427 = vmatprep.mubr.f32.mxu0 %v7190_v10  ;;  %v8347_v34 = vrot.slane %v2315_v3, %v7558_v36 }
 0xe83   :  { %v6986_v51 = vpop.eup %6985  ;;  %v2296_v38 = vadd.f32 %v5319_v57, %v2284_v55  ;;  %v2274_v32 = vmul.f32 %v6984_v54, %v8163_v15  ;;  %v2572_v15 = vld [vmem:[%s9439_s14 + $0x90] sm:$0xff]  ;;  %v8350_v55 = vrot.slane %v2315_v3, %v7563_v0 }
 0xe84   :  { %v2273_v46 = vmul.f32 %v6986_v51, %v8166_v31  ;;  %v2573_v31 = vld [vmem:[%s9439_s14 + $0x98] sm:$0xff] }
 0xe85   :  { %5323 = vmatmul.mubr.msk.f32.gmra.mrb[42].mxu0 %vm102_vm0, %v2296_v38  ;;  %v2286_v45 = vmul.f32 %v5318_v52, %v2274_v32  ;;  %v6419_v2 = vpack.c.bf16 %v2573_v31, %v2572_v15 }
 0xe86   :  { %2433 = vmatprep.mubr.f32.mxu0 %v7190_v10  ;;  %v2285_v28 = vmul.f32 %v5318_v52, %v2273_v46  ;;  %v6433_v52 = vpack.c.bf16 %v2563_v59, %v2562_v40 }
 0xe87   :  { %v2298_v17 = vadd.f32 %v5319_v57, %v2286_v45  ;;  %6420 = vmatprep.subr.bf16.mxu1 %v6419_v2 }
 0xe88   :  { %v2297_v48 = vadd.f32 %v5319_v57, %v2285_v28  ;;  %6422 = vmatpush3.bf16.msra.mxu1 %v6421_v8  ;;  %v2583_v57 = vld [vmem:[%s9439_s14 + $0xe8] sm:$0xff] }
 0xe89   :  { %6424 = vmatprep.subr.bf16.mxu1 %v6423_v7  ;;  %v6439_v16 = vpack.c.bf16 %v2583_v57, %v2582_v60 }
 0xe8a   :  { %5324 = vmatmul.mubr.msk.f32.gmra.mrb[44].mxu0 %vm102_vm0, %v2297_v48 }
 0xe8b   :  { %2439 = vmatprep.mubr.f32.mxu0 %v7190_v10 }
 0xe8c   :  { %6426 = vmatpush3.bf16.msra.mxu1 %v6425_v23 }
 0xe8d   :  { %6428 = vmatprep.subr.bf16.mxu1 %v6427_v19 }
 0xe8e   :  { %5325 = vmatmul.mubr.msk.f32.gmra.mrb[46].mxu0 %vm102_vm0, %v2298_v17 }
 0xe8f   :  { %2912 = vmatprep.mubr.f32.mxu0 %v7190_v10 }
 0xe90   :  { %6430 = vmatpush3.bf16.msra.mxu1 %v6429_v6 }
 0xe91   :  { %6432 = vmatprep.subr.bf16.mxu1 %v6431_v58 }
 0xe94   :  { %6434 = vmatpush3.bf16.msra.mxu1 %v6433_v52 }
 0xe95   :  { %6436 = vmatprep.subr.bf16.mxu1 %v6435_v50 }
 0xe98   :  { %6438 = vmatpush3.bf16.msra.mxu1 %v6437_v4 }
 0xe99   :  { %6440 = vmatprep.subr.bf16.mxu1 %v6439_v16 }
 0xe9c   :  { %6442 = vmatpush3.bf16.msra.mxu1 %v6441_v49 }
 0xe9d   :  { %6444 = vmatprep.subr.bf16.mxu1 %v6443_v13 }
 0xea0   :  { %6446 = vmatpush3.bf16.msra.mxu1 %v6445_v47 }
 0xf4c   :  { %v2411_v54 = vpop.f32.mrb[36].mxu0 }
 0xf4d   :  { %v8353_v51 = vadd.f32 %v2411_v54, %v8347_v34  ;;  %v2413_v38 = vpop.f32.mrb[37].mxu0 }
 0xf4e   :  { %v8356_v46 = vadd.f32 %v2413_v38, %v8350_v55 }
 0xf4f   :  { %v2458_v32 = vmul.f32 0.044715, %v8353_v51 }
 0xf50   :  { %v2459_v28 = vmul.f32 0.044715, %v8356_v46  ;;  %v2417_v48 = vpop.f32.mrb[38].mxu0 }
 0xf51   :  { %v2470_v45 = vmul.f32 %v2458_v32, %v8353_v51  ;;  %v8362_v17 = vadd.f32 %v2417_v48, %v8347_v34  ;;  %v2419_v15 = vpop.f32.mrb[39].mxu0 }
 0xf52   :  { %v2471_v31 = vmul.f32 %v2459_v28, %v8356_v46  ;;  %v8366_v2 = vadd.f32 %v2419_v15, %v8350_v55 }
 0xf53   :  { %v2482_v41 = vmul.f32 %v2470_v45, %v8353_v51  ;;  %v2460_v18 = vmul.f32 0.044715, %v8362_v17 }
 0xf54   :  { %v2461_v8 = vmul.f32 0.044715, %v8366_v2  ;;  %v2423_v24 = vpop.f32.mrb[40].mxu0  ;;  %v2483_v39 = vmul.f32 %v2471_v31, %v8356_v46 }
 0xf55   :  { %v2494_v7 = vadd.f32 %v2482_v41, %v8353_v51  ;;  %v2472_v22 = vmul.f32 %v2460_v18, %v8362_v17  ;;  %v8375_v20 = vadd.f32 %v2423_v24, %v8347_v34  ;;  %v2425_v23 = vpop.f32.mrb[41].mxu0 }
 0xf56   :  { %v2473_v30 = vmul.f32 %v2461_v8, %v8366_v2  ;;  %v8379_v1 = vadd.f32 %v2425_v23, %v8350_v55  ;;  %v2495_v19 = vadd.f32 %v2483_v39, %v8356_v46  ;;  %v2447_v23 = vmul.f32 0.5, %v8356_v46 }
 0xf57   :  { %v2506_v62 = vmul.f32 0.7978846, %v2494_v7  ;;  %v2462_v21 = vmul.f32 0.044715, %v8375_v20  ;;  %v2484_v6 = vmul.f32 %v2472_v22, %v8362_v17 }
 0xf58   :  { %v2463_v53 = vmul.f32 0.044715, %v8379_v1  ;;  %v2429_v42 = vpop.f32.mrb[42].mxu0  ;;  %v2507_v58 = vmul.f32 0.7978846, %v2495_v19  ;;  %v2485_v40 = vmul.f32 %v2473_v30, %v8366_v2 }
 0xf59   :  { %6987 = vtanh.f32 %v2506_v62  ;;  %v2474_v59 = vmul.f32 %v2462_v21, %v8375_v20  ;;  %v8388_v52 = vadd.f32 %v2429_v42, %v8347_v34  ;;  %v2431_v25 = vpop.f32.mrb[43].mxu0  ;;  %v2496_v11 = vadd.f32 %v2484_v6, %v8362_v17 }
 0xf5a   :  { %v2475_v50 = vmul.f32 %v2463_v53, %v8379_v1  ;;  %v8393_v26 = vadd.f32 %v2431_v25, %v8350_v55  ;;  %6989 = vtanh.f32 %v2507_v58  ;;  %v2497_v9 = vadd.f32 %v2485_v40, %v8366_v2 }
 0xf5b   :  { %v2464_v4 = vmul.f32 0.044715, %v8388_v52  ;;  %v2508_v60 = vmul.f32 0.7978846, %v2496_v11  ;;  %v2486_v57 = vmul.f32 %v2474_v59, %v8375_v20  ;;  %v2446_v40 = vmul.f32 0.5, %v8353_v51 }
 0xf5c   :  { %v2465_v16 = vmul.f32 0.044715, %v8393_v26  ;;  %v2509_v29 = vmul.f32 0.7978846, %v2497_v9  ;;  %v2487_v5 = vmul.f32 %v2475_v50, %v8379_v1  ;;  %v2449_v51 = vmul.f32 0.5, %v8366_v2 }
 0xf5d   :  { %v2476_v49 = vmul.f32 %v2464_v4, %v8388_v52  ;;  %v2435_v33 = vpop.f32.mrb[44].mxu0  ;;  %6991 = vtanh.f32 %v2508_v60  ;;  %v2498_v12 = vadd.f32 %v2486_v57, %v8375_v20  ;;  %v2451_v2 = vmul.f32 0.5, %v8379_v1 }
 0xf5e   :  { %v2477_v13 = vmul.f32 %v2465_v16, %v8393_v26  ;;  %v8404_v35 = vadd.f32 %v2435_v33, %v8347_v34  ;;  %v2437_v37 = vpop.f32.mrb[45].mxu0  ;;  %6993 = vtanh.f32 %v2509_v29  ;;  %v2499_v47 = vadd.f32 %v2487_v5, %v8379_v1 }
 0xf5f   :  { %v8408_v3 = vadd.f32 %v2437_v37, %v8350_v55  ;;  %v2510_v54 = vmul.f32 0.7978846, %v2498_v12  ;;  %v2488_v38 = vmul.f32 %v2476_v49, %v8388_v52  ;;  %v2448_v33 = vmul.f32 0.5, %v8362_v17 }
 0xf60   :  { %v2466_v32 = vmul.f32 0.044715, %v8404_v35  ;;  %v2511_v28 = vmul.f32 0.7978846, %v2499_v47  ;;  %v2489_v48 = vmul.f32 %v2477_v13, %v8393_v26  ;;  %v2450_v17 = vmul.f32 0.5, %v8375_v20 }
 0xf61   :  { %v2467_v45 = vmul.f32 0.044715, %v8408_v3  ;;  %v2441_v15 = vpop.f32.mrb[46].mxu0  ;;  %6995 = vtanh.f32 %v2510_v54  ;;  %v2500_v31 = vadd.f32 %v2488_v38, %v8388_v52 }
 0xf62   :  { %v2478_v41 = vmul.f32 %v2466_v32, %v8404_v35  ;;  %v8417_v18 = vadd.f32 %v2441_v15, %v8347_v34  ;;  %v2443_v8 = vpop.f32.mrb[47].mxu0  ;;  %6997 = vtanh.f32 %v2511_v28  ;;  %v2501_v24 = vadd.f32 %v2489_v48, %v8393_v26 }
 0xf63   :  { %v6988_v39 = vpop.eup %6987  ;;  %v2479_v7 = vmul.f32 %v2467_v45, %v8408_v3  ;;  %v8422_v22 = vadd.f32 %v2443_v8, %v8350_v55  ;;  %v2512_v30 = vmul.f32 0.7978846, %v2500_v31 }
 0xf64   :  { %v6990_v19 = vpop.eup %6989  ;;  %v2468_v62 = vmul.f32 0.044715, %v8417_v18  ;;  %v2530_v21 = vadd.f32 1.0, %v6988_v39  ;;  %v2513_v6 = vmul.f32 0.7978846, %v2501_v24  ;;  %v2490_v34 = vmul.f32 %v2478_v41, %v8404_v35 }
 0xf65   :  { %v2469_v53 = vmul.f32 0.044715, %v8422_v22  ;;  %v2531_v42 = vadd.f32 1.0, %v6990_v19  ;;  %6999 = vtanh.f32 %v2512_v30  ;;  %v2491_v58 = vmul.f32 %v2479_v7, %v8408_v3 }
 0xf66   :  { %v2480_v55 = vmul.f32 %v2468_v62, %v8417_v18  ;;  %7001 = vtanh.f32 %v2513_v6  ;;  %v2502_v46 = vadd.f32 %v2490_v34, %v8404_v35  ;;  %v2542_v4 = vmul.f32 %v2530_v21, %v2446_v40 }
 0xf67   :  { %v6992_v59 = vpop.eup %6991  ;;  %v2481_v25 = vmul.f32 %v2469_v53, %v8422_v22  ;;  %v2543_v11 = vmul.f32 %v2531_v42, %v2447_v23  ;;  %v2503_v50 = vadd.f32 %v2491_v58, %v8408_v3  ;;  %v2453_v39 = vmul.f32 0.5, %v8393_v26 }
 0xf68   :  { %v6994_v9 = vpop.eup %6993  ;;  %v2532_v60 = vadd.f32 1.0, %v6992_v59  ;;  %v2514_v57 = vmul.f32 0.7978846, %v2502_v46  ;;  %v2492_v16 = vmul.f32 %v2480_v55, %v8417_v18  ;;  %v2452_v23 = vmul.f32 0.5, %v8388_v52 }
 0xf69   :  { %2657 = vmatprep.mubr.f32.mxu1 %v2543_v11  ;;  %v2533_v29 = vadd.f32 1.0, %v6994_v9  ;;  %v2515_v5 = vmul.f32 0.7978846, %v2503_v50  ;;  %v2493_v49 = vmul.f32 %v2481_v25, %v8422_v22  ;;  %v2455_v21 = vmul.f32 0.5, %v8408_v3 }
 0xf6a   :  { %2658 = vmatmul.mubr.f32.vlgmr.msra.gmra.mrb[42].mxu1 %v2542_v4  ;;  %7003 = vtanh.f32 %v2514_v57  ;;  %v2504_v12 = vadd.f32 %v2492_v16, %v8417_v18  ;;  %v2544_v38 = vmul.f32 %v2532_v60, %v2448_v33  ;;  %v2454_v34 = vmul.f32 0.5, %v8404_v35  ;;  %v5326_v35 = vld [vmem:[%s9440_s15] ss:$0 sm:$0xff] }
 0xf6b   :  { %v6996_v13 = vpop.eup %6995  ;;  %v2545_v37 = vmul.f32 %v2533_v29, %v2449_v51  ;;  %7005 = vtanh.f32 %v2515_v5  ;;  %v2505_v47 = vadd.f32 %v2493_v49, %v8422_v22  ;;  %v2457_v52 = vmul.f32 0.5, %v8422_v22 }
 0xf6c   :  { %v6998_v54 = vpop.eup %6997  ;;  %v2534_v32 = vadd.f32 1.0, %v6996_v13  ;;  %v2516_v28 = vmul.f32 0.7978846, %v2504_v12  ;;  %v2456_v46 = vmul.f32 0.5, %v8417_v18 }
 0xf6d   :  { %2662 = vmatprep.mubr.f32.mxu1 %v2545_v37  ;;  %v2535_v48 = vadd.f32 1.0, %v6998_v54  ;;  %v2517_v45 = vmul.f32 0.7978846, %v2505_v47 }
 0xf6e   :  { %2663 = vmatmul.mubr.f32.gmra.mrb[44].mxu1 %v2544_v38  ;;  %7007 = vtanh.f32 %v2516_v28  ;;  %v2546_v8 = vmul.f32 %v2534_v32, %v2450_v17 }
 0xf6f   :  { %v7000_v15 = vpop.eup %6999  ;;  %v2547_v31 = vmul.f32 %v2535_v48, %v2451_v2  ;;  %7009 = vtanh.f32 %v2517_v45 }
 0xf70   :  { %v7002_v41 = vpop.eup %7001  ;;  %v2536_v24 = vadd.f32 1.0, %v7000_v15 }
 0xf71   :  { %2667 = vmatprep.mubr.f32.mxu1 %v2547_v31  ;;  %v2537_v7 = vadd.f32 1.0, %v7002_v41 }
 0xf72   :  { %2668 = vmatmul.mubr.f32.gmra.mrb[46].mxu1 %v2546_v8  ;;  %v2548_v19 = vmul.f32 %v2536_v24, %v2452_v23 }
 0xf73   :  { %v2549_v1 = vmul.f32 %v2537_v7, %v2453_v39  ;;  %v5332_v39 = vld [vmem:[%s9431_s6 + $0x88] sm:$0xff]  ;;  %v5331_v7 = vld [vmem:[%s9431_s6 + $0x80] sm:$0xff] }
 0xf74   :  { %v7004_v30 = vpop.eup %7003 }
 0xf75   :  { %v7006_v62 = vpop.eup %7005  ;;  %2672 = vmatprep.mubr.f32.mxu1 %v2549_v1  ;;  %v2538_v20 = vadd.f32 1.0, %v7004_v30 }
 0xf76   :  { %2673 = vmatmul.mubr.f32.gmra.mrb[48].mxu1 %v2548_v19  ;;  %v2539_v6 = vadd.f32 1.0, %v7006_v62 }
 0xf77   :  { %v2550_v26 = vmul.f32 %v2538_v20, %v2454_v34 }
 0xf78   :  { %v7008_v53 = vpop.eup %7007  ;;  %v2551_v42 = vmul.f32 %v2539_v6, %v2455_v21 }
 0xf79   :  { %v7010_v58 = vpop.eup %7009  ;;  %v2540_v40 = vadd.f32 1.0, %v7008_v53 }
 0xf7a   :  { %2677 = vmatprep.mubr.f32.mxu1 %v2551_v42  ;;  %v2541_v55 = vadd.f32 1.0, %v7010_v58 }
 0xf7b   :  { %2678 = vmatmul.mubr.f32.gmra.mrb[50].mxu1 %v2550_v26  ;;  %v2552_v25 = vmul.f32 %v2540_v40, %v2456_v46 }
 0xf7c   :  { %v2553_v59 = vmul.f32 %v2541_v55, %v2457_v52 }
 0xf7e   :  { %2682 = vmatprep.mubr.f32.mxu1 %v2553_v59 }
 0xf7f   :  { %2683 = vmatmul.mubr.f32.gmra.mrb[52].mxu1 %v2552_v25 }
0x103d   :  { %v5647_v3 = vpop.f32.mrb[42].mxu1 }
0x103e   :  { %v5648_v11 = vpop.f32.mrb[43].mxu1 }
0x103f   :  { %v5649_v50 = vadd.f32 %v5648_v11, %v5647_v3 }
0x1041   :  { %v2660_v9 = vadd.f32 %v5649_v50, %v5326_v35  ;;  %v5650_v4 = vpop.f32.mrb[44].mxu1 }
0x1042   :  { %v5651_v60 = vpop.f32.mrb[45].mxu1 }
0x1043   :  { %v8452_v22 = vadd.f32 %v2660_v9, %v8113_v43  ;;  %v5652_v57 = vadd.f32 %v5651_v60, %v5650_v4 }
0x1045   :  { %v2665_v16 = vadd.f32 %v5652_v57, %v5326_v35  ;;  %v5653_v18 = vpop.f32.mrb[46].mxu1  ;;  %v2698_v51 = vsel %vm102_vm0, %v8452_v22, 0.0 }
0x1046   :  { %2699 = vadd.xlane.f32.xlu1 %v2698_v51  ;;  %v5654_v29 = vpop.f32.mrb[47].mxu1 }
0x1047   :  { %v8457_v5 = vadd.f32 %v2665_v16, %v8110_v14  ;;  %v5655_v49 = vadd.f32 %v5654_v29, %v5653_v18 }
0x1049   :  { %v2670_v33 = vadd.f32 %v5655_v49, %v5326_v35  ;;  %v5656_v12 = vpop.f32.mrb[48].mxu1  ;;  %v2701_v13 = vsel %vm102_vm0, %v8457_v5, 0.0 }
0x104a   :  { %2702 = vadd.xlane.f32.xlu0 %v2701_v13  ;;  %v5657_v43 = vpop.f32.mrb[49].mxu1 }
0x104b   :  { %v8462_v37 = vadd.f32 %v2670_v33, %v8120_v63  ;;  %v5658_v47 = vadd.f32 %v5657_v43, %v5656_v12  ;;  %v5336_v33 = vld [vmem:[%s9431_s6 + $0xa8] sm:$0xff]  ;;  %v5338_v12 = vld [vmem:[%s9431_s6 + $0xb8] sm:$0xff]  ;;  %v5335_v43 = vld [vmem:[%s9431_s6 + $0xa0] sm:$0xff] }
0x104c   :  { %v6451_v13 = vpack.c.bf16 %v5338_v12, %v5336_v33 }
0x104d   :  { %v2675_v54 = vadd.f32 %v5658_v47, %v5326_v35  ;;  %v2704_v38 = vsel %vm102_vm0, %v8462_v37, 0.0  ;;  %v5337_v47 = vld [vmem:[%s9431_s6 + $0xb0] sm:$0xff] }
0x104e   :  { %v5659_v32 = vpop.f32.mrb[50].mxu1  ;;  %2705 = vadd.xlane.f32.xlu1 %v2704_v38  ;;  %v5340_v38 = vld [vmem:[%s9431_s6 + $0xc8] sm:$0xff] }
0x104f   :  { %v8467_v14 = vadd.f32 %v2675_v54, %v8123_v56  ;;  %v5660_v28 = vpop.f32.mrb[51].mxu1  ;;  %v6453_v54 = vpack.c.bf16 %v5337_v47, %v5335_v43 }
0x1050   :  { %v5661_v2 = vadd.f32 %v5660_v28, %v5659_v32  ;;  %v5342_v32 = vld [vmem:[%s9431_s6 + $0xd8] sm:$0xff] }
0x1051   :  { %v2707_v48 = vsel %vm102_vm0, %v8467_v14, 0.0  ;;  %v6455_v28 = vpack.c.bf16 %v5342_v32, %v5340_v38 }
0x1052   :  { %v2680_v45 = vadd.f32 %v5661_v2, %v5326_v35  ;;  %v5662_v17 = vpop.f32.mrb[52].mxu1  ;;  %2708 = vadd.xlane.f32.xlu0 %v2707_v48  ;;  %v5339_v2 = vld [vmem:[%s9431_s6 + $0xc0] sm:$0xff]  ;;  %v5341_v48 = vld [vmem:[%s9431_s6 + $0xd0] sm:$0xff] }
0x1053   :  { %v5663_v63 = vpop.f32.mrb[53].mxu1 }
0x1054   :  { %v8472_v15 = vadd.f32 %v2680_v45, %v8133_v61  ;;  %v5664_v31 = vadd.f32 %v5663_v63, %v5662_v17  ;;  %v5334_v61 = vld [vmem:[%s9431_s6 + $0x98] sm:$0xff]  ;;  %v6457_v45 = vpack.c.bf16 %v5341_v48, %v5339_v2  ;;  %v5344_v17 = vld [vmem:[%s9431_s6 + $0xe8] sm:$0xff] }
0x1055   :  { %v6447_v23 = vpack.c.bf16 %v5334_v61, %v5332_v39  ;;  %v5346_v63 = vld [vmem:[%s9431_s6 + $0xf8] sm:$0xff] }
0x1056   :  { %v2685_v41 = vadd.f32 %v5664_v31, %v5326_v35  ;;  %v2710_v8 = vsel %vm102_vm0, %v8472_v15, 0.0  ;;  %v6459_v31 = vpack.c.bf16 %v5346_v63, %v5344_v17 }
0x1057   :  { %2711 = vadd.xlane.f32.xlu1 %v2710_v8  ;;  %6448 = vmatprep.subr.bf16.mxu0 %v6447_v23  ;;  %v5345_v8 = vld [vmem:[%s9431_s6 + $0xf0] sm:$0xff] }
0x1058   :  { %v8477_v56 = vadd.f32 %v2685_v41, %v8130_v27  ;;  %v5333_v27 = vld [vmem:[%s9431_s6 + $0x90] sm:$0xff]  ;;  %v5343_v41 = vld [vmem:[%s9431_s6 + $0xe0] sm:$0xff] }
0x1059   :  { %v6449_v1 = vpack.c.bf16 %v5333_v27, %v5331_v7 }
0x105a   :  { %v2713_v24 = vsel %vm102_vm0, %v8477_v56, 0.0 }
0x105b   :  { %2714 = vadd.xlane.f32.xlu0 %v2713_v24  ;;  %6450 = vmatpush1.bf16.msra.mxu0 %v6449_v1  ;;  %v6461_v24 = vpack.c.bf16 %v5345_v8, %v5343_v41 }
0x105c   :  { %6452 = vmatprep.subr.bf16.mxu0 %v6451_v13 }
0x105f   :  { %6454 = vmatpush1.bf16.msra.mxu0 %v6453_v54 }
0x1060   :  { %6456 = vmatprep.subr.bf16.mxu0 %v6455_v28 }
0x1063   :  { %6458 = vmatpush1.bf16.msra.mxu0 %v6457_v45 }
0x1064   :  { %6460 = vmatprep.subr.bf16.mxu0 %v6459_v31 }
0x1067   :  { %6462 = vmatpush1.bf16.msra.mxu0 %v6461_v24 }
0x10d3   :  { %v2700_v30 = vpop.xlane.xlu1 %2699 }
0x10d4   :  { %v2716_v19 = vmul.f32 0.015625, %v2700_v30 }
0x10d6   :  { %v8494_v62 = vsub.f32 %v8452_v22, %v2716_v19 }
0x10d7   :  { %v2703_v20 = vpop.xlane.xlu0 %2702 }
0x10d8   :  { %v2717_v21 = vmul.f32 0.015625, %v2703_v20  ;;  %v2728_v6 = vmul.f32 %v8494_v62, %v8494_v62 }
0x10da   :  { %v8499_v34 = vsub.f32 %v8457_v5, %v2717_v21  ;;  %v2734_v53 = vsel %vm102_vm0, %v2728_v6, 0.0 }
0x10db   :  { %2735 = vadd.xlane.f32.xlu1 %v2734_v53  ;;  %v2706_v42 = vpop.xlane.xlu1 %2705 }
0x10dc   :  { %v2718_v58 = vmul.f32 0.015625, %v2706_v42  ;;  %v2729_v26 = vmul.f32 %v8499_v34, %v8499_v34  ;;  %v5329_v42 = vld [vmem:[%s9429_s4 + $0x1] ss:$0 sm:$0xff] }
0x10de   :  { %v8505_v40 = vsub.f32 %v8462_v37, %v2718_v58  ;;  %v2737_v52 = vsel %vm102_vm0, %v2729_v26, 0.0 }
0x10df   :  { %v2709_v55 = vpop.xlane.xlu0 %2708  ;;  %2738 = vadd.xlane.f32.xlu0 %v2737_v52 }
0x10e0   :  { %v2719_v46 = vmul.f32 0.015625, %v2709_v55  ;;  %v2730_v59 = vmul.f32 %v8505_v40, %v8505_v40  ;;  %v5330_v55 = vld [vmem:[%s9430_s5 + $0x1] ss:$0 sm:$0xff] }
0x10e2   :  { %v8511_v25 = vsub.f32 %v8467_v14, %v2719_v46  ;;  %v2740_v3 = vsel %vm102_vm0, %v2730_v59, 0.0 }
0x10e3   :  { %2741 = vadd.xlane.f32.xlu1 %v2740_v3 }
0x10e4   :  { %v2712_v35 = vpop.xlane.xlu1 %2711  ;;  %v2731_v11 = vmul.f32 %v8511_v25, %v8511_v25 }
0x10e5   :  { %v2720_v50 = vmul.f32 0.015625, %v2712_v35 }
0x10e6   :  { %v2743_v9 = vsel %vm102_vm0, %v2731_v11, 0.0 }
0x10e7   :  { %v8518_v4 = vsub.f32 %v8472_v15, %v2720_v50  ;;  %2744 = vadd.xlane.f32.xlu0 %v2743_v9 }
0x10e8   :  { %v2715_v60 = vpop.xlane.xlu0 %2714 }
0x10e9   :  { %v2721_v57 = vmul.f32 0.015625, %v2715_v60  ;;  %v2732_v16 = vmul.f32 %v8518_v4, %v8518_v4 }
0x10eb   :  { %v8523_v18 = vsub.f32 %v8477_v56, %v2721_v57  ;;  %v2746_v51 = vsel %vm102_vm0, %v2732_v16, 0.0 }
0x10ec   :  { %2747 = vadd.xlane.f32.xlu1 %v2746_v51 }
0x10ed   :  { %v2733_v29 = vmul.f32 %v8523_v18, %v8523_v18 }
0x10ef   :  { %v2749_v49 = vsel %vm102_vm0, %v2733_v29, 0.0 }
0x10f0   :  { %2750 = vadd.xlane.f32.xlu0 %v2749_v49 }
0x1168   :  { %v2736_v39 = vpop.xlane.xlu1 %2735 }
0x1169   :  { %v2752_v61 = vmul.f32 0.015625, %v2736_v39 }
0x116b   :  { %v2758_v7 = vadd.f32 1e-06, %v2752_v61 }
0x116c   :  { %v2739_v23 = vpop.xlane.xlu0 %2738 }
0x116d   :  { %7011 = vrsqrt.f32 %v2758_v7  ;;  %v2753_v27 = vmul.f32 0.015625, %v2739_v23 }
0x116f   :  { %v2759_v1 = vadd.f32 1e-06, %v2753_v27 }
0x1170   :  { %v2742_v30 = vpop.xlane.xlu1 %2741 }
0x1171   :  { %7013 = vrsqrt.f32 %v2759_v1  ;;  %v2754_v19 = vmul.f32 0.015625, %v2742_v30 }
0x1173   :  { %v2760_v20 = vadd.f32 1e-06, %v2754_v19 }
0x1174   :  { %v2745_v21 = vpop.xlane.xlu0 %2744 }
0x1175   :  { %7015 = vrsqrt.f32 %v2760_v20  ;;  %v2755_v6 = vmul.f32 0.015625, %v2745_v21 }
0x1177   :  { %v7012_v53 = vpop.eup %7011  ;;  %v2761_v58 = vadd.f32 1e-06, %v2755_v6 }
0x1178   :  { %v2770_v26 = vmul.f32 %v7012_v53, %v8494_v62 }
0x1179   :  { %7017 = vrsqrt.f32 %v2761_v58  ;;  %v2748_v52 = vpop.xlane.xlu1 %2747 }
0x117a   :  { %v2782_v46 = vmul.f32 %v5329_v42, %v2770_v26  ;;  %v2756_v59 = vmul.f32 0.015625, %v2748_v52 }
0x117b   :  { %v7014_v3 = vpop.eup %7013 }
0x117c   :  { %v2762_v35 = vadd.f32 1e-06, %v2756_v59  ;;  %v2794_v11 = vadd.f32 %v5330_v55, %v2782_v46  ;;  %v2771_v50 = vmul.f32 %v7014_v3, %v8499_v34 }
0x117d   :  { %v2751_v9 = vpop.xlane.xlu0 %2750 }
0x117e   :  { %7019 = vrsqrt.f32 %v2762_v35  ;;  %v2757_v60 = vmul.f32 0.015625, %v2751_v9  ;;  %5348 = vmatmul.mubr.msk.f32.vlgmr.msra.gmra.mrb[48].mxu0 %vm102_vm0, %v2794_v11  ;;  %v2783_v57 = vmul.f32 %v5329_v42, %v2771_v50 }
0x117f   :  { %v7016_v62 = vpop.eup %7015  ;;  %2918 = vmatprep.mubr.f32.mxu0 %v7190_v10 }
0x1180   :  { %v2763_v16 = vadd.f32 1e-06, %v2757_v60  ;;  %v2795_v51 = vadd.f32 %v5330_v55, %v2783_v57  ;;  %v2772_v29 = vmul.f32 %v7016_v62, %v8505_v40 }
0x1182   :  { %7021 = vrsqrt.f32 %v2763_v16  ;;  %5349 = vmatmul.mubr.msk.f32.gmra.mrb[50].mxu0 %vm102_vm0, %v2795_v51  ;;  %v2784_v49 = vmul.f32 %v5329_v42, %v2772_v29 }
0x1183   :  { %v7018_v33 = vpop.eup %7017  ;;  %2924 = vmatprep.mubr.f32.mxu0 %v7190_v10 }
0x1184   :  { %v2796_v34 = vadd.f32 %v5330_v55, %v2784_v49  ;;  %v2773_v12 = vmul.f32 %v7018_v33, %v8511_v25 }
0x1186   :  { %5350 = vmatmul.mubr.msk.f32.gmra.mrb[52].mxu0 %vm102_vm0, %v2796_v34  ;;  %v2785_v13 = vmul.f32 %v5329_v42, %v2773_v12 }
0x1187   :  { %2930 = vmatprep.mubr.f32.mxu0 %v7190_v10 }
0x1188   :  { %v7020_v43 = vpop.eup %7019  ;;  %v2797_v47 = vadd.f32 %v5330_v55, %v2785_v13 }
0x1189   :  { %v2774_v54 = vmul.f32 %v7020_v43, %v8518_v4  ;;  %v5347_v4 = vld [vmem:[%s9432_s7 + $0x2] sm:$0x3]  ;;  %s7198_s7 = smov [#allocation4]  }
0x118a   :  { %5351 = vmatmul.mubr.msk.f32.gmra.mrb[54].mxu0 %vm102_vm0, %v2797_v47  ;;  %v2823_v48 = vrot.slane %v5347_v4, %v7558_v36  ;;  %v2827_v45 = vrot.slane %v5347_v4, %v7563_v0 }
0x118b   :  { %2936 = vmatprep.mubr.f32.mxu0 %v7190_v10  ;;  %v2786_v40 = vmul.f32 %v5329_v42, %v2774_v54 }
0x118c   :  { %v7022_v38 = vpop.eup %7021 }
0x118d   :  { %v2798_v32 = vadd.f32 %v5330_v55, %v2786_v40  ;;  %v2775_v28 = vmul.f32 %v7022_v38, %v8523_v18 }
0x118f   :  { %5352 = vmatmul.mubr.msk.f32.gmra.mrb[56].mxu0 %vm102_vm0, %v2798_v32  ;;  %v2787_v25 = vmul.f32 %v5329_v42, %v2775_v28 }
0x1190   :  { %2942 = vmatprep.mubr.f32.mxu0 %v7190_v10 }
0x1191   :  { %v2799_v2 = vadd.f32 %v5330_v55, %v2787_v25 }
0x1193   :  { %5353 = vmatmul.mubr.msk.f32.gmra.mrb[58].mxu0 %vm102_vm0, %v2799_v2 }
0x1251   :  { %v2914_v17 = vpop.f32.mrb[48].mxu0 }
0x1252   :  { %v2915_v63 = vadd.f32 %v2914_v17, %v2823_v48  ;;  %v2916_v31 = vpop.f32.mrb[49].mxu0 }
0x1253   :  { %v2917_v18 = vadd.f32 %v2916_v31, %v2827_v45 }
0x1254   :  { %2949 = vst [vmem:[#allocation2] sm:$0xff] %v2915_v63  ;;  %v8593_v41 = vmul.f32 0.25, %v2915_v63 }
0x1255   :  { %2950 = vst.msk [vmem:[#allocation2 + $0x8] sm:$0xff] %vm102_vm0, %v2917_v18  ;;  %v2920_v8 = vpop.f32.mrb[50].mxu0 }
0x1256   :  { %v8596_v24 = vadd.f32 %v2920_v8, %v2823_v48  ;;  %v2922_v39 = vpop.f32.mrb[51].mxu0  ;;  %6030 = vmatprep.mubr.msk.f32.mxu0 %vm522_vm1, %v8593_v41 }
0x1257   :  { %v2923_v61 = vadd.f32 %v2922_v39, %v2827_v45 }
0x1258   :  { %2951 = vst [vmem:[#allocation2 + $0x10] sm:$0xff] %v8596_v24  ;;  %v8602_v7 = vpack.i.bf16 %v8596_v24, %v2915_v63  ;;  %v8626_v29 = vmul.f32 0.25, %v8596_v24 }
0x1259   :  { %2952 = vst.msk [vmem:[#allocation2 + $0x18] sm:$0xff] %vm102_vm0, %v2923_v61  ;;  %v2926_v23 = vpop.f32.mrb[52].mxu0 }
0x125a   :  { %v2927_v27 = vadd.f32 %v2926_v23, %v2823_v48  ;;  %v2928_v1 = vpop.f32.mrb[53].mxu0  ;;  %6763 = vrot.lane.b32.xlu1 %v8602_v7, %s7191_s23 }
0x125b   :  { %v2929_v30 = vadd.f32 %v2928_v1, %v2827_v45 }
0x125c   :  { %v2973_v53 = vld [vmem:[#allocation2 + $0x8] sm:$0xff]  ;;  %v8646_v47 = vmul.f32 0.25, %v2927_v27 }
0x125d   :  { %2954 = vst.msk [vmem:[#allocation2 + $0x28] sm:$0xff] %vm102_vm0, %v2929_v30  ;;  %v2932_v19 = vpop.f32.mrb[54].mxu0 }
0x125e   :  { %v2933_v20 = vadd.f32 %v2932_v19, %v2823_v48  ;;  %v2934_v21 = vpop.f32.mrb[55].mxu0 }
0x125f   :  { %v2935_v6 = vadd.f32 %v2934_v21, %v2827_v45 }
0x1260   :  { %v2974_v42 = vld [vmem:[#allocation2 + $0x18] sm:$0xff]  ;;  %v8608_v58 = vpack.i.bf16 %v2933_v20, %v2927_v27  ;;  %v8632_v34 = vmul.f32 0.25, %v2933_v20 }
0x1261   :  { %2956 = vst.msk [vmem:[#allocation2 + $0x38] sm:$0xff] %vm102_vm0, %v2935_v6  ;;  %v6481_v26 = vpack.c.bf16 %v2974_v42, %v2973_v53  ;;  %v8611_v52 = vpack.i.bf16 %v2974_v42, %v2973_v53 }
0x1262   :  { %v2938_v55 = vpop.f32.mrb[56].mxu0  ;;  %6768 = vrot.lane.b32.xlu0 %v8608_v58, %s7191_s23 }
0x1263   :  { %v2939_v46 = vadd.f32 %v2938_v55, %v2823_v48  ;;  %v2940_v59 = vpop.f32.mrb[57].mxu0  ;;  %6482 = vmatprep.subr.bf16.mxu1 %v6481_v26 }
0x1264   :  { %v2941_v3 = vadd.f32 %v2940_v59, %v2827_v45  ;;  %6484 = vmatpush3.bf16.msra.mxu1 %v6481_v26  ;;  %v2975_v60 = vld [vmem:[#allocation2 + $0x28] sm:$0xff] }
0x1265   :  { %v8650_v54 = vmul.f32 0.25, %v2939_v46 }
0x1266   :  { %2958 = vst.msk [vmem:[#allocation2 + $0x48] sm:$0xff] %vm102_vm0, %v2941_v3  ;;  %v2944_v35 = vpop.f32.mrb[58].mxu0 }
0x1267   :  { %v2945_v11 = vadd.f32 %v2944_v35, %v2823_v48  ;;  %v2946_v50 = vpop.f32.mrb[59].mxu0  ;;  %v8697_v35 = vld [vmem:[%s9428_s3 + $0x8] sm:$0xff] }
0x1268   :  { %v2947_v9 = vadd.f32 %v2946_v50, %v2827_v45  ;;  %v2976_v57 = vld [vmem:[#allocation2 + $0x38] sm:$0xff] }
0x1269   :  { %v6485_v62 = vpack.c.bf16 %v2976_v57, %v2975_v60  ;;  %v8616_v16 = vpack.i.bf16 %v2945_v11, %v2939_v46  ;;  %v8618_v51 = vpack.i.bf16 %v2976_v57, %v2975_v60  ;;  %v8640_v43 = vmul.f32 0.25, %v2945_v11 }
0x126a   :  { %2960 = vst.msk [vmem:[#allocation2 + $0x58] sm:$0xff] %vm102_vm0, %v2947_v9  ;;  %v8703_v9 = vld [vmem:[%s9428_s3] sm:$0xff] }
0x126b   :  { %6486 = vmatprep.subr.bf16.mxu1 %v6485_v62  ;;  %6788 = vrot.lane.b32.xlu0 %v8616_v16, %s7192_s24 }
0x126c   :  { %6488 = vmatpush3.bf16.msra.mxu1 %v6485_v62  ;;  %6773 = vrot.lane.b32.xlu1 %v8616_v16, %s7191_s23  ;;  %s5217_s23 = sshll.u32 %s7198_s7, 4  ;;  %s5218_s23 = int_to_ptr.vmem [resolvable:$true] %s5217_s23 }
0x126d   :  { %v2977_v49 = vld [vmem:[#allocation2 + $0x48] sm:$0xff]  ;;  %p7170_p1 = scmp.lt.s32.totalorder %s5218_s23, %s5218_s23 }
0x126f   :  { %3333 = vrot.lane.b32.xlu0 %v8626_v29, %s7194_s26 }
0x1270   :  { %6778 = vrot.lane.b32.xlu1 %v8602_v7, %s7192_s24 }
0x1271   :  { %v2978_v33 = vld [vmem:[#allocation2 + $0x58] sm:$0xff] }
0x1272   :  { %v6489_v12 = vpack.c.bf16 %v2978_v33, %v2977_v49  ;;  %v8634_v13 = vpack.i.bf16 %v2978_v33, %v2977_v49  ;;  %v8711_v33 = vld [vmem:[%s9428_s3 + $0x18] sm:$0xff] }
0x1273   :  { %3337 = vrot.lane.b32.xlu0 %v8632_v34, %s7194_s26 }
0x1274   :  { %6490 = vmatprep.subr.bf16.mxu1 %v6489_v12  ;;  %6783 = vrot.lane.b32.xlu1 %v8608_v58, %s7192_s24 }
0x1275   :  { %6492 = vmatpush3.bf16.msra.mxu1 %v6489_v12 }
0x1277   :  { %3341 = vrot.lane.b32.xlu0 %v8640_v43, %s7194_s26 }
0x1278   :  { %3331 = vrot.lane.b32.xlu1 %v8593_v41, %s7194_s26 }
0x127c   :  { %3335 = vrot.lane.b32.xlu1 %v8646_v47, %s7194_s26 }
0x1280   :  { %3339 = vrot.lane.b32.xlu1 %v8650_v54, %s7194_s26 }
0x12cc   :  { %v6764_v40 = vpop.permute.xlu1 %6763 }
0x12cd   :  { %v6766_v38 = vunpack.i.h.bf16 %v6764_v40  ;;  %v6765_v32 = vunpack.i.l.bf16 %v6764_v40 }
0x12cf   :  { %v6463_v28 = vpack.c.bf16 %v6766_v38, %v6765_v32  ;;  %v8717_v38 = vld [vmem:[%s9428_s3 + $0x10] sm:$0xff] }
0x12d1   :  { %6465 = vmatprep.subr.msk.bf16.mxu0 %vm7616_vm2, %v6463_v28 }
0x12d2   :  { %6468 = vmatpush3.bf16.xpose.msk.msra.mxu0 %vm7616_vm2, %v6463_v28 }
0x12d4   :  { %v6769_v25 = vpop.permute.xlu0 %6768 }
0x12d5   :  { %v6771_v2 = vunpack.i.h.bf16 %v6769_v25  ;;  %v6770_v4 = vunpack.i.l.bf16 %v6769_v25 }
0x12d7   :  { %v6469_v48 = vpack.c.bf16 %v6771_v2, %v6770_v4  ;;  %v8724_v4 = vld [vmem:[%s9428_s3 + $0x20] sm:$0xff] }
0x12d9   :  { %6471 = vmatprep.subr.msk.bf16.mxu0 %vm7616_vm2, %v6469_v48 }
0x12da   :  { %6474 = vmatpush3.bf16.xpose.msk.msra.mxu0 %vm7616_vm2, %v6469_v48 }
0x12dd   :  { %v6789_v19 = vpop.permute.xlu0 %6788 }
0x12de   :  { %v6774_v45 = vpop.permute.xlu1 %6773  ;;  %v6791_v20 = vunpack.i.h.bf16 %v6789_v19  ;;  %v6790_v21 = vunpack.i.l.bf16 %v6789_v19 }
0x12df   :  { %v6776_v17 = vunpack.i.h.bf16 %v6774_v45  ;;  %v6775_v63 = vunpack.i.l.bf16 %v6774_v45  ;;  %v8730_v45 = vld [vmem:[%s9428_s3 + $0x28] sm:$0xff]  ;;  %s9459_s3 = smov 16  }
0x12e0   :  { %v6505_v6 = vpack.c.bf16 %v6791_v20, %v6790_v21 }
0x12e1   :  { %v6475_v31 = vpack.c.bf16 %v6776_v17, %v6775_v63  ;;  %v3334_v42 = vpop.permute.xlu0 %3333 }
0x12e2   :  { %v6779_v18 = vpop.permute.xlu1 %6778 }
0x12e3   :  { %v6781_v8 = vunpack.i.h.bf16 %v6779_v18  ;;  %v6780_v39 = vunpack.i.l.bf16 %v6779_v18  ;;  %6477 = vmatprep.subr.msk.bf16.mxu0 %vm7616_vm2, %v6475_v31 }
0x12e4   :  { %6480 = vmatpush3.bf16.xpose.msk.msra.mxu0 %vm7616_vm2, %v6475_v31 }
0x12e5   :  { %v6493_v61 = vpack.c.bf16 %v6781_v8, %v6780_v39  ;;  %v3338_v55 = vpop.permute.xlu0 %3337 }
0x12e6   :  { %v6784_v23 = vpop.permute.xlu1 %6783 }
0x12e7   :  { %v6786_v27 = vunpack.i.h.bf16 %v6784_v23  ;;  %v6785_v1 = vunpack.i.l.bf16 %v6784_v23  ;;  %6495 = vmatprep.subr.msk.bf16.mxu0 %vm7616_vm2, %v6493_v61 }
0x12e9   :  { %v6499_v30 = vpack.c.bf16 %v6786_v27, %v6785_v1  ;;  %v3342_v59 = vpop.permute.xlu0 %3341 }
0x12ea   :  { %v3332_v53 = vpop.permute.xlu1 %3331 }
0x12eb   :  { %6031 = vmatmul.mubr.msk.f32.vlgmr.msra.gmra.mrb[60].mxu0 %vm522_vm1, %v8626_v29 }
0x12ec   :  { %6033 = vmatprep.mubr.msk.f32.mxu0 %vm522_vm1, %v8646_v47  ;;  %6498 = vmatpush3.bf16.xpose.msk.msra.mxu0 %vm7616_vm2, %v6493_v61 }
0x12ed   :  { %6501 = vmatprep.subr.msk.bf16.mxu0 %vm7616_vm2, %v6499_v30 }
0x12ee   :  { %v3336_v26 = vpop.permute.xlu1 %3335 }
0x12ef   :  { %6034 = vmatmul.mubr.msk.f32.gmra.mrb[62].mxu0 %vm522_vm1, %v8632_v34 }
0x12f0   :  { %6036 = vmatprep.mubr.msk.f32.mxu0 %vm522_vm1, %v8650_v54 }
0x12f2   :  { %v3340_v46 = vpop.permute.xlu1 %3339 }
0x12f3   :  { %6037 = vmatmul.mubr.msk.f32.gmra.mrb[64].mxu0 %vm522_vm1, %v8640_v43 }
0x12f4   :  { %6504 = vmatpush3.bf16.xpose.msk.msra.mxu0 %vm7616_vm2, %v6499_v30  ;;  %6072 = vmatprep.mubr.msk.f32.mxu0 %vm522_vm1, %v3332_v53 }
0x12f5   :  { %6507 = vmatprep.subr.msk.bf16.mxu0 %vm7616_vm2, %v6505_v6 }
0x12fc   :  { %6510 = vmatpush3.bf16.xpose.msk.msra.mxu0 %vm7616_vm2, %v6505_v6 }
0x1303   :  { %6073 = vmatmul.mubr.msk.f32.vlgmr.msra.gmra.mrb[66].mxu0 %vm522_vm1, %v3334_v42 }
0x1304   :  { %6075 = vmatprep.mubr.msk.f32.mxu0 %vm522_vm1, %v3336_v26 }
0x1307   :  { %6076 = vmatmul.mubr.msk.f32.gmra.mrb[68].mxu0 %vm522_vm1, %v3338_v55 }
0x1308   :  { %6078 = vmatprep.mubr.msk.f32.mxu0 %vm522_vm1, %v3340_v46 }
0x130b   :  { %6079 = vmatmul.mubr.msk.f32.gmra.mrb[70].mxu0 %vm522_vm1, %v3342_v59 }
0x13be   :  { %v6032_v3 = vpop.f32.mrb[60].mxu0 }
0x13bf   :  { %v3099_v11 = vadd.f32 %v8697_v35, %v6032_v3  ;;  %v3093_v50 = vpop.f32.mrb[61].mxu0 }
0x13c0   :  { %v3094_v60 = vadd.f32 %v8703_v9, %v3093_v50 }
0x13c1   :  { %v3125_v57 = vsel %vm648_vm3, %v3099_v11, -inf }
0x13c2   :  { %3126 = vmax.xlane.f32.xlu0 %v3125_v57  ;;  %v6035_v62 = vpop.f32.mrb[62].mxu0  ;;  %v3122_v49 = vsel %vm648_vm3, %v3094_v60, -inf }
0x13c3   :  { %v3109_v12 = vadd.f32 %v8711_v33, %v6035_v62  ;;  %v3103_v40 = vpop.f32.mrb[63].mxu0  ;;  %3123 = vmax.xlane.f32.xlu1 %v3122_v49 }
0x13c4   :  { %v3104_v32 = vadd.f32 %v8717_v38, %v3103_v40 }
0x13c5   :  { %v3131_v28 = vsel %vm648_vm3, %v3109_v12, -inf }
0x13c6   :  { %3132 = vmax.xlane.f32.xlu0 %v3131_v28  ;;  %v6038_v25 = vpop.f32.mrb[64].mxu0  ;;  %v3128_v63 = vsel %vm648_vm3, %v3104_v32, -inf }
0x13c7   :  { %v3113_v2 = vpop.f32.mrb[65].mxu0  ;;  %v3119_v17 = vadd.f32 %v8730_v45, %v6038_v25 }
0x13c8   :  { %v3114_v48 = vadd.f32 %v8724_v4, %v3113_v2 }
0x13c9   :  { %v3137_v18 = vsel %vm648_vm3, %v3119_v17, -inf }
0x13ca   :  { %3129 = vmax.xlane.f32.xlu0 %v3128_v63  ;;  %v3134_v31 = vsel %vm648_vm3, %v3114_v48, -inf }
0x13cb   :  { %3135 = vmax.xlane.f32.xlu1 %v3134_v31 }
0x13ce   :  { %3138 = vmax.xlane.f32.xlu0 %v3137_v18 }
0x13d6   :  { %v6074_v8 = vpop.f32.mrb[66].mxu0 }
0x13d7   :  { %v8737_v39 = vadd.f32 %v8697_v35, %v6074_v8  ;;  %v3451_v61 = vpop.f32.mrb[67].mxu0 }
0x13d8   :  { %v8740_v23 = vadd.f32 %v8703_v9, %v3451_v61 }
0x13d9   :  { %v3483_v27 = vsel %vm648_vm3, %v8737_v39, -inf }
0x13da   :  { %v6077_v1 = vpop.f32.mrb[68].mxu0  ;;  %3484 = vmax.xlane.f32.xlu0 %v3483_v27  ;;  %v3480_v30 = vsel %vm648_vm3, %v8740_v23, -inf }
0x13db   :  { %v8747_v19 = vadd.f32 %v8711_v33, %v6077_v1  ;;  %v3461_v20 = vpop.f32.mrb[69].mxu0  ;;  %3481 = vmax.xlane.f32.xlu1 %v3480_v30 }
0x13dc   :  { %v8761_v55 = vadd.f32 %v8717_v38, %v3461_v20 }
0x13dd   :  { %v3489_v21 = vsel %vm648_vm3, %v8747_v19, -inf }
0x13de   :  { %v6080_v6 = vpop.f32.mrb[70].mxu0  ;;  %3490 = vmax.xlane.f32.xlu0 %v3489_v21  ;;  %v3486_v59 = vsel %vm648_vm3, %v8761_v55, -inf }
0x13df   :  { %v8752_v53 = vadd.f32 %v8730_v45, %v6080_v6  ;;  %v3471_v42 = vpop.f32.mrb[71].mxu0 }
0x13e0   :  { %v8764_v46 = vadd.f32 %v8724_v4, %v3471_v42 }
0x13e1   :  { %v3495_v26 = vsel %vm648_vm3, %v8752_v53, -inf }
0x13e2   :  { %3496 = vmax.xlane.f32.xlu0 %v3495_v26  ;;  %v3492_v3 = vsel %vm648_vm3, %v8764_v46, -inf }
0x13ec   :  { %6793 = vrot.lane.b32.xlu1 %v8611_v52, %s7194_s26 }
0x13f8   :  { %6798 = vrot.lane.b32.xlu0 %v8618_v51, %s7194_s26 }
0x1410   :  { %3487 = vmax.xlane.f32.xlu1 %v3486_v59 }
0x1414   :  { %3493 = vmax.xlane.f32.xlu1 %v3492_v3 }
0x1425   :  { %6803 = vrot.lane.b32.xlu1 %v8634_v13, %s7194_s26  ;;  %s9460_s26 = smov 80  }
0x144f   :  { %v3127_v50 = vpop.xlane.xlu0 %3126 }
0x1450   :  { %v3141_v57 = vsub.f32 %v3099_v11, %v3127_v50  ;;  %v3124_v62 = vpop.xlane.xlu1 %3123 }
0x1451   :  { %v3140_v49 = vsub.f32 %v3094_v60, %v3124_v62 }
0x1452   :  { %v3148_v40 = vmul.f32 1.442695, %v3141_v57 }
0x1453   :  { %v3146_v28 = vmul.f32 1.442695, %v3140_v49  ;;  %v3133_v25 = vpop.xlane.xlu0 %3132 }
0x1454   :  { %7023 = vpow2.f32 %v3148_v40  ;;  %v3143_v2 = vsub.f32 %v3109_v12, %v3133_v25 }
0x1455   :  { %7025 = vpow2.f32 %v3146_v28 }
0x1456   :  { %v3152_v63 = vmul.f32 1.442695, %v3143_v2 }
0x1457   :  { %v3130_v31 = vpop.xlane.xlu0 %3129 }
0x1458   :  { %7027 = vpow2.f32 %v3152_v63  ;;  %v3142_v18 = vsub.f32 %v3104_v32, %v3130_v31  ;;  %v3136_v8 = vpop.xlane.xlu1 %3135 }
0x1459   :  { %v3144_v61 = vsub.f32 %v3114_v48, %v3136_v8 }
0x145a   :  { %v3150_v27 = vmul.f32 1.442695, %v3142_v18 }
0x145b   :  { %v3154_v1 = vmul.f32 1.442695, %v3144_v61  ;;  %v3139_v30 = vpop.xlane.xlu0 %3138 }
0x145c   :  { %7029 = vpow2.f32 %v3150_v27  ;;  %v3145_v20 = vsub.f32 %v3119_v17, %v3139_v30 }
0x145d   :  { %7031 = vpow2.f32 %v3154_v1 }
0x145e   :  { %v8772_v11 = vpop.eup %7023  ;;  %v3156_v60 = vmul.f32 1.442695, %v3145_v20 }
0x145f   :  { %v8774_v21 = vpop.eup %7025  ;;  %v3161_v12 = vsel %vm648_vm3, %v8772_v11, 0.0 }
0x1460   :  { %7033 = vpow2.f32 %v3156_v60  ;;  %3162 = vadd.xlane.f32.xlu0 %v3161_v12  ;;  %v3158_v32 = vsel %vm648_vm3, %v8774_v21, 0.0 }
0x1461   :  { %3159 = vadd.xlane.f32.xlu1 %v3158_v32 }
0x1462   :  { %v8780_v48 = vpop.eup %7027 }
0x1463   :  { %v3167_v17 = vsel %vm648_vm3, %v8780_v48, 0.0 }
0x1464   :  { %3168 = vadd.xlane.f32.xlu0 %v3167_v17 }
0x1466   :  { %v8784_v6 = vpop.eup %7029 }
0x1467   :  { %v3485_v42 = vpop.xlane.xlu0 %3484  ;;  %v3164_v26 = vsel %vm648_vm3, %v8784_v6, 0.0  ;;  %v8788_v59 = vpop.eup %7031 }
0x1468   :  { %v3499_v3 = vsub.f32 %v8737_v39, %v3485_v42  ;;  %3165 = vadd.xlane.f32.xlu1 %v3164_v26  ;;  %v3482_v50 = vpop.xlane.xlu1 %3481  ;;  %v3170_v2 = vsel %vm648_vm3, %v8788_v59, 0.0 }
0x1469   :  { %v3498_v57 = vsub.f32 %v8740_v23, %v3482_v50 }
0x146a   :  { %v8792_v62 = vpop.eup %7033  ;;  %v3506_v49 = vmul.f32 1.442695, %v3499_v3 }
0x146b   :  { %v3504_v40 = vmul.f32 1.442695, %v3498_v57  ;;  %v3491_v28 = vpop.xlane.xlu0 %3490  ;;  %v3173_v25 = vsel %vm648_vm3, %v8792_v62, 0.0 }
0x146c   :  { %7035 = vpow2.f32 %v3506_v49  ;;  %v3501_v63 = vsub.f32 %v8747_v19, %v3491_v28  ;;  %3174 = vadd.xlane.f32.xlu0 %v3173_v25  ;;  %3171 = vadd.xlane.f32.xlu1 %v3170_v2  ;;  %v6794_v39 = vpop.permute.xlu1 %6793 }
0x146d   :  { %7037 = vpow2.f32 %v3504_v40  ;;  %v6796_v31 = vunpack.i.h.bf16 %v6794_v39  ;;  %v6795_v23 = vunpack.i.l.bf16 %v6794_v39 }
0x146e   :  { %v3510_v18 = vmul.f32 1.442695, %v3501_v63 }
0x146f   :  { %v3497_v8 = vpop.xlane.xlu0 %3496  ;;  %v8799_v61 = vpack.c.bf16 %v6796_v31, %v6795_v23 }
0x1470   :  { %7039 = vpow2.f32 %v3510_v18  ;;  %v3503_v27 = vsub.f32 %v8752_v53, %v3497_v8 }
0x1471   :  { %6512 = vmatprep.subr.bf16.mxu1 %v8799_v61 }
0x1472   :  { %v3514_v1 = vmul.f32 1.442695, %v3503_v27 }
0x1474   :  { %7041 = vpow2.f32 %v3514_v1 }
0x1476   :  { %v8803_v30 = vpop.eup %7035 }
0x1477   :  { %v8805_v19 = vpop.eup %7037  ;;  %v3519_v20 = vsel %vm648_vm3, %v8803_v30, 0.0 }
0x1478   :  { %3520 = vadd.xlane.f32.xlu0 %v3519_v20  ;;  %v3516_v60 = vsel %vm648_vm3, %v8805_v19, 0.0 }
0x1479   :  { %3517 = vadd.xlane.f32.xlu1 %v3516_v60 }
0x147a   :  { %v8811_v12 = vpop.eup %7039 }
0x147b   :  { %v3525_v53 = vsel %vm648_vm3, %v8811_v12, 0.0 }
0x147c   :  { %3526 = vadd.xlane.f32.xlu0 %v3525_v53 }
0x147e   :  { %v8815_v32 = vpop.eup %7041 }
0x147f   :  { %v3531_v17 = vsel %vm648_vm3, %v8815_v32, 0.0 }
0x1480   :  { %3532 = vadd.xlane.f32.xlu0 %v3531_v17 }
0x149d   :  { %v3488_v42 = vpop.xlane.xlu1 %3487 }
0x149e   :  { %v3500_v26 = vsub.f32 %v8761_v55, %v3488_v42  ;;  %v6799_v55 = vpop.permute.xlu0 %6798 }
0x149f   :  { %v6801_v18 = vunpack.i.h.bf16 %v6799_v55  ;;  %v6800_v8 = vunpack.i.l.bf16 %v6799_v55 }
0x14a0   :  { %v3508_v3 = vmul.f32 1.442695, %v3500_v26 }
0x14a1   :  { %v3494_v50 = vpop.xlane.xlu1 %3493  ;;  %v6515_v53 = vpack.c.bf16 %v6801_v18, %v6800_v8 }
0x14a2   :  { %7043 = vpow2.f32 %v3508_v3  ;;  %v3502_v57 = vsub.f32 %v8764_v46, %v3494_v50 }
0x14a4   :  { %v3512_v49 = vmul.f32 1.442695, %v3502_v57 }
0x14a6   :  { %7045 = vpow2.f32 %v3512_v49 }
0x14ac   :  { %v8821_v40 = vpop.eup %7043 }
0x14ad   :  { %v3522_v28 = vsel %vm648_vm3, %v8821_v40, 0.0 }
0x14ae   :  { %3523 = vadd.xlane.f32.xlu1 %v3522_v28 }
0x14b0   :  { %v8825_v25 = vpop.eup %7045 }
0x14b1   :  { %v3528_v2 = vsel %vm648_vm3, %v8825_v25, 0.0 }
0x14b2   :  { %3529 = vadd.xlane.f32.xlu0 %v3528_v2 }
0x14bf   :  { %6813 = vrot.lane.b32.xlu1 %v8608_v58, %s7193_s25 }
0x14c3   :  { %6818 = vrot.lane.b32.xlu1 %v8616_v16, %s7193_s25 }
0x14c7   :  { %3737 = vrot.lane.b32.xlu1 %v8593_v41, %s7195_s28  ;;  %v6804_v41 = vpop.permute.xlu1 %6803 }
0x14c8   :  { %6808 = vrot.lane.b32.xlu0 %v8602_v7, %s7193_s25  ;;  %v6806_v17 = vunpack.i.h.bf16 %v6804_v41  ;;  %v6805_v42 = vunpack.i.l.bf16 %v6804_v41 }
0x14ca   :  { %v6519_v50 = vpack.c.bf16 %v6806_v17, %v6805_v42 }
0x14cb   :  { %3739 = vrot.lane.b32.xlu1 %v8626_v29, %s7195_s28 }
0x14cc   :  { %3743 = vrot.lane.b32.xlu0 %v8632_v34, %s7195_s28 }
0x14cf   :  { %3741 = vrot.lane.b32.xlu1 %v8646_v47, %s7195_s28 }
0x14d0   :  { %3747 = vrot.lane.b32.xlu0 %v8640_v43, %s7195_s28 }
0x14d3   :  { %3745 = vrot.lane.b32.xlu1 %v8650_v54, %s7195_s28 }
0x14ed   :  { %v3163_v46 = vpop.xlane.xlu0 %3162 }
0x14ee   :  { %7047 = vrcp.f32 %v3163_v46  ;;  %v3160_v7 = vpop.xlane.xlu1 %3159 }
0x14ef   :  { %7049 = vrcp.f32 %v3160_v7 }
0x14f1   :  { %v3169_v63 = vpop.xlane.xlu0 %3168 }
0x14f2   :  { %7051 = vrcp.f32 %v3169_v63 }
0x14f5   :  { %v3166_v39 = vpop.xlane.xlu1 %3165 }
0x14f6   :  { %7053 = vrcp.f32 %v3166_v39 }
0x14f8   :  { %v7048_v31 = vpop.eup %7047 }
0x14f9   :  { %v7050_v23 = vpop.eup %7049  ;;  %v3175_v27 = vpop.xlane.xlu0 %3174  ;;  %v3183_v60 = vmul.f32 %v7048_v31, %v8772_v11 }
0x14fa   :  { %v3172_v1 = vpop.xlane.xlu1 %3171  ;;  %7055 = vrcp.f32 %v3175_v27  ;;  %v3182_v20 = vmul.f32 %v7050_v23, %v8774_v21 }
0x14fb   :  { %7057 = vrcp.f32 %v3172_v1 }
0x14fc   :  { %6051 = vmatprep.mubr.msk.f32.mxu1 %vm648_vm3, %v3182_v20  ;;  %v7052_v26 = vpop.eup %7051 }
0x14fd   :  { %6052 = vmatmul.mubr.msk.f32.vlgmr.msra.gmra.mrb[54].mxu1 %vm648_vm3, %v3183_v60  ;;  %v3185_v21 = vmul.f32 %v7052_v26, %v8780_v48 }
0x14fe   :  { %6514 = vmatpush3.bf16.msra.mxu1 %v8799_v61 }
0x14ff   :  { %6516 = vmatprep.subr.bf16.mxu1 %v6515_v53 }
0x1500   :  { %v7054_v3 = vpop.eup %7053 }
0x1501   :  { %v3184_v57 = vmul.f32 %v7054_v3, %v8784_v6 }
0x1502   :  { %6518 = vmatpush3.bf16.msra.mxu1 %v6515_v53 }
0x1503   :  { %6520 = vmatprep.subr.bf16.mxu1 %v6519_v50  ;;  %6054 = vmatprep.mubr.msk.f32.mxu1 %vm648_vm3, %v3184_v57 }
0x1504   :  { %v7056_v11 = vpop.eup %7055  ;;  %6055 = vmatmul.mubr.msk.f32.gmra.mrb[56].mxu1 %vm648_vm3, %v3185_v21 }
0x1505   :  { %v7058_v49 = vpop.eup %7057  ;;  %v3521_v28 = vpop.xlane.xlu0 %3520  ;;  %v3187_v2 = vmul.f32 %v7056_v11, %v8792_v62 }
0x1506   :  { %7059 = vrcp.f32 %v3521_v28  ;;  %6522 = vmatpush3.bf16.msra.mxu1 %v6519_v50  ;;  %v3518_v61 = vpop.xlane.xlu1 %3517  ;;  %v3186_v55 = vmul.f32 %v7058_v49, %v8788_v59 }
0x1507   :  { %7061 = vrcp.f32 %v3518_v61 }
0x1508   :  { %6057 = vmatprep.mubr.msk.f32.mxu1 %vm648_vm3, %v3186_v55 }
0x1509   :  { %6058 = vmatmul.mubr.msk.f32.gmra.mrb[58].mxu1 %vm648_vm3, %v3187_v2  ;;  %v3527_v62 = vpop.xlane.xlu0 %3526 }
0x150a   :  { %7063 = vrcp.f32 %v3527_v62 }
0x150d   :  { %v3533_v7 = vpop.xlane.xlu0 %3532 }
0x1510   :  { %v7060_v48 = vpop.eup %7059 }
0x1511   :  { %v7062_v6 = vpop.eup %7061  ;;  %v3541_v46 = vmul.f32 %v7060_v48, %v8803_v30 }
0x1512   :  { %v3540_v41 = vmul.f32 %v7062_v6, %v8805_v19 }
0x1514   :  { %6093 = vmatprep.mubr.msk.f32.mxu1 %vm648_vm3, %v3540_v41  ;;  %v7064_v27 = vpop.eup %7063 }
0x1515   :  { %6094 = vmatmul.mubr.msk.f32.vlgmr.msra.gmra.mrb[60].mxu1 %vm648_vm3, %v3541_v46  ;;  %v3543_v17 = vmul.f32 %v7064_v27, %v8811_v12 }
0x153b   :  { %v3524_v63 = vpop.xlane.xlu1 %3523 }
0x153c   :  { %7065 = vrcp.f32 %v3524_v63 }
0x153d   :  { %7067 = vrcp.f32 %v3533_v7 }
0x153f   :  { %v3530_v59 = vpop.xlane.xlu0 %3529  ;;  %v6814_v39 = vpop.permute.xlu1 %6813 }
0x1540   :  { %7069 = vrcp.f32 %v3530_v59  ;;  %v6816_v23 = vunpack.i.h.bf16 %v6814_v39  ;;  %v6815_v18 = vunpack.i.l.bf16 %v6814_v39 }
0x1542   :  { %v6529_v60 = vpack.c.bf16 %v6816_v23, %v6815_v18 }
0x1543   :  { %v6809_v31 = vpop.permute.xlu0 %6808  ;;  %v6819_v53 = vpop.permute.xlu1 %6818 }
0x1544   :  { %v6811_v8 = vunpack.i.h.bf16 %v6809_v31  ;;  %v6810_v19 = vunpack.i.l.bf16 %v6809_v31  ;;  %v6821_v3 = vunpack.i.h.bf16 %v6819_v53  ;;  %v6820_v50 = vunpack.i.l.bf16 %v6819_v53 }
0x1546   :  { %v7066_v30 = vpop.eup %7065  ;;  %v6523_v1 = vpack.c.bf16 %v6811_v8, %v6810_v19  ;;  %v6535_v21 = vpack.c.bf16 %v6821_v3, %v6820_v50 }
0x1547   :  { %v3542_v20 = vmul.f32 %v7066_v30, %v8821_v40  ;;  %v7068_v42 = vpop.eup %7067  ;;  %v3738_v12 = vpop.permute.xlu1 %3737 }
0x1548   :  { %6525 = vmatprep.subr.msk.bf16.mxu1 %vm7616_vm2, %v6523_v1  ;;  %v3545_v57 = vmul.f32 %v7068_v42, %v8815_v32  ;;  %v3744_v32 = vpop.permute.xlu0 %3743 }
0x1549   :  { %6096 = vmatprep.mubr.msk.f32.mxu1 %vm648_vm3, %v3542_v20  ;;  %6528 = vmatpush3.bf16.xpose.msk.msra.mxu1 %vm7616_vm2, %v6523_v1 }
0x154a   :  { %v7070_v26 = vpop.eup %7069  ;;  %6097 = vmatmul.mubr.msk.f32.gmra.mrb[62].mxu1 %vm648_vm3, %v3543_v17  ;;  %6531 = vmatprep.subr.msk.bf16.mxu1 %vm7616_vm2, %v6529_v60 }
0x154b   :  { %v3544_v40 = vmul.f32 %v7070_v26, %v8825_v25  ;;  %v3740_v11 = vpop.permute.xlu1 %3739 }
0x154c   :  { %v3748_v28 = vpop.permute.xlu0 %3747 }
0x154d   :  { %6099 = vmatprep.mubr.msk.f32.mxu1 %vm648_vm3, %v3544_v40 }
0x154e   :  { %6100 = vmatmul.mubr.msk.f32.gmra.mrb[64].mxu1 %vm648_vm3, %v3545_v57 }
0x154f   :  { %6114 = vmatprep.mubr.msk.f32.mxu1 %vm522_vm1, %v3738_v12  ;;  %v3742_v25 = vpop.permute.xlu1 %3741 }
0x1551   :  { %6534 = vmatpush3.bf16.xpose.msk.msra.mxu1 %vm7616_vm2, %v6529_v60 }
0x1552   :  { %6537 = vmatprep.subr.msk.bf16.mxu1 %vm7616_vm2, %v6535_v21 }
0x1553   :  { %v3746_v49 = vpop.permute.xlu1 %3745 }
0x1559   :  { %6540 = vmatpush3.bf16.xpose.msk.msra.mxu1 %vm7616_vm2, %v6535_v21 }
0x1560   :  { %6115 = vmatmul.mubr.msk.f32.vlgmr.msra.gmra.mrb[66].mxu1 %vm522_vm1, %v3740_v11 }
0x1561   :  { %6117 = vmatprep.mubr.msk.f32.mxu1 %vm522_vm1, %v3742_v25 }
0x1564   :  { %6118 = vmatmul.mubr.msk.f32.gmra.mrb[68].mxu1 %vm522_vm1, %v3744_v32 }
0x1565   :  { %6120 = vmatprep.mubr.msk.f32.mxu1 %vm522_vm1, %v3746_v49 }
0x1568   :  { %6121 = vmatmul.mubr.msk.f32.gmra.mrb[70].mxu1 %vm522_vm1, %v3748_v28 }
0x15d0   :  { %v6053_v2 = vpop.f32.mrb[54].mxu1 }
0x15d1   :  { %3302 = vst.msk [vmem:[#allocation3 + $0x8] sm:$0xff] %vm522_vm1, %v6053_v2  ;;  %v3272_v61 = vpop.f32.mrb[55].mxu1 }
0x15d2   :  { %3301 = vst.msk [vmem:[#allocation3] sm:$0xff] %vm522_vm1, %v3272_v61 }
0x15d7   :  { %v6056_v55 = vpop.f32.mrb[56].mxu1 }
0x15d8   :  { %3304 = vst.msk [vmem:[#allocation3 + $0x18] sm:$0xff] %vm522_vm1, %v6056_v55  ;;  %v3282_v48 = vpop.f32.mrb[57].mxu1 }
0x15d9   :  { %3303 = vst.msk [vmem:[#allocation3 + $0x10] sm:$0xff] %vm522_vm1, %v3282_v48 }
0x15dc   :  { %v6059_v6 = vpop.f32.mrb[58].mxu1 }
0x15dd   :  { %3306 = vst.msk [vmem:[#allocation3 + $0x28] sm:$0xff] %vm522_vm1, %v6059_v6  ;;  %v3292_v41 = vpop.f32.mrb[59].mxu1 }
0x15de   :  { %3305 = vst.msk [vmem:[#allocation3 + $0x20] sm:$0xff] %vm522_vm1, %v3292_v41 }
0x15e8   :  { %v8896_v46 = vpop.f32.mrb[60].mxu1 }
0x15e9   :  { %v8898_v62 = vpop.f32.mrb[61].mxu1 }
0x161d   :  { %v8900_v7 = vpop.f32.mrb[62].mxu1 }
0x161e   :  { %v8902_v63 = vpop.f32.mrb[63].mxu1 }
0x1621   :  { %v8904_v59 = vpop.f32.mrb[64].mxu1 }
0x1622   :  { %v8906_v39 = vpop.f32.mrb[65].mxu1 }
0x1633   :  { %v6116_v31 = vpop.f32.mrb[66].mxu1 }
0x1634   :  { %v3863_v23 = vadd.f32 %v8697_v35, %v6116_v31  ;;  %v3857_v18 = vpop.f32.mrb[67].mxu1 }
0x1635   :  { %v3858_v8 = vadd.f32 %v8703_v9, %v3857_v18 }
0x1636   :  { %v3889_v19 = vsel %vm648_vm3, %v3863_v23, -inf }
0x1637   :  { %3890 = vmax.xlane.f32.xlu0 %v3889_v19  ;;  %v6119_v27 = vpop.f32.mrb[68].mxu1  ;;  %v3886_v30 = vsel %vm648_vm3, %v3858_v8, -inf }
0x1638   :  { %v3873_v1 = vadd.f32 %v8711_v33, %v6119_v27  ;;  %v3867_v20 = vpop.f32.mrb[69].mxu1  ;;  %3887 = vmax.xlane.f32.xlu1 %v3886_v30 }
0x1639   :  { %v3868_v60 = vadd.f32 %v8717_v38, %v3867_v20 }
0x163a   :  { %v3895_v53 = vsel %vm648_vm3, %v3873_v1, -inf }
0x163b   :  { %3896 = vmax.xlane.f32.xlu0 %v3895_v53  ;;  %v6122_v17 = vpop.f32.mrb[70].mxu1  ;;  %v3892_v3 = vsel %vm648_vm3, %v3868_v60, -inf }
0x163c   :  { %v3877_v42 = vpop.f32.mrb[71].mxu1  ;;  %v3883_v40 = vadd.f32 %v8730_v45, %v6122_v17 }
0x163d   :  { %v3878_v26 = vadd.f32 %v8724_v4, %v3877_v42 }
0x163e   :  { %v3901_v57 = vsel %vm648_vm3, %v3883_v40, -inf }
0x163f   :  { %3893 = vmax.xlane.f32.xlu0 %v3892_v3  ;;  %v3898_v50 = vsel %vm648_vm3, %v3878_v26, -inf }
0x1640   :  { %3899 = vmax.xlane.f32.xlu1 %v3898_v50 }
0x1643   :  { %3902 = vmax.xlane.f32.xlu0 %v3901_v57 }
0x1651   :  { %6823 = vrot.lane.b32.xlu1 %v8611_v52, %s7195_s28 }
0x1655   :  { %6833 = vrot.lane.b32.xlu1 %v8634_v13, %s7195_s28 }
0x1659   :  { %6828 = vrot.lane.b32.xlu0 %v8618_v51, %s7195_s28 }
0x16c4   :  { %v3891_v12 = vpop.xlane.xlu0 %3890 }
0x16c5   :  { %v3905_v21 = vsub.f32 %v3863_v23, %v3891_v12  ;;  %v3888_v11 = vpop.xlane.xlu1 %3887 }
0x16c6   :  { %v3904_v25 = vsub.f32 %v3858_v8, %v3888_v11 }
0x16c7   :  { %v3912_v32 = vmul.f32 1.442695, %v3905_v21 }
0x16c8   :  { %v3910_v49 = vmul.f32 1.442695, %v3904_v25  ;;  %v3897_v28 = vpop.xlane.xlu0 %3896 }
0x16c9   :  { %7071 = vpow2.f32 %v3912_v32  ;;  %v3907_v2 = vsub.f32 %v3873_v1, %v3897_v28 }
0x16ca   :  { %7073 = vpow2.f32 %v3910_v49 }
0x16cb   :  { %v3916_v61 = vmul.f32 1.442695, %v3907_v2 }
0x16cc   :  { %v3894_v55 = vpop.xlane.xlu0 %3893 }
0x16cd   :  { %7075 = vpow2.f32 %v3916_v61  ;;  %v3906_v52 = vsub.f32 %v3868_v60, %v3894_v55  ;;  %v3900_v48 = vpop.xlane.xlu1 %3899  ;;  %v4119_v61 = vld [vmem:[#allocation2] sm:$0xff] }
0x16ce   :  { %v3908_v13 = vsub.f32 %v3878_v26, %v3900_v48  ;;  %v4125_v55 = vmul.f32 0.25, %v4119_v61 }
0x16cf   :  { %v3914_v6 = vmul.f32 1.442695, %v3906_v52  ;;  %v6837_v52 = vpack.i.bf16 %v8596_v24, %v4119_v61 }
0x16d0   :  { %v3903_v41 = vpop.xlane.xlu0 %3902  ;;  %v3918_v19 = vmul.f32 1.442695, %v3908_v13 }
0x16d1   :  { %7077 = vpow2.f32 %v3914_v6  ;;  %v3909_v51 = vsub.f32 %v3883_v40, %v3903_v41  ;;  %v6824_v31 = vpop.permute.xlu1 %6823 }
0x16d2   :  { %v6826_v23 = vunpack.i.h.bf16 %v6824_v31  ;;  %v6825_v18 = vunpack.i.l.bf16 %v6824_v31 }
0x16d3   :  { %v7072_v8 = vpop.eup %7071  ;;  %v3920_v27 = vmul.f32 1.442695, %v3909_v51 }
0x16d4   :  { %v7074_v30 = vpop.eup %7073  ;;  %v6541_v20 = vpack.c.bf16 %v6826_v23, %v6825_v18  ;;  %v6829_v1 = vpop.permute.xlu0 %6828  ;;  %v3925_v53 = vsel %vm648_vm3, %v7072_v8, 0.0 }
0x16d5   :  { %7079 = vpow2.f32 %v3920_v27  ;;  %v6831_v17 = vunpack.i.h.bf16 %v6829_v1  ;;  %v6830_v60 = vunpack.i.l.bf16 %v6829_v1  ;;  %3926 = vadd.xlane.f32.xlu0 %v3925_v53  ;;  %v6834_v42 = vpop.permute.xlu1 %6833  ;;  %v3922_v26 = vsel %vm648_vm3, %v7074_v30, 0.0 }
0x16d6   :  { %v6836_v3 = vunpack.i.h.bf16 %v6834_v42  ;;  %v6835_v40 = vunpack.i.l.bf16 %v6834_v42  ;;  %3923 = vadd.xlane.f32.xlu1 %v3922_v26  ;;  %6542 = vmatprep.subr.bf16.mxu0 %v6541_v20  ;;  %7081 = vpow2.f32 %v3918_v19 }
0x16d7   :  { %v7076_v50 = vpop.eup %7075  ;;  %v6545_v57 = vpack.c.bf16 %v6831_v17, %v6830_v60  ;;  %6544 = vmatpush3.bf16.msra.mxu0 %v6541_v20 }
0x16d8   :  { %v3931_v12 = vsel %vm648_vm3, %v7076_v50, 0.0  ;;  %v6549_v21 = vpack.c.bf16 %v6836_v3, %v6835_v40 }
0x16d9   :  { %3932 = vadd.xlane.f32.xlu0 %v3931_v12  ;;  %6546 = vmatprep.subr.bf16.mxu0 %v6545_v57 }
0x16db   :  { %v7078_v11 = vpop.eup %7077  ;;  %6548 = vmatpush3.bf16.msra.mxu0 %v6545_v57 }
0x16dc   :  { %6550 = vmatprep.subr.bf16.mxu0 %v6549_v21  ;;  %v3928_v25 = vsel %vm648_vm3, %v7078_v11, 0.0 }
0x16dd   :  { %3929 = vadd.xlane.f32.xlu1 %v3928_v25 }
0x16df   :  { %v7080_v32 = vpop.eup %7079  ;;  %6552 = vmatpush3.bf16.msra.mxu0 %v6549_v21 }
0x16e0   :  { %v3937_v49 = vsel %vm648_vm3, %v7080_v32, 0.0  ;;  %v7082_v28 = vpop.eup %7081 }
0x16e1   :  { %3938 = vadd.xlane.f32.xlu0 %v3937_v49  ;;  %v3934_v2 = vsel %vm648_vm3, %v7082_v28, 0.0 }
0x16e5   :  { %3935 = vadd.xlane.f32.xlu0 %v3934_v2 }
0x16ee   :  { %6843 = vrot.lane.b32.xlu1 %v8608_v58, %s9459_s3 }
0x16f2   :  { %6848 = vrot.lane.b32.xlu1 %v8616_v16, %s9459_s3 }
0x16f6   :  { %4143 = vrot.lane.b32.xlu1 %v4125_v55, %s9460_s26 }
0x16fa   :  { %4145 = vrot.lane.b32.xlu1 %v8626_v29, %s9460_s26 }
0x16fb   :  { %6838 = vrot.lane.b32.xlu0 %v6837_v52, %s9459_s3 }
0x16fe   :  { %4147 = vrot.lane.b32.xlu1 %v8646_v47, %s9460_s26 }
0x16ff   :  { %4149 = vrot.lane.b32.xlu0 %v8632_v34, %s9460_s26 }
0x1702   :  { %4151 = vrot.lane.b32.xlu1 %v8650_v54, %s9460_s26 }
0x1703   :  { %4153 = vrot.lane.b32.xlu0 %v8640_v43, %s9460_s26 }
0x1762   :  { %v3927_v58 = vpop.xlane.xlu0 %3926 }
0x1763   :  { %7083 = vrcp.f32 %v3927_v58  ;;  %v3924_v24 = vpop.xlane.xlu1 %3923 }
0x1764   :  { %7085 = vrcp.f32 %v3924_v24 }
0x1766   :  { %v3933_v16 = vpop.xlane.xlu0 %3932 }
0x1767   :  { %7087 = vrcp.f32 %v3933_v16 }
0x176a   :  { %v3930_v29 = vpop.xlane.xlu1 %3929 }
0x176b   :  { %7089 = vrcp.f32 %v3930_v29 }
0x176d   :  { %v7084_v48 = vpop.eup %7083 }
0x176e   :  { %v7086_v6 = vpop.eup %7085  ;;  %v3939_v47 = vpop.xlane.xlu0 %3938  ;;  %v3947_v41 = vmul.f32 %v7084_v48, %v7072_v8 }
0x176f   :  { %v3946_v13 = vmul.f32 %v7086_v6, %v7074_v30  ;;  %7091 = vrcp.f32 %v3939_v47  ;;  %v6844_v43 = vpop.permute.xlu1 %6843 }
0x1770   :  { %v6846_v31 = vunpack.i.h.bf16 %v6844_v43  ;;  %v6845_v19 = vunpack.i.l.bf16 %v6844_v43 }
0x1771   :  { %6135 = vmatprep.mubr.msk.f32.mxu0 %vm648_vm3, %v3946_v13  ;;  %v7088_v54 = vpop.eup %7087 }
0x1772   :  { %v3936_v34 = vpop.xlane.xlu0 %3935  ;;  %6136 = vmatmul.mubr.msk.f32.vlgmr.msra.gmra.mrb[72].mxu0 %vm648_vm3, %v3947_v41  ;;  %v3949_v1 = vmul.f32 %v7088_v54, %v7076_v50  ;;  %v6559_v30 = vpack.c.bf16 %v6846_v31, %v6845_v19 }
0x1773   :  { %7093 = vrcp.f32 %v3936_v34  ;;  %v6849_v53 = vpop.permute.xlu1 %6848 }
0x1774   :  { %v6851_v26 = vunpack.i.h.bf16 %v6849_v53  ;;  %v6850_v3 = vunpack.i.l.bf16 %v6849_v53 }
0x1775   :  { %v7090_v51 = vpop.eup %7089 }
0x1776   :  { %v6839_v23 = vpop.permute.xlu0 %6838  ;;  %v3948_v18 = vmul.f32 %v7090_v51, %v7078_v11  ;;  %v6565_v57 = vpack.c.bf16 %v6851_v26, %v6850_v3  ;;  %v4131_v51 = vld [vmem:[#allocation2 + $0x8] sm:$0xff] }
0x1777   :  { %v6841_v27 = vunpack.i.h.bf16 %v6839_v23  ;;  %v6840_v20 = vunpack.i.l.bf16 %v6839_v23  ;;  %v4144_v50 = vpop.permute.xlu1 %4143 }
0x1778   :  { %6138 = vmatprep.mubr.msk.f32.mxu0 %vm648_vm3, %v3948_v18 }
0x1779   :  { %v6553_v8 = vpack.c.bf16 %v6841_v27, %v6840_v20  ;;  %6139 = vmatmul.mubr.msk.f32.gmra.mrb[74].mxu0 %vm648_vm3, %v3949_v1  ;;  %v7092_v17 = vpop.eup %7091 }
0x177a   :  { %v3951_v40 = vmul.f32 %v7092_v17, %v7080_v32  ;;  %v4150_v11 = vpop.permute.xlu0 %4149 }
0x177b   :  { %6555 = vmatprep.subr.msk.bf16.mxu0 %vm7616_vm2, %v6553_v8  ;;  %v4146_v12 = vpop.permute.xlu1 %4145 }
0x177c   :  { %6558 = vmatpush3.bf16.xpose.msk.msra.mxu0 %vm7616_vm2, %v6553_v8 }
0x177d   :  { %v7094_v60 = vpop.eup %7093  ;;  %6561 = vmatprep.subr.msk.bf16.mxu0 %vm7616_vm2, %v6559_v30 }
0x177e   :  { %v3950_v42 = vmul.f32 %v7094_v60, %v7082_v28  ;;  %v4154_v32 = vpop.permute.xlu0 %4153 }
0x177f   :  { %v4148_v21 = vpop.permute.xlu1 %4147 }
0x1780   :  { %6141 = vmatprep.mubr.msk.f32.mxu0 %vm648_vm3, %v3950_v42 }
0x1781   :  { %6142 = vmatmul.mubr.msk.f32.gmra.mrb[76].mxu0 %vm648_vm3, %v3951_v40 }
0x1782   :  { %6156 = vmatprep.mubr.msk.f32.mxu0 %vm522_vm1, %v4144_v50 }
0x1783   :  { %v4152_v25 = vpop.permute.xlu1 %4151 }
0x1784   :  { %6564 = vmatpush3.bf16.xpose.msk.msra.mxu0 %vm7616_vm2, %v6559_v30 }
0x1785   :  { %6567 = vmatprep.subr.msk.bf16.mxu0 %vm7616_vm2, %v6565_v57 }
0x178c   :  { %6570 = vmatpush3.bf16.xpose.msk.msra.mxu0 %vm7616_vm2, %v6565_v57 }
0x1793   :  { %6157 = vmatmul.mubr.msk.f32.vlgmr.msra.gmra.mrb[78].mxu0 %vm522_vm1, %v4146_v12 }
0x1794   :  { %6159 = vmatprep.mubr.msk.f32.mxu0 %vm522_vm1, %v4148_v21 }
0x1797   :  { %6160 = vmatmul.mubr.msk.f32.gmra.mrb[80].mxu0 %vm522_vm1, %v4150_v11 }
0x1798   :  { %6162 = vmatprep.mubr.msk.f32.mxu0 %vm522_vm1, %v4152_v25 }
0x179b   :  { %6163 = vmatmul.mubr.msk.f32.gmra.mrb[82].mxu0 %vm522_vm1, %v4154_v32 }
0x179c   :  { %4885 = vmatprep.mubr.f32.mxu0 %v7190_v10 }
0x1845   :  { %v8974_v49 = vpop.f32.mrb[72].mxu0 }
0x1846   :  { %v8976_v44 = vpop.f32.mrb[73].mxu0 }
0x184c   :  { %v8978_v28 = vpop.f32.mrb[74].mxu0 }
0x184d   :  { %v8980_v2 = vpop.f32.mrb[75].mxu0 }
0x1854   :  { %v8982_v61 = vpop.f32.mrb[76].mxu0 }
0x1855   :  { %v8984_v55 = vpop.f32.mrb[77].mxu0 }
0x1866   :  { %v6158_v52 = vpop.f32.mrb[78].mxu0 }
0x1867   :  { %v4269_v58 = vadd.f32 %v8697_v35, %v6158_v52  ;;  %v4263_v24 = vpop.f32.mrb[79].mxu0  ;;  %v4136_v52 = vld [vmem:[#allocation2 + $0x58] sm:$0xff] }
0x1868   :  { %v4264_v16 = vadd.f32 %v8703_v9, %v4263_v24  ;;  %v4132_v9 = vld [vmem:[#allocation2 + $0x18] sm:$0xff] }
0x1869   :  { %v4295_v29 = vsel %vm648_vm3, %v4269_v58, -inf  ;;  %v6852_v31 = vpack.i.bf16 %v4132_v9, %v4131_v51 }
0x186a   :  { %4296 = vmax.xlane.f32.xlu0 %v4295_v29  ;;  %v6161_v48 = vpop.f32.mrb[80].mxu0  ;;  %v4292_v6 = vsel %vm648_vm3, %v4264_v16, -inf  ;;  %v4133_v29 = vld [vmem:[#allocation2 + $0x28] sm:$0xff] }
0x186b   :  { %v4273_v47 = vpop.f32.mrb[81].mxu0  ;;  %4293 = vmax.xlane.f32.xlu1 %v4292_v6  ;;  %v4279_v41 = vadd.f32 %v8711_v33, %v6161_v48 }
0x186c   :  { %v4274_v13 = vadd.f32 %v8717_v38, %v4273_v47 }
0x186d   :  { %v4301_v35 = vsel %vm648_vm3, %v4279_v41, -inf }
0x186e   :  { %v6164_v34 = vpop.f32.mrb[82].mxu0  ;;  %v4298_v43 = vsel %vm648_vm3, %v4274_v13, -inf }
0x186f   :  { %v4283_v54 = vpop.f32.mrb[83].mxu0  ;;  %4299 = vmax.xlane.f32.xlu0 %v4298_v43  ;;  %v4289_v47 = vadd.f32 %v8730_v45, %v6164_v34 }
0x1870   :  { %v4284_v6 = vadd.f32 %v8724_v4, %v4283_v54 }
0x1873   :  { %4302 = vmax.xlane.f32.xlu0 %v4301_v35 }
0x187c   :  { %6853 = vrot.lane.b32.xlu1 %v6852_v31, %s9460_s26 }
0x18f7   :  { %v4297_v23 = vpop.xlane.xlu0 %4296 }
0x18f8   :  { %v4311_v18 = vsub.f32 %v4269_v58, %v4297_v23  ;;  %v4294_v19 = vpop.xlane.xlu1 %4293  ;;  %v4135_v58 = vld [vmem:[#allocation2 + $0x48] sm:$0xff] }
0x18f9   :  { %v4310_v27 = vsub.f32 %v4264_v16, %v4294_v19  ;;  %v6862_v24 = vpack.i.bf16 %v4136_v52, %v4135_v58  ;;  %v4134_v16 = vld [vmem:[#allocation2 + $0x38] sm:$0xff] }
0x18fa   :  { %v4318_v38 = vmul.f32 1.442695, %v4311_v18  ;;  %v6857_v48 = vpack.i.bf16 %v4134_v16, %v4133_v29  ;;  %v5431_v16 = vld [vmem:[%s9433_s8 + $0x68] sm:$0xff] }
0x18fb   :  { %v4316_v20 = vmul.f32 1.442695, %v4310_v27 }
0x18fc   :  { %7095 = vpow2.f32 %v4318_v38  ;;  %v4300_v33 = vpop.xlane.xlu0 %4299  ;;  %v6854_v1 = vpop.permute.xlu1 %6853 }
0x18fd   :  { %7097 = vpow2.f32 %v4316_v20  ;;  %v4312_v8 = vsub.f32 %v4274_v13, %v4300_v33  ;;  %v6856_v30 = vunpack.i.h.bf16 %v6854_v1  ;;  %v6855_v53 = vunpack.i.l.bf16 %v6854_v1 }
0x18fe   :  { %v4304_v13 = vsel %vm648_vm3, %v4284_v6, -inf }
0x18ff   :  { %v4320_v17 = vmul.f32 1.442695, %v4312_v8  ;;  %v6571_v60 = vpack.c.bf16 %v6856_v30, %v6855_v53 }
0x1900   :  { %v4303_v42 = vpop.xlane.xlu0 %4302 }
0x1901   :  { %7099 = vpow2.f32 %v4320_v17  ;;  %v4313_v26 = vsub.f32 %v4279_v41, %v4303_v42  ;;  %6572 = vmatprep.subr.bf16.mxu1 %v6571_v60  ;;  %v4307_v41 = vsel %vm648_vm3, %v4289_v47, -inf }
0x1902   :  { %6574 = vmatpush3.bf16.msra.mxu1 %v6571_v60 }
0x1903   :  { %v4322_v3 = vmul.f32 1.442695, %v4313_v26 }
0x1905   :  { %7101 = vpow2.f32 %v4322_v3 }
0x1906   :  { %v7096_v40 = vpop.eup %7095 }
0x1907   :  { %v7098_v50 = vpop.eup %7097  ;;  %v4331_v57 = vsel %vm648_vm3, %v7096_v40, 0.0 }
0x1908   :  { %4332 = vadd.xlane.f32.xlu0 %v4331_v57  ;;  %v4328_v12 = vsel %vm648_vm3, %v7098_v50, 0.0 }
0x1909   :  { %4329 = vadd.xlane.f32.xlu1 %v4328_v12 }
0x190b   :  { %v7100_v21 = vpop.eup %7099 }
0x190c   :  { %v4334_v11 = vsel %vm648_vm3, %v7100_v21, 0.0 }
0x190d   :  { %4335 = vadd.xlane.f32.xlu1 %v4334_v11  ;;  %v5426_v11 = vld [vmem:[%s9433_s8 + $0x40] sm:$0xff] }
0x190f   :  { %v7102_v25 = vpop.eup %7101 }
0x1910   :  { %v4337_v32 = vsel %vm648_vm3, %v7102_v25, 0.0 }
0x1911   :  { %4338 = vadd.xlane.f32.xlu0 %v4337_v32 }
0x191e   :  { %6863 = vrot.lane.b32.xlu1 %v6862_v24, %s9460_s26  ;;  %v5430_v24 = vld [vmem:[%s9433_s8 + $0x60] sm:$0xff] }
0x1927   :  { %6858 = vrot.lane.b32.xlu0 %v6857_v48, %s9460_s26  ;;  %v6591_v48 = vpack.c.bf16 %v5431_v16, %v5430_v24 }
0x1942   :  { %4305 = vmax.xlane.f32.xlu1 %v4304_v13  ;;  %v5432_v13 = vld [vmem:[%s9433_s8 + $0x70] sm:$0xff] }
0x1946   :  { %4308 = vmax.xlane.f32.xlu0 %v4307_v41  ;;  %v5433_v41 = vld [vmem:[%s9433_s8 + $0x78] sm:$0xff] }
0x1995   :  { %v4333_v35 = vpop.xlane.xlu0 %4332 }
0x1996   :  { %v4330_v43 = vpop.xlane.xlu1 %4329 }
0x1997   :  { %7103 = vrcp.f32 %v4330_v43 }
0x1998   :  { %7105 = vrcp.f32 %v4333_v35  ;;  %v6595_v35 = vpack.c.bf16 %v5433_v41, %v5432_v13 }
0x199a   :  { %v4336_v9 = vpop.xlane.xlu1 %4335 }
0x199b   :  { %7107 = vrcp.f32 %v4336_v9 }
0x199e   :  { %v4339_v51 = vpop.xlane.xlu0 %4338  ;;  %v6864_v31 = vpop.permute.xlu1 %6863 }
0x199f   :  { %v6866_v4 = vunpack.i.h.bf16 %v6864_v31  ;;  %v6865_v54 = vunpack.i.l.bf16 %v6864_v31  ;;  %7109 = vrcp.f32 %v4339_v51 }
0x19a1   :  { %v7104_v23 = vpop.eup %7103  ;;  %v6579_v38 = vpack.c.bf16 %v6866_v4, %v6865_v54 }
0x19a2   :  { %v6859_v18 = vpop.permute.xlu0 %6858  ;;  %v4352_v19 = vmul.f32 %v7104_v23, %v7098_v50  ;;  %v7106_v20 = vpop.eup %7105 }
0x19a3   :  { %v6861_v45 = vunpack.i.h.bf16 %v6859_v18  ;;  %v6860_v34 = vunpack.i.l.bf16 %v6859_v18  ;;  %v4353_v1 = vmul.f32 %v7106_v20, %v7096_v40 }
0x19a4   :  { %6177 = vmatprep.mubr.msk.f32.mxu1 %vm648_vm3, %v4352_v19 }
0x19a5   :  { %v6575_v27 = vpack.c.bf16 %v6861_v45, %v6860_v34  ;;  %v7108_v33 = vpop.eup %7107 }
0x19a6   :  { %v4354_v30 = vmul.f32 %v7108_v33, %v7100_v21 }
0x19a7   :  { %6576 = vmatprep.subr.bf16.mxu1 %v6575_v27 }
0x19a8   :  { %6578 = vmatpush3.bf16.msra.mxu1 %v6575_v27 }
0x19a9   :  { %6580 = vmatprep.subr.bf16.mxu1 %v6579_v38  ;;  %v7110_v8 = vpop.eup %7109 }
0x19aa   :  { %v4355_v53 = vmul.f32 %v7110_v8, %v7102_v25 }
0x19ac   :  { %6582 = vmatpush3.bf16.msra.mxu1 %v6579_v38 }
0x19af   :  { %6178 = vmatmul.mubr.msk.f32.vlgmr.msra.gmra.mrb[72].mxu1 %vm648_vm3, %v4353_v1 }
0x19b0   :  { %6180 = vmatprep.mubr.msk.f32.mxu1 %vm648_vm3, %v4354_v30 }
0x19b3   :  { %6181 = vmatmul.mubr.msk.f32.gmra.mrb[74].mxu1 %vm648_vm3, %v4355_v53 }
0x19cf   :  { %v4306_v17 = vpop.xlane.xlu1 %4305 }
0x19d0   :  { %v4314_v60 = vsub.f32 %v4284_v6, %v4306_v17 }
0x19d2   :  { %v4324_v42 = vmul.f32 1.442695, %v4314_v60 }
0x19d3   :  { %v4309_v26 = vpop.xlane.xlu0 %4308 }
0x19d4   :  { %7111 = vpow2.f32 %v4324_v42  ;;  %v4315_v3 = vsub.f32 %v4289_v47, %v4309_v26  ;;  %v9094_v26 = vld [vmem:[%s9434_s9 + $0x1] ss:$0 sm:$0xff] }
0x19d6   :  { %v4326_v50 = vmul.f32 1.442695, %v4315_v3 }
0x19d8   :  { %7113 = vpow2.f32 %v4326_v50 }
0x19de   :  { %v7112_v57 = vpop.eup %7111 }
0x19df   :  { %v4340_v40 = vsel %vm648_vm3, %v7112_v57, 0.0 }
0x19e0   :  { %4341 = vadd.xlane.f32.xlu0 %v4340_v40 }
0x19e2   :  { %v7114_v12 = vpop.eup %7113 }
0x19e3   :  { %v4343_v21 = vsel %vm648_vm3, %v7114_v12, 0.0 }
0x19e4   :  { %4344 = vadd.xlane.f32.xlu1 %v4343_v21 }
0x19f5   :  { %3691 = vrot.lane.b32.xlu1 %v8896_v46, %s9459_s3  ;;  %v5427_v46 = vld [vmem:[%s9433_s8 + $0x48] sm:$0xff] }
0x19f6   :  { %3689 = vrot.lane.b32.xlu0 %v8898_v62, %s9459_s3  ;;  %v5428_v62 = vld [vmem:[%s9433_s8 + $0x50] sm:$0xff] }
0x19f9   :  { %4095 = vrot.lane.b32.xlu1 %v8976_v44, %s7193_s25  ;;  %v6583_v44 = vpack.c.bf16 %v5427_v46, %v5426_v11 }
0x19fa   :  { %3693 = vrot.lane.b32.xlu0 %v8902_v63, %s9459_s3  ;;  %v5429_v63 = vld [vmem:[%s9433_s8 + $0x58] sm:$0xff] }
0x19fb   :  { %6584 = vmatprep.subr.bf16.mxu1 %v6583_v44 }
0x19fc   :  { %6586 = vmatpush3.bf16.msra.mxu1 %v6583_v44 }
0x19fd   :  { %4097 = vrot.lane.b32.xlu1 %v8974_v49, %s7193_s25  ;;  %v6587_v49 = vpack.c.bf16 %v5429_v63, %v5428_v62 }
0x19ff   :  { %6588 = vmatprep.subr.bf16.mxu1 %v6587_v49 }
0x1a00   :  { %6590 = vmatpush3.bf16.msra.mxu1 %v6587_v49 }
0x1a01   :  { %3695 = vrot.lane.b32.xlu1 %v8900_v7, %s9459_s3  ;;  %6592 = vmatprep.subr.bf16.mxu1 %v6591_v48 }
0x1a04   :  { %6594 = vmatpush3.bf16.msra.mxu1 %v6591_v48 }
0x1a05   :  { %6596 = vmatprep.subr.bf16.mxu1 %v6595_v35 }
0x1a08   :  { %6598 = vmatpush3.bf16.msra.mxu1 %v6595_v35 }
0x1a6d   :  { %v4342_v7 = vpop.xlane.xlu0 %4341 }
0x1a6e   :  { %7115 = vrcp.f32 %v4342_v7 }
0x1a71   :  { %v3690_v25 = vpop.permute.xlu0 %3689  ;;  %v4345_v32 = vpop.xlane.xlu1 %4344 }
0x1a72   :  { %3707 = vst.msk [vmem:[#allocation3] sm:$0xff] %vm1234_vm4, %v3690_v25  ;;  %7117 = vrcp.f32 %v4345_v32 }
0x1a75   :  { %v3694_v52 = vpop.permute.xlu0 %3693  ;;  %v3692_v58 = vpop.permute.xlu1 %3691 }
0x1a76   :  { %3709 = vst.msk [vmem:[#allocation3 + $0x10] sm:$0xff] %vm1234_vm4, %v3694_v52  ;;  %3708 = vst.msk [vmem:[#allocation3 + $0x8] sm:$0xff] %vm1234_vm4, %v3692_v58 }
0x1a78   :  { %v7116_v29 = vpop.eup %7115 }
0x1a79   :  { %v4096_v6 = vpop.permute.xlu1 %4095  ;;  %v4356_v47 = vmul.f32 %v7116_v29, %v7112_v57 }
0x1a7a   :  { %4113 = vst.msk [vmem:[#allocation3] sm:$0xff] %vm1641_vm5, %v4096_v6 }
0x1a7b   :  { %6183 = vmatprep.mubr.msk.f32.mxu1 %vm648_vm3, %v4356_v47 }
0x1a7c   :  { %v7118_v43 = vpop.eup %7117 }
0x1a7d   :  { %v4098_v9 = vpop.permute.xlu1 %4097  ;;  %v4357_v51 = vmul.f32 %v7118_v43, %v7114_v12 }
0x1a7e   :  { %4114 = vst.msk [vmem:[#allocation3 + $0x8] sm:$0xff] %vm1641_vm5, %v4098_v9 }
0x1a7f   :  { %6184 = vmatmul.mubr.msk.f32.gmra.mrb[76].mxu1 %vm648_vm3, %v4357_v51 }
0x1a81   :  { %v3696_v31 = vpop.permute.xlu1 %3695 }
0x1a82   :  { %3710 = vst.msk [vmem:[#allocation3 + $0x18] sm:$0xff] %vm1234_vm4, %v3696_v31  ;;  %v6179_v23 = vpop.f32.mrb[72].mxu1 }
0x1a83   :  { %4503 = vrot.lane.b32.xlu1 %v6179_v23, %s7192_s24  ;;  %v4466_v18 = vpop.f32.mrb[73].mxu1 }
0x1a84   :  { %4501 = vrot.lane.b32.xlu0 %v4466_v18, %s7192_s24 }
0x1a86   :  { %v6182_v19 = vpop.f32.mrb[74].mxu1 }
0x1a87   :  { %4101 = vrot.lane.b32.xlu1 %v8978_v28, %s7193_s25  ;;  %v4476_v4 = vpop.f32.mrb[75].mxu1 }
0x1a88   :  { %4099 = vrot.lane.b32.xlu0 %v8980_v2, %s7193_s25 }
0x1a8b   :  { %4507 = vrot.lane.b32.xlu1 %v6182_v19, %s7192_s24  ;;  %v5447_v19 = vld [vmem:[%s9437_s12 + $0x88] sm:$0xff] }
0x1a8c   :  { %4505 = vrot.lane.b32.xlu0 %v4476_v4, %s7192_s24  ;;  %v5449_v4 = vld [vmem:[%s9437_s12 + $0x98] sm:$0xff] }
0x1a8f   :  { %3699 = vrot.lane.b32.xlu1 %v8904_v59, %s9459_s3 }
0x1a90   :  { %3697 = vrot.lane.b32.xlu0 %v8906_v39, %s9459_s3 }
0x1a93   :  { %4105 = vrot.lane.b32.xlu1 %v8982_v61, %s7193_s25 }
0x1a94   :  { %4103 = vrot.lane.b32.xlu0 %v8984_v55, %s7193_s25 }
0x1af5   :  { %v4504_v28 = vpop.permute.xlu1 %4503 }
0x1af6   :  { %4520 = vst.msk [vmem:[#allocation3 + $0x8] sm:$0xff] %vm2048_vm6, %v4504_v28  ;;  %v4502_v2 = vpop.permute.xlu0 %4501  ;;  %v6599_v28 = vpack.c.bf16 %v5449_v4, %v5447_v19 }
0x1af7   :  { %4519 = vst.msk [vmem:[#allocation3] sm:$0xff] %vm2048_vm6, %v4502_v2  ;;  %v5446_v2 = vld [vmem:[%s9437_s12 + $0x80] sm:$0xff] }
0x1af8   :  { %6600 = vmatprep.subr.bf16.mxu0 %v6599_v28 }
0x1af9   :  { %v4102_v54 = vpop.permute.xlu1 %4101 }
0x1afa   :  { %4116 = vst.msk [vmem:[#allocation3 + $0x18] sm:$0xff] %vm1641_vm5, %v4102_v54  ;;  %v4100_v45 = vpop.permute.xlu0 %4099  ;;  %v5448_v54 = vld [vmem:[%s9437_s12 + $0x90] sm:$0xff] }
0x1afb   :  { %4115 = vst.msk [vmem:[#allocation3 + $0x10] sm:$0xff] %vm1641_vm5, %v4100_v45  ;;  %v6601_v45 = vpack.c.bf16 %v5448_v54, %v5446_v2 }
0x1afd   :  { %v4508_v59 = vpop.permute.xlu1 %4507  ;;  %v4526_v55 = vld [vmem:[#allocation3 + $0x8] sm:$0xff]  ;;  %6602 = vmatpush1.bf16.msra.mxu0 %v6601_v45 }
0x1afe   :  { %4522 = vst.msk [vmem:[#allocation3 + $0x18] sm:$0xff] %vm2048_vm6, %v4508_v59  ;;  %v4506_v39 = vpop.permute.xlu0 %4505  ;;  %v4525_v61 = vld [vmem:[#allocation3] sm:$0xff]  ;;  %v5451_v59 = vld [vmem:[%s9437_s12 + $0xa8] sm:$0xff] }
0x1aff   :  { %4521 = vst.msk [vmem:[#allocation3 + $0x10] sm:$0xff] %vm2048_vm6, %v4506_v39  ;;  %6202 = vmatprep.mubr.msk.f32.mxu1 %vm102_vm0, %v4525_v61  ;;  %v5453_v39 = vld [vmem:[%s9437_s12 + $0xb8] sm:$0xff] }
0x1b00   :  { %6203 = vmatmul.mubr.msk.f32.vlgmr.msra.gmra.mrb[78].mxu1 %vm102_vm0, %v4526_v55  ;;  %v6603_v61 = vpack.c.bf16 %v5453_v39, %v5451_v59  ;;  %v5450_v55 = vld [vmem:[%s9437_s12 + $0xa0] sm:$0xff] }
0x1b01   :  { %v3700_v34 = vpop.permute.xlu1 %3699 }
0x1b02   :  { %3712 = vst.msk [vmem:[#allocation3 + $0x28] sm:$0xff] %vm1234_vm4, %v3700_v34  ;;  %v3698_v27 = vpop.permute.xlu0 %3697  ;;  %v5452_v34 = vld [vmem:[%s9437_s12 + $0xb0] sm:$0xff]  ;;  %6604 = vmatprep.subr.bf16.mxu0 %v6603_v61 }
0x1b03   :  { %3711 = vst.msk [vmem:[#allocation3 + $0x20] sm:$0xff] %vm1234_vm4, %v3698_v27  ;;  %v6605_v27 = vpack.c.bf16 %v5452_v34, %v5450_v55 }
0x1b05   :  { %v4106_v38 = vpop.permute.xlu1 %4105  ;;  %v4528_v1 = vld [vmem:[#allocation3 + $0x18] sm:$0xff]  ;;  %6606 = vmatpush1.bf16.msra.mxu0 %v6605_v27 }
0x1b06   :  { %4118 = vst.msk [vmem:[#allocation3 + $0x28] sm:$0xff] %vm1641_vm5, %v4106_v38  ;;  %v4104_v20 = vpop.permute.xlu0 %4103  ;;  %v4527_v33 = vld [vmem:[#allocation3 + $0x10] sm:$0xff]  ;;  %v5455_v38 = vld [vmem:[%s9437_s12 + $0xc8] sm:$0xff] }
0x1b07   :  { %4117 = vst.msk [vmem:[#allocation3 + $0x20] sm:$0xff] %vm1641_vm5, %v4104_v20  ;;  %6205 = vmatprep.mubr.msk.f32.mxu1 %vm102_vm0, %v4527_v33  ;;  %v5457_v20 = vld [vmem:[%s9437_s12 + $0xd8] sm:$0xff] }
0x1b08   :  { %6206 = vmatmul.mubr.msk.f32.gmra.mrb[80].mxu1 %vm102_vm0, %v4528_v1  ;;  %v6607_v33 = vpack.c.bf16 %v5457_v20, %v5455_v38  ;;  %v5454_v1 = vld [vmem:[%s9437_s12 + $0xc0] sm:$0xff] }
0x1b09   :  { %v5485_v20 = vld [vmem:[%s9439_s14 + $0x180] sm:$0xff] }
0x1b0a   :  { %6608 = vmatprep.subr.bf16.mxu0 %v6607_v33  ;;  %v5486_v33 = vld [vmem:[%s9439_s14 + $0x188] sm:$0xff] }
0x1b52   :  { %v6185_v8 = vpop.f32.mrb[76].mxu1 }
0x1b53   :  { %4511 = vrot.lane.b32.xlu1 %v6185_v8, %s7192_s24  ;;  %v4486_v30 = vpop.f32.mrb[77].mxu1  ;;  %v5456_v8 = vld [vmem:[%s9437_s12 + $0xd0] sm:$0xff] }
0x1b54   :  { %4509 = vrot.lane.b32.xlu0 %v4486_v30, %s7192_s24  ;;  %v6609_v30 = vpack.c.bf16 %v5456_v8, %v5454_v1  ;;  %v5469_v1 = vld [vmem:[%s9439_s14 + $0x100] sm:$0xff]  ;;  %v6615_v8 = vpack.c.bf16 %v5486_v33, %v5485_v20 }
0x1b56   :  { %6610 = vmatpush1.bf16.msra.mxu0 %v6609_v30  ;;  %v5470_v30 = vld [vmem:[%s9439_s14 + $0x108] sm:$0xff]  ;;  %6616 = vmatprep.subr.bf16.mxu1 %v6615_v8 }
0x1bc5   :  { %v4512_v53 = vpop.permute.xlu1 %4511 }
0x1bc6   :  { %4524 = vst.msk [vmem:[#allocation3 + $0x28] sm:$0xff] %vm2048_vm6, %v4512_v53  ;;  %v4510_v17 = vpop.permute.xlu0 %4509  ;;  %v5459_v53 = vld [vmem:[%s9437_s12 + $0xe8] sm:$0xff] }
0x1bc7   :  { %4523 = vst.msk [vmem:[#allocation3 + $0x20] sm:$0xff] %vm2048_vm6, %v4510_v17  ;;  %v5461_v17 = vld [vmem:[%s9437_s12 + $0xf8] sm:$0xff] }
0x1bcd   :  { %v4530_v42 = vld [vmem:[#allocation3 + $0x28] sm:$0xff] }
0x1bce   :  { %v4529_v60 = vld [vmem:[#allocation3 + $0x20] sm:$0xff] }
0x1bcf   :  { %6208 = vmatprep.mubr.msk.f32.mxu1 %vm102_vm0, %v4529_v60  ;;  %v6611_v60 = vpack.c.bf16 %v5461_v17, %v5459_v53  ;;  %v6617_v53 = vpack.c.bf16 %v5470_v30, %v5469_v1  ;;  %v5487_v17 = vld [vmem:[%s9439_s14 + $0x190] sm:$0xff]  ;;  %v5462_v30 = vld [vmem:[%s9438_s13 + $0x2] sm:$0x3] }
0x1bd0   :  { %6209 = vmatmul.mubr.msk.f32.gmra.mrb[82].mxu1 %vm102_vm0, %v4530_v42  ;;  %v5458_v42 = vld [vmem:[%s9437_s12 + $0xe0] sm:$0xff] }
0x1bd1   :  { %6612 = vmatprep.subr.bf16.mxu0 %v6611_v60  ;;  %6618 = vmatpush3.bf16.msra.mxu1 %v6617_v53  ;;  %v5488_v60 = vld [vmem:[%s9439_s14 + $0x198] sm:$0xff] }
0x1bd3   :  { %v6204_v3 = vpop.f32.mrb[78].mxu1 }
0x1bd4   :  { %v4638_v50 = vadd.f32 %v6204_v3, %v9094_v26  ;;  %v4632_v57 = vpop.f32.mrb[79].mxu1  ;;  %v5460_v3 = vld [vmem:[%s9437_s12 + $0xf0] sm:$0xff]  ;;  %s7165_s12 = scalar_lea.vmem %s5218_s23, 32 }
0x1bd5   :  { %v4633_v40 = vadd.f32 %v9094_v26, %v4632_v57  ;;  %p7166_p0 = scmp.ne.s32.totalorder %s5218_s23, %s7165_s12  ;;  %p7171_p2 = scmp.lt.s32.totalorder %s7165_s12, %s7165_s12 }
0x1bd6   :  { %v4662_v12 = vadd.f32 %v4638_v50, %v8457_v5  ;;  %v6613_v50 = vpack.c.bf16 %v5460_v3, %v5458_v42  ;;  %v6619_v42 = vpack.c.bf16 %v5488_v60, %v5487_v17  ;;  %v5471_v3 = vld [vmem:[%s9439_s14 + $0x110] sm:$0xff]  ;;  %v9336_v60 = vrot.slane %v5462_v30, %v7558_v36 }
0x1bd7   :  { %v9100_v21 = vadd.f32 %v4633_v40, %v8452_v22  ;;  %p7172_p3 = por %p7171_p2, %p7170_p1 }
0x1bd8   :  { %v4674_v11 = vsel %vm102_vm0, %v4662_v12, 0.0  ;;  %6614 = vmatpush1.bf16.msra.mxu0 %v6613_v50  ;;  %v5472_v50 = vld [vmem:[%s9439_s14 + $0x118] sm:$0xff]  ;;  %6620 = vmatprep.subr.bf16.mxu1 %v6619_v42 }
0x1bd9   :  { %4675 = vadd.xlane.f32.xlu1 %v4674_v11  ;;  %v4671_v46 = vsel %vm102_vm0, %v9100_v21, 0.0  ;;  %p7173_p4 = pnand %p7172_p3, %p7166_p0 }
0x1bda   :  { %4672 = vadd.xlane.f32.xlu0 %v4671_v46 }
0x1bdb   :  { %v6207_v62 = vpop.f32.mrb[80].mxu1 }
0x1bdc   :  { %v4642_v44 = vpop.f32.mrb[81].mxu1  ;;  %v4648_v63 = vadd.f32 %v6207_v62, %v9094_v26 }
0x1bdd   :  { %v4643_v49 = vadd.f32 %v9094_v26, %v4642_v44 }
0x1bde   :  { %v9109_v5 = vadd.f32 %v4648_v63, %v8467_v14 }
0x1bdf   :  { %v4663_v7 = vadd.f32 %v4643_v49, %v8462_v37 }
0x1be0   :  { %v4680_v25 = vsel %vm102_vm0, %v9109_v5, 0.0 }
0x1be1   :  { %v4677_v22 = vsel %vm102_vm0, %v4663_v7, 0.0 }
0x1be2   :  { %4678 = vadd.xlane.f32.xlu0 %v4677_v22 }
0x1be6   :  { %4681 = vadd.xlane.f32.xlu0 %v4680_v25 }
0x1c66   :  { %v4676_v32 = vpop.xlane.xlu1 %4675 }
0x1c67   :  { %v4690_v52 = vmul.f32 0.015625, %v4676_v32  ;;  %v4673_v58 = vpop.xlane.xlu0 %4672 }
0x1c68   :  { %v4689_v24 = vmul.f32 0.015625, %v4673_v58 }
0x1c69   :  { %v9114_v16 = vsub.f32 %v4662_v12, %v4690_v52 }
0x1c6a   :  { %v9117_v29 = vsub.f32 %v9100_v21, %v4689_v24 }
0x1c6b   :  { %v4702_v37 = vmul.f32 %v9114_v16, %v9114_v16 }
0x1c6c   :  { %v4701_v14 = vmul.f32 %v9117_v29, %v9117_v29 }
0x1c6d   :  { %v4710_v48 = vsel %vm102_vm0, %v4702_v37, 0.0 }
0x1c6e   :  { %4711 = vadd.xlane.f32.xlu1 %v4710_v48  ;;  %v4707_v6 = vsel %vm102_vm0, %v4701_v14, 0.0  ;;  %v9193_v48 = vld [vmem:[%s9435_s10 + $0x1] ss:$0 sm:$0xff] }
0x1c6f   :  { %4708 = vadd.xlane.f32.xlu0 %v4707_v6  ;;  %v4679_v47 = vpop.xlane.xlu0 %4678 }
0x1c70   :  { %v4691_v13 = vmul.f32 0.015625, %v4679_v47 }
0x1c72   :  { %v9125_v41 = vsub.f32 %v4663_v7, %v4691_v13 }
0x1c73   :  { %v4682_v43 = vpop.xlane.xlu0 %4681 }
0x1c74   :  { %v4692_v35 = vmul.f32 0.015625, %v4682_v43  ;;  %v4703_v9 = vmul.f32 %v9125_v41, %v9125_v41  ;;  %v9200_v43 = vld [vmem:[%s9436_s11 + $0x1] ss:$0 sm:$0xff] }
0x1c76   :  { %v9130_v51 = vsub.f32 %v9109_v5, %v4692_v35  ;;  %v4713_v31 = vsel %vm102_vm0, %v4703_v9, 0.0 }
0x1c77   :  { %4714 = vadd.xlane.f32.xlu0 %v4713_v31 }
0x1c78   :  { %v4704_v23 = vmul.f32 %v9130_v51, %v9130_v51 }
0x1c7a   :  { %v4716_v18 = vsel %vm102_vm0, %v4704_v23, 0.0 }
0x1c7b   :  { %4717 = vadd.xlane.f32.xlu1 %v4716_v18 }
0x1ca3   :  { %v6210_v57 = vpop.f32.mrb[82].mxu1 }
0x1ca4   :  { %v4658_v40 = vadd.f32 %v6210_v57, %v9094_v26  ;;  %v4652_v12 = vpop.f32.mrb[83].mxu1  ;;  %v6621_v57 = vpack.c.bf16 %v5472_v50, %v5471_v3 }
0x1ca5   :  { %v4653_v11 = vadd.f32 %v9094_v26, %v4652_v12  ;;  %v5490_v12 = vld [vmem:[%s9439_s14 + $0x1a8] sm:$0xff] }
0x1ca6   :  { %v4666_v46 = vadd.f32 %v4658_v40, %v8477_v56  ;;  %6622 = vmatpush3.bf16.msra.mxu1 %v6621_v57  ;;  %v5489_v40 = vld [vmem:[%s9439_s14 + $0x1a0] sm:$0xff] }
0x1ca7   :  { %v4665_v62 = vadd.f32 %v4653_v11, %v8472_v15  ;;  %v6623_v11 = vpack.c.bf16 %v5490_v12, %v5489_v40 }
0x1ca8   :  { %v4686_v44 = vsel %vm102_vm0, %v4666_v46, 0.0 }
0x1ca9   :  { %4687 = vadd.xlane.f32.xlu1 %v4686_v44  ;;  %v4683_v63 = vsel %vm102_vm0, %v4665_v62, 0.0  ;;  %6624 = vmatprep.subr.bf16.mxu1 %v6623_v11 }
0x1caa   :  { %4684 = vadd.xlane.f32.xlu0 %v4683_v63  ;;  %v5491_v63 = vld [vmem:[%s9439_s14 + $0x1b0] sm:$0xff] }
0x1cfb   :  { %v4712_v49 = vpop.xlane.xlu1 %4711 }
0x1cfc   :  { %v4726_v7 = vmul.f32 0.015625, %v4712_v49  ;;  %v4709_v22 = vpop.xlane.xlu0 %4708  ;;  %v5492_v49 = vld [vmem:[%s9439_s14 + $0x1b8] sm:$0xff] }
0x1cfd   :  { %v4725_v25 = vmul.f32 0.015625, %v4709_v22  ;;  %v5475_v22 = vld [vmem:[%s9439_s14 + $0x130] sm:$0xff] }
0x1cfe   :  { %v4732_v32 = vadd.f32 1e-06, %v4726_v7  ;;  %v6627_v7 = vpack.c.bf16 %v5492_v49, %v5491_v63 }
0x1cff   :  { %v4731_v52 = vadd.f32 1e-06, %v4725_v25  ;;  %v5476_v25 = vld [vmem:[%s9439_s14 + $0x138] sm:$0xff] }
0x1d00   :  { %7119 = vrsqrt.f32 %v4732_v32  ;;  %v6629_v32 = vpack.c.bf16 %v5476_v25, %v5475_v22 }
0x1d01   :  { %7121 = vrsqrt.f32 %v4731_v52  ;;  %v5493_v52 = vld [vmem:[%s9439_s14 + $0x1c0] sm:$0xff] }
0x1d04   :  { %v4715_v58 = vpop.xlane.xlu0 %4714 }
0x1d05   :  { %v4727_v26 = vmul.f32 0.015625, %v4715_v58  ;;  %v5494_v58 = vld [vmem:[%s9439_s14 + $0x1c8] sm:$0xff] }
0x1d07   :  { %v4733_v24 = vadd.f32 1e-06, %v4727_v26  ;;  %v6631_v26 = vpack.c.bf16 %v5494_v58, %v5493_v52 }
0x1d08   :  { %v4718_v56 = vpop.xlane.xlu1 %4717 }
0x1d09   :  { %7123 = vrsqrt.f32 %v4733_v24  ;;  %v4728_v15 = vmul.f32 0.015625, %v4718_v56  ;;  %v5477_v24 = vld [vmem:[%s9439_s14 + $0x140] sm:$0xff]  ;;  %v5478_v56 = vld [vmem:[%s9439_s14 + $0x148] sm:$0xff] }
0x1d0a   :  { %v7120_v37 = vpop.eup %7119 }
0x1d0b   :  { %v7122_v14 = vpop.eup %7121  ;;  %v4734_v6 = vadd.f32 1e-06, %v4728_v15  ;;  %v4744_v13 = vmul.f32 %v7120_v37, %v9114_v16  ;;  %v6633_v15 = vpack.c.bf16 %v5478_v56, %v5477_v24  ;;  %v5495_v37 = vld [vmem:[%s9439_s14 + $0x1d0] sm:$0xff] }
0x1d0c   :  { %v4743_v47 = vmul.f32 %v7122_v14, %v9117_v29  ;;  %v5496_v14 = vld [vmem:[%s9439_s14 + $0x1d8] sm:$0xff] }
0x1d0d   :  { %7125 = vrsqrt.f32 %v4734_v6  ;;  %v4756_v31 = vmul.f32 %v9193_v48, %v4744_v13  ;;  %v5479_v6 = vld [vmem:[%s9439_s14 + $0x150] sm:$0xff]  ;;  %v5480_v13 = vld [vmem:[%s9439_s14 + $0x158] sm:$0xff] }
0x1d0e   :  { %v4755_v35 = vmul.f32 %v9193_v48, %v4743_v47  ;;  %v6635_v47 = vpack.c.bf16 %v5496_v14, %v5495_v37 }
0x1d0f   :  { %v4768_v29 = vadd.f32 %v9200_v43, %v4756_v31  ;;  %v6637_v31 = vpack.c.bf16 %v5480_v13, %v5479_v6 }
0x1d10   :  { %v4767_v9 = vadd.f32 %v9200_v43, %v4755_v35  ;;  %v5497_v35 = vld [vmem:[%s9439_s14 + $0x1e0] sm:$0xff] }
0x1d12   :  { %5463 = vmatmul.mubr.msk.f32.vlgmr.msra.gmra.mrb[84].mxu0 %vm102_vm0, %v4767_v9  ;;  %v5498_v9 = vld [vmem:[%s9439_s14 + $0x1e8] sm:$0xff] }
0x1d13   :  { %v7124_v23 = vpop.eup %7123  ;;  %4891 = vmatprep.mubr.f32.mxu0 %v7190_v10 }
0x1d14   :  { %v4745_v16 = vmul.f32 %v7124_v23, %v9125_v41  ;;  %v6639_v23 = vpack.c.bf16 %v5498_v9, %v5497_v35 }
0x1d16   :  { %5464 = vmatmul.mubr.msk.f32.gmra.mrb[86].mxu0 %vm102_vm0, %v4768_v29  ;;  %v4757_v18 = vmul.f32 %v9193_v48, %v4745_v16  ;;  %v5481_v29 = vld [vmem:[%s9439_s14 + $0x160] sm:$0xff]  ;;  %v5482_v16 = vld [vmem:[%s9439_s14 + $0x168] sm:$0xff] }
0x1d17   :  { %v7126_v19 = vpop.eup %7125  ;;  %4897 = vmatprep.mubr.f32.mxu0 %v7190_v10 }
0x1d18   :  { %v4769_v4 = vadd.f32 %v9200_v43, %v4757_v18  ;;  %v4746_v28 = vmul.f32 %v7126_v19, %v9130_v51  ;;  %v5499_v18 = vld [vmem:[%s9439_s14 + $0x1f0] sm:$0xff]  ;;  %v5500_v19 = vld [vmem:[%s9439_s14 + $0x1f8] sm:$0xff] }
0x1d1a   :  { %5465 = vmatmul.mubr.msk.f32.gmra.mrb[88].mxu0 %vm102_vm0, %v4769_v4  ;;  %v4758_v2 = vmul.f32 %v9193_v48, %v4746_v28  ;;  %v6641_v4 = vpack.c.bf16 %v5482_v16, %v5481_v29  ;;  %v6643_v28 = vpack.c.bf16 %v5500_v19, %v5499_v18 }
0x1d1b   :  { %4903 = vmatprep.mubr.f32.mxu0 %v7190_v10 }
0x1d1c   :  { %v4770_v54 = vadd.f32 %v9200_v43, %v4758_v2  ;;  %v5483_v2 = vld [vmem:[%s9439_s14 + $0x170] sm:$0xff] }
0x1d1e   :  { %5466 = vmatmul.mubr.msk.f32.gmra.mrb[90].mxu0 %vm102_vm0, %v4770_v54  ;;  %v5484_v54 = vld [vmem:[%s9439_s14 + $0x178] sm:$0xff] }
0x1d1f   :  { %4909 = vmatprep.mubr.f32.mxu0 %v7190_v10 }
0x1d36   :  { %v4688_v41 = vpop.xlane.xlu1 %4687 }
0x1d37   :  { %v4694_v45 = vmul.f32 0.015625, %v4688_v41  ;;  %v4685_v59 = vpop.xlane.xlu0 %4684  ;;  %v6645_v41 = vpack.c.bf16 %v5484_v54, %v5483_v2 }
0x1d38   :  { %v4693_v39 = vmul.f32 0.015625, %v4685_v59 }
0x1d39   :  { %v9220_v61 = vsub.f32 %v4666_v46, %v4694_v45  ;;  %v5473_v46 = vld [vmem:[%s9439_s14 + $0x120] sm:$0xff] }
0x1d3a   :  { %v9222_v55 = vsub.f32 %v4665_v62, %v4693_v39  ;;  %v5474_v62 = vld [vmem:[%s9439_s14 + $0x128] sm:$0xff] }
0x1d3b   :  { %v4706_v51 = vmul.f32 %v9220_v61, %v9220_v61  ;;  %v6625_v44 = vpack.c.bf16 %v5474_v62, %v5473_v46 }
0x1d3c   :  { %v4705_v34 = vmul.f32 %v9222_v55, %v9222_v55 }
0x1d3d   :  { %v4722_v27 = vsel %vm102_vm0, %v4706_v51, 0.0  ;;  %6626 = vmatpush3.bf16.msra.mxu1 %v6625_v44 }
0x1d3e   :  { %4723 = vadd.xlane.f32.xlu1 %v4722_v27  ;;  %v4719_v38 = vsel %vm102_vm0, %v4705_v34, 0.0  ;;  %6628 = vmatprep.subr.bf16.mxu1 %v6627_v7 }
0x1d3f   :  { %4720 = vadd.xlane.f32.xlu0 %v4719_v38 }
0x1d41   :  { %6630 = vmatpush3.bf16.msra.mxu1 %v6629_v32 }
0x1d42   :  { %6632 = vmatprep.subr.bf16.mxu1 %v6631_v26 }
0x1d45   :  { %6634 = vmatpush3.bf16.msra.mxu1 %v6633_v15 }
0x1d46   :  { %6636 = vmatprep.subr.bf16.mxu1 %v6635_v47 }
0x1d49   :  { %6638 = vmatpush3.bf16.msra.mxu1 %v6637_v31 }
0x1d4a   :  { %6640 = vmatprep.subr.bf16.mxu1 %v6639_v23 }
0x1d4d   :  { %6642 = vmatpush3.bf16.msra.mxu1 %v6641_v4 }
0x1d4e   :  { %6644 = vmatprep.subr.bf16.mxu1 %v6643_v28 }
0x1d51   :  { %6646 = vmatpush3.bf16.msra.mxu1 %v6645_v41 }
0x1dcb   :  { %v4724_v45 = vpop.xlane.xlu1 %4723 }
0x1dcc   :  { %v4730_v59 = vmul.f32 0.015625, %v4724_v45  ;;  %v4721_v39 = vpop.xlane.xlu0 %4720 }
0x1dcd   :  { %v4729_v51 = vmul.f32 0.015625, %v4721_v39 }
0x1dce   :  { %v4736_v34 = vadd.f32 1e-06, %v4730_v59 }
0x1dcf   :  { %v4735_v27 = vadd.f32 1e-06, %v4729_v51 }
0x1dd0   :  { %7127 = vrsqrt.f32 %v4736_v34 }
0x1dd1   :  { %7129 = vrsqrt.f32 %v4735_v27 }
0x1dda   :  { %v7128_v38 = vpop.eup %7127 }
0x1ddb   :  { %v7130_v20 = vpop.eup %7129  ;;  %v4748_v1 = vmul.f32 %v7128_v38, %v9220_v61 }
0x1ddc   :  { %v4747_v33 = vmul.f32 %v7130_v20, %v9222_v55  ;;  %v9340_v55 = vrot.slane %v5462_v30, %v7563_v0 }
0x1ddd   :  { %v4760_v17 = vmul.f32 %v9193_v48, %v4748_v1 }
0x1dde   :  { %v4759_v8 = vmul.f32 %v9193_v48, %v4747_v33 }
0x1ddf   :  { %v4772_v61 = vadd.f32 %v9200_v43, %v4760_v17 }
0x1de0   :  { %v4771_v53 = vadd.f32 %v9200_v43, %v4759_v8 }
0x1de2   :  { %5467 = vmatmul.mubr.msk.f32.gmra.mrb[92].mxu0 %vm102_vm0, %v4771_v53 }
0x1de3   :  { %4915 = vmatprep.mubr.f32.mxu0 %v7190_v10 }
0x1de5   :  { %v4887_v42 = vpop.f32.mrb[84].mxu0 }
0x1de6   :  { %v9344_v3 = vadd.f32 %v4887_v42, %v9336_v60  ;;  %v4889_v50 = vpop.f32.mrb[85].mxu0  ;;  %5468 = vmatmul.mubr.msk.f32.gmra.mrb[94].mxu0 %vm102_vm0, %v4772_v61 }
0x1de7   :  { %v4890_v48 = vadd.f32 %v4889_v50, %v9340_v55 }
0x1de8   :  { %v4934_v57 = vmul.f32 0.044715, %v9344_v3  ;;  %v4922_v50 = vmul.f32 0.5, %v9344_v3 }
0x1de9   :  { %v4935_v36 = vmul.f32 0.044715, %v4890_v48  ;;  %v4893_v40 = vpop.f32.mrb[86].mxu0  ;;  %v4923_v61 = vmul.f32 0.5, %v4890_v48 }
0x1dea   :  { %v4946_v10 = vmul.f32 %v4934_v57, %v9344_v3  ;;  %v9351_v0 = vadd.f32 %v4893_v40, %v9336_v60  ;;  %v4895_v12 = vpop.f32.mrb[87].mxu0 }
0x1deb   :  { %v4947_v43 = vmul.f32 %v4935_v36, %v4890_v48  ;;  %v9354_v11 = vadd.f32 %v4895_v12, %v9340_v55 }
0x1dec   :  { %v4958_v46 = vmul.f32 %v4946_v10, %v9344_v3  ;;  %v4936_v62 = vmul.f32 0.044715, %v9351_v0 }
0x1ded   :  { %v4937_v44 = vmul.f32 0.044715, %v9354_v11  ;;  %v4899_v63 = vpop.f32.mrb[88].mxu0  ;;  %v4959_v49 = vmul.f32 %v4947_v43, %v4890_v48  ;;  %v4925_v43 = vmul.f32 0.5, %v9354_v11 }
0x1dee   :  { %v4970_v7 = vadd.f32 %v4958_v46, %v9344_v3  ;;  %v4948_v22 = vmul.f32 %v4936_v62, %v9351_v0  ;;  %v9362_v25 = vadd.f32 %v4899_v63, %v9336_v60  ;;  %v4901_v32 = vpop.f32.mrb[89].mxu0  ;;  %v4924_v62 = vmul.f32 0.5, %v9351_v0 }
0x1def   :  { %v4949_v52 = vmul.f32 %v4937_v44, %v9354_v11  ;;  %v9366_v58 = vadd.f32 %v4901_v32, %v9340_v55  ;;  %v4971_v26 = vadd.f32 %v4959_v49, %v4890_v48 }
0x1df0   :  { %v4982_v24 = vmul.f32 0.7978846, %v4970_v7  ;;  %v4938_v56 = vmul.f32 0.044715, %v9362_v25  ;;  %v4960_v15 = vmul.f32 %v4948_v22, %v9351_v0  ;;  %v4926_v32 = vmul.f32 0.5, %v9362_v25 }
0x1df1   :  { %v4939_v37 = vmul.f32 0.044715, %v9366_v58  ;;  %v4905_v14 = vpop.f32.mrb[90].mxu0  ;;  %v4983_v6 = vmul.f32 0.7978846, %v4971_v26  ;;  %v4961_v47 = vmul.f32 %v4949_v52, %v9354_v11  ;;  %v4927_v3 = vmul.f32 0.5, %v9366_v58 }
0x1df2   :  { %7131 = vtanh.f32 %v4982_v24  ;;  %v4950_v13 = vmul.f32 %v4938_v56, %v9362_v25  ;;  %v9374_v35 = vadd.f32 %v4905_v14, %v9336_v60  ;;  %v4907_v9 = vpop.f32.mrb[91].mxu0  ;;  %v4972_v31 = vadd.f32 %v4960_v15, %v9351_v0 }
0x1df3   :  { %v4951_v23 = vmul.f32 %v4939_v37, %v9366_v58  ;;  %v4908_v29 = vadd.f32 %v4907_v9, %v9340_v55  ;;  %7133 = vtanh.f32 %v4983_v6  ;;  %v4973_v16 = vadd.f32 %v4961_v47, %v9354_v11 }
0x1df4   :  { %v4940_v18 = vmul.f32 0.044715, %v9374_v35  ;;  %v4984_v19 = vmul.f32 0.7978846, %v4972_v31  ;;  %v4962_v4 = vmul.f32 %v4950_v13, %v9362_v25  ;;  %v4928_v37 = vmul.f32 0.5, %v9374_v35 }
0x1df5   :  { %v4941_v28 = vmul.f32 0.044715, %v4908_v29  ;;  %v4985_v2 = vmul.f32 0.7978846, %v4973_v16  ;;  %v4963_v54 = vmul.f32 %v4951_v23, %v9366_v58  ;;  %v4929_v15 = vmul.f32 0.5, %v4908_v29 }
0x1df6   :  { %v4952_v41 = vmul.f32 %v4940_v18, %v9374_v35  ;;  %7135 = vtanh.f32 %v4984_v19  ;;  %v4974_v45 = vadd.f32 %v4962_v4, %v9362_v25 }
0x1df7   :  { %v4953_v59 = vmul.f32 %v4941_v28, %v4908_v29  ;;  %7137 = vtanh.f32 %v4985_v2  ;;  %v4975_v39 = vadd.f32 %v4963_v54, %v9366_v58 }
0x1df8   :  { %v4986_v51 = vmul.f32 0.7978846, %v4974_v45  ;;  %v4964_v34 = vmul.f32 %v4952_v41, %v9374_v35 }
0x1df9   :  { %v4987_v27 = vmul.f32 0.7978846, %v4975_v39  ;;  %v4965_v38 = vmul.f32 %v4953_v59, %v4908_v29 }
0x1dfa   :  { %7139 = vtanh.f32 %v4986_v51  ;;  %v4976_v20 = vadd.f32 %v4964_v34, %v9374_v35 }
0x1dfb   :  { %7141 = vtanh.f32 %v4987_v27  ;;  %v4977_v33 = vadd.f32 %v4965_v38, %v4908_v29 }
0x1dfc   :  { %v7132_v1 = vpop.eup %7131  ;;  %v4988_v8 = vmul.f32 0.7978846, %v4976_v20 }
0x1dfd   :  { %v7134_v30 = vpop.eup %7133  ;;  %v5006_v53 = vadd.f32 1.0, %v7132_v1  ;;  %v4989_v17 = vmul.f32 0.7978846, %v4977_v33 }
0x1dfe   :  { %v5007_v42 = vadd.f32 1.0, %v7134_v30  ;;  %7143 = vtanh.f32 %v4988_v8 }
0x1dff   :  { %7145 = vtanh.f32 %v4989_v17  ;;  %v5018_v10 = vmul.f32 %v5006_v53, %v4922_v50 }
0x1e00   :  { %v7136_v57 = vpop.eup %7135  ;;  %v5019_v36 = vmul.f32 %v5007_v42, %v4923_v61 }
0x1e01   :  { %v7138_v40 = vpop.eup %7137  ;;  %v5008_v12 = vadd.f32 1.0, %v7136_v57 }
0x1e02   :  { %5135 = vmatprep.mubr.f32.mxu1 %v5019_v36  ;;  %v5009_v46 = vadd.f32 1.0, %v7138_v40 }
0x1e03   :  { %5136 = vmatmul.mubr.f32.vlgmr.msra.gmra.mrb[84].mxu1 %v5018_v10  ;;  %v5020_v49 = vmul.f32 %v5008_v12, %v4924_v62 }
0x1e04   :  { %v7140_v44 = vpop.eup %7139  ;;  %v5021_v63 = vmul.f32 %v5009_v46, %v4925_v43 }
0x1e05   :  { %v7142_v48 = vpop.eup %7141  ;;  %v5010_v7 = vadd.f32 1.0, %v7140_v44 }
0x1e06   :  { %5140 = vmatprep.mubr.f32.mxu1 %v5021_v63  ;;  %v5011_v22 = vadd.f32 1.0, %v7142_v48  ;;  %v5502_v63 = vld [vmem:[%s9440_s15 + $0x1] ss:$0 sm:$0xff] }
0x1e07   :  { %5141 = vmatmul.mubr.f32.gmra.mrb[86].mxu1 %v5020_v49  ;;  %v5022_v11 = vmul.f32 %v5010_v7, %v4926_v32 }
0x1e08   :  { %v7144_v52 = vpop.eup %7143  ;;  %v5023_v26 = vmul.f32 %v5011_v22, %v4927_v3 }
0x1e09   :  { %v7146_v24 = vpop.eup %7145  ;;  %v5012_v56 = vadd.f32 1.0, %v7144_v52 }
0x1e0a   :  { %5144 = vmatprep.mubr.f32.mxu1 %v5023_v26  ;;  %v5013_v0 = vadd.f32 1.0, %v7146_v24 }
0x1e0b   :  { %5145 = vmatmul.mubr.f32.gmra.mrb[88].mxu1 %v5022_v11  ;;  %v5024_v6 = vmul.f32 %v5012_v56, %v4928_v37 }
0x1e0c   :  { %v5025_v14 = vmul.f32 %v5013_v0, %v4929_v15 }
0x1e0e   :  { %5148 = vmatprep.mubr.f32.mxu1 %v5025_v14 }
0x1e0f   :  { %5149 = vmatmul.mubr.f32.gmra.mrb[90].mxu1 %v5024_v6 }
0x1eb5   :  { %v4911_v58 = vpop.f32.mrb[92].mxu0 }
0x1eb6   :  { %v4912_v47 = vadd.f32 %v4911_v58, %v9336_v60  ;;  %v4913_v13 = vpop.f32.mrb[93].mxu0 }
0x1eb7   :  { %v4914_v25 = vadd.f32 %v4913_v13, %v9340_v55 }
0x1eb8   :  { %v4942_v9 = vmul.f32 0.044715, %v4912_v47  ;;  %v4930_v61 = vmul.f32 0.5, %v4912_v47 }
0x1eb9   :  { %v4943_v31 = vmul.f32 0.044715, %v4914_v25  ;;  %v4917_v23 = vpop.f32.mrb[94].mxu0  ;;  %v4931_v53 = vmul.f32 0.5, %v4914_v25 }
0x1eba   :  { %v4954_v16 = vmul.f32 %v4942_v9, %v4912_v47  ;;  %v4918_v29 = vadd.f32 %v4917_v23, %v9336_v60  ;;  %v4919_v18 = vpop.f32.mrb[95].mxu0 }
0x1ebb   :  { %v4955_v19 = vmul.f32 %v4943_v31, %v4914_v25  ;;  %v4920_v35 = vadd.f32 %v4919_v18, %v9340_v55 }
0x1ebc   :  { %v4944_v4 = vmul.f32 0.044715, %v4918_v29  ;;  %v4966_v28 = vmul.f32 %v4954_v16, %v4912_v47  ;;  %v4932_v43 = vmul.f32 0.5, %v4918_v29 }
0x1ebd   :  { %v4945_v2 = vmul.f32 0.044715, %v4920_v35  ;;  %v4967_v54 = vmul.f32 %v4955_v19, %v4914_v25  ;;  %v4933_v10 = vmul.f32 0.5, %v4920_v35 }
0x1ebe   :  { %v4956_v41 = vmul.f32 %v4944_v4, %v4918_v29  ;;  %v4978_v45 = vadd.f32 %v4966_v28, %v4912_v47 }
0x1ebf   :  { %v4957_v59 = vmul.f32 %v4945_v2, %v4920_v35  ;;  %v4979_v39 = vadd.f32 %v4967_v54, %v4914_v25 }
0x1ec0   :  { %v4990_v51 = vmul.f32 0.7978846, %v4978_v45  ;;  %v4968_v34 = vmul.f32 %v4956_v41, %v4918_v29 }
0x1ec1   :  { %v4991_v27 = vmul.f32 0.7978846, %v4979_v39  ;;  %v4969_v38 = vmul.f32 %v4957_v59, %v4920_v35  ;;  %v5503_v59 = vld [vmem:[%s9441_s16] ss:$0 sm:$0xff] }
0x1ec2   :  { %7147 = vtanh.f32 %v4990_v51  ;;  %v4980_v20 = vadd.f32 %v4968_v34, %v4918_v29  ;;  %v5504_v51 = vld [vmem:[%s9442_s17] ss:$0 sm:$0xff] }
0x1ec3   :  { %7149 = vtanh.f32 %v4991_v27  ;;  %v4981_v60 = vadd.f32 %v4969_v38, %v4920_v35 }
0x1ec4   :  { %v4992_v33 = vmul.f32 0.7978846, %v4980_v20 }
0x1ec5   :  { %v4993_v1 = vmul.f32 0.7978846, %v4981_v60 }
0x1ec6   :  { %7151 = vtanh.f32 %v4992_v33 }
0x1ec7   :  { %7153 = vtanh.f32 %v4993_v1 }
0x1ecc   :  { %v7148_v55 = vpop.eup %7147 }
0x1ecd   :  { %v7150_v8 = vpop.eup %7149  ;;  %v5014_v30 = vadd.f32 1.0, %v7148_v55 }
0x1ece   :  { %v5015_v17 = vadd.f32 1.0, %v7150_v8 }
0x1ecf   :  { %v5026_v36 = vmul.f32 %v5014_v30, %v4930_v61 }
0x1ed0   :  { %v7152_v42 = vpop.eup %7151  ;;  %v5027_v50 = vmul.f32 %v5015_v17, %v4931_v53 }
0x1ed1   :  { %v7154_v57 = vpop.eup %7153  ;;  %v5016_v40 = vadd.f32 1.0, %v7152_v42 }
0x1ed2   :  { %5153 = vmatprep.mubr.f32.mxu1 %v5027_v50  ;;  %v5017_v12 = vadd.f32 1.0, %v7154_v57 }
0x1ed3   :  { %5154 = vmatmul.mubr.f32.gmra.mrb[92].mxu1 %v5026_v36  ;;  %v5028_v62 = vmul.f32 %v5016_v40, %v4932_v43 }
0x1ed4   :  { %v5029_v46 = vmul.f32 %v5017_v12, %v4933_v10 }
0x1ed6   :  { %v5807_v44 = vpop.f32.mrb[84].mxu1  ;;  %5157 = vmatprep.mubr.f32.mxu1 %v5029_v46 }
0x1ed7   :  { %v5808_v48 = vpop.f32.mrb[85].mxu1  ;;  %5158 = vmatmul.mubr.f32.gmra.mrb[94].mxu1 %v5028_v62 }
0x1ed8   :  { %v5809_v49 = vadd.f32 %v5808_v48, %v5807_v44 }
0x1eda   :  { %v5138_v7 = vadd.f32 %v5809_v49, %v5502_v63  ;;  %v5810_v3 = vpop.f32.mrb[86].mxu1 }
0x1edb   :  { %v5811_v22 = vpop.f32.mrb[87].mxu1 }
0x1edc   :  { %v5162_v32 = vadd.f32 %v5138_v7, %v9100_v21 }
0x1ede   :  { %v5813_v52 = vpop.f32.mrb[88].mxu1  ;;  %v5166_v26 = vsel %vm102_vm0, %v5162_v32, 0.0 }
0x1edf   :  { %v5814_v24 = vpop.f32.mrb[89].mxu1  ;;  %5167 = vadd.xlane.f32.xlu0 %v5166_v26 }
0x1ee2   :  { %v5816_v11 = vpop.f32.mrb[90].mxu1 }
0x1ee3   :  { %v5817_v56 = vpop.f32.mrb[91].mxu1 }
0x1ee4   :  { %v5818_v15 = vadd.f32 %v5817_v56, %v5816_v11 }
0x1ee6   :  { %v5151_v0 = vadd.f32 %v5818_v15, %v5502_v63 }
0x1ee8   :  { %v5163_v37 = vadd.f32 %v5151_v0, %v9109_v5 }
0x1eea   :  { %v5169_v14 = vsel %vm102_vm0, %v5163_v37, 0.0 }
0x1eeb   :  { %5170 = vadd.xlane.f32.xlu1 %v5169_v14 }
0x1f6c   :  { %v5168_v6 = vpop.xlane.xlu0 %5167 }
0x1f6d   :  { %v5172_v58 = vmul.f32 0.015625, %v5168_v6 }
0x1f6f   :  { %v5174_v47 = vsub.f32 %v5162_v32, %v5172_v58 }
0x1f71   :  { %v5176_v13 = vmul.f32 %v5174_v47, %v5174_v47 }
0x1f73   :  { %v5178_v21 = vsel %vm102_vm0, %v5176_v13, 0.0 }
0x1f74   :  { %5179 = vadd.xlane.f32.xlu0 %v5178_v21 }
0x1f78   :  { %v5171_v25 = vpop.xlane.xlu1 %5170 }
0x1f79   :  { %v5173_v9 = vmul.f32 0.015625, %v5171_v25 }
0x1f7b   :  { %v5175_v31 = vsub.f32 %v5163_v37, %v5173_v9 }
0x1f7d   :  { %v5177_v23 = vmul.f32 %v5175_v31, %v5175_v31 }
0x1f7f   :  { %v5181_v16 = vsel %vm102_vm0, %v5177_v23, 0.0 }
0x1f80   :  { %5182 = vadd.xlane.f32.xlu1 %v5181_v16 }
0x1fa6   :  { %v5819_v29 = vpop.f32.mrb[92].mxu1 }
0x1fa7   :  { %v5820_v18 = vpop.f32.mrb[93].mxu1 }
0x1faa   :  { %v5822_v5 = vpop.f32.mrb[94].mxu1 }
0x1fab   :  { %v5823_v19 = vpop.f32.mrb[95].mxu1 }
0x2001   :  { %v5180_v35 = vpop.xlane.xlu0 %5179 }
0x2002   :  { %v5184_v4 = vmul.f32 0.015625, %v5180_v35 }
0x2004   :  { %v5186_v28 = vadd.f32 1e-06, %v5184_v4 }
0x2006   :  { %7155 = vrsqrt.f32 %v5186_v28 }
0x200d   :  { %v5183_v2 = vpop.xlane.xlu1 %5182 }
0x200e   :  { %v5185_v54 = vmul.f32 0.015625, %v5183_v2 }
0x2010   :  { %v7156_v41 = vpop.eup %7155  ;;  %v5187_v45 = vadd.f32 1e-06, %v5185_v54 }
0x2011   :  { %v5190_v39 = vmul.f32 %v7156_v41, %v5174_v47 }
0x2012   :  { %7157 = vrsqrt.f32 %v5187_v45 }
0x2013   :  { %v5198_v34 = vmul.f32 %v5503_v59, %v5190_v39 }
0x2015   :  { %v5206_v27 = vadd.f32 %v5504_v51, %v5198_v34 }
0x2017   :  { %5209 = vst.msk [vmem:[#allocation4] sm:$0x1] %vm5208_vm7, %v5206_v27 }
0x201c   :  { %v7158_v38 = vpop.eup %7157 }
0x201d   :  { %v5191_v20 = vmul.f32 %v7158_v38, %v5175_v31 }
0x201f   :  { %v5199_v60 = vmul.f32 %v5503_v59, %v5191_v20 }
0x2021   :  { %v5207_v33 = vadd.f32 %v5504_v51, %v5199_v60 }
0x2023   :  { %5210 = vst.msk [vmem:[#allocation4 + $0x1] sm:$0x1] %vm5208_vm7, %v5207_v33 }
0x2024   :  { %7176 = shalt.err (!%p7173_p4)
}
0x2025   :  { %s7177_s29 = scalar_lea.hbm %s9443_s18, 32 }
0x2026   :  { %p7178_p5 = scmp.ne.s32.totalorder %s9443_s18, %s7177_s29  ;;  %p7181_p6 = scmp.lt.u32.totalorder %s7177_s29, %s9443_s18 }
0x2028   :  { %p7183_p7 = pnand %p7181_p6, %p7178_p5 }
0x202a   :  { %7186 = shalt.err (!%p7183_p7)
}
0x202b   :  { %5220 = dma.vmem_to_hbm [thread:$0]  %s5218_s23, 32, %s9443_s18, [#allocation5]  }
0x202c   :  { %7187 = dma.done.wait [#allocation5], 32  }
0x202d   :  { %7188 = vsyncadd [#allocation5], 4294967264 }
0x202e   :  { %5224 = vsyncpa [#allocation5], 1 }

</bundles_post_ra>
